<compile_context>
chip_gen: v7x
topology: tpu7x:2x2x1
jax: 0.10.0
libtpu: 0.0.40
codegen_flags: <defaults>
</compile_context>

<pallas_src>
import functools

import jax
import jax.numpy as jnp
from jax import lax
from jax.experimental import pallas as pl
from jax.experimental.pallas import tpu as pltpu


def _fused_rcu_kernel(xt_ref, xm_ref, xb_ref, w1_ref, b1_ref, w2_ref, b2_ref,
                      o_ref, xpad_ref, hpad_ref):
    """One (batch, row-tile) grid step of the fused ResidualConvUnit.

    xt_ref  : (2,  W, C)  two x rows just above the tile (halo; junk at r == 0)
    xm_ref  : (TH, W, C)  the tile's own x rows (also used for the residual)
    xb_ref  : (2,  W, C)  two x rows just below the tile (halo; junk at r == last)
    w*_ref  : (3, 3C, C)  conv weights, one (kw*Cin, Cout) matrix per kh tap
    b*_ref  : (1, C)
    o_ref   : (TH, W, C)
    xpad_ref: (TH+4, W+2, C) f32 scratch -- relu(x) with a zero halo
    hpad_ref: (TH+2, W+2, C) f32 scratch -- conv1 activation with a zero halo
    """
    TH, W, C = o_ref.shape
    r = pl.program_id(1)
    nrt = pl.num_programs(1)

    # ---- Stage x: zero halo + relu(x) interior (ReLU applied exactly once).
    xpad_ref[...] = jnp.zeros_like(xpad_ref)
    xpad_ref[2:TH + 2, 1:W + 1, :] = jnp.maximum(xm_ref[...], 0.0)

    @pl.when(r > 0)
    def _():                                   # top halo rows (interior tiles)
        xpad_ref[0:2, 1:W + 1, :] = jnp.maximum(xt_ref[...], 0.0)

    @pl.when(r < nrt - 1)
    def _():                                   # bottom halo rows
        xpad_ref[TH + 2:TH + 4, 1:W + 1, :] = jnp.maximum(xb_ref[...], 0.0)

    def _conv3x3(src_ref, w_ref, rows):
        # 3 matmuls with contraction 3*C: concat the three kw shifts on the
        # channel axis so the MXU sees K = 3C instead of 9 tiny K = C taps.
        taps = []
        for kh in range(3):
            patch = jnp.concatenate(
                [src_ref[kh:kh + rows, kw:kw + W, :] for kw in range(3)],
                axis=-1)
            taps.append(jnp.dot(patch.reshape(rows * W, 3 * C), w_ref[kh],
                                preferred_element_type=jnp.float32))
        return taps[0] + taps[1] + taps[2]

    # ---- conv1 on TH+2 rows (the extra top/bottom row feeds conv2's halo).
    R1 = TH + 2
    h = jnp.maximum(_conv3x3(xpad_ref, w1_ref, R1) + b1_ref[...], 0.0)
    h = h.reshape(R1, W, C)

    # ---- Stage h: zero halo.  At the image border conv2's halo rows must be
    #      zero padding of h (NOT conv1 evaluated past the edge), so the halo
    #      rows are only written for interior tiles.
    hpad_ref[...] = jnp.zeros_like(hpad_ref)
    hpad_ref[1:TH + 1, 1:W + 1, :] = h[1:TH + 1]

    @pl.when(r > 0)
    def _():
        hpad_ref[0:1, 1:W + 1, :] = h[0:1]

    @pl.when(r < nrt - 1)
    def _():
        hpad_ref[TH + 1:TH + 2, 1:W + 1, :] = h[TH + 1:TH + 2]

    # ---- conv2 + bias + residual add.
    out = _conv3x3(hpad_ref, w2_ref, TH) + b2_ref[...]
    out = out.reshape(TH, W, C) + xm_ref[...].astype(jnp.float32)
    o_ref[...] = out.astype(o_ref.dtype)


def _pick_row_tile(H, W, C, budget_bytes=12 << 20):
    """Largest even divisor of H whose fused working set fits a VMEM budget
    (conservative so double-buffered blocks stay under v7x's scoped limit)."""
    def est(th):
        f32 = 4
        xpad = (th + 4) * (W + 2) * C
        hpad = (th + 2) * (W + 2) * C
        io = 2 * (2 * th * W * C + 4 * W * C)       # double-buffered in/out blocks
        live = 4 * (th + 2) * W * C                 # concat patch + f32 accumulator
        wts = 2 * (9 * C * C + C)
        return f32 * (xpad + hpad + io + live + wts)

    evens = [t for t in range(H, 1, -1) if H % t == 0 and t % 2 == 0]
    for t in evens:
        if est(t) <= budget_bytes:
            return t
    return evens[-1] if evens else H                # odd H -> single row tile


@functools.partial(jax.jit, static_argnames=("row_tile",))
def residual_conv_unit(x_nchw, w1, b1, w2, b2, row_tile=None):
    """Pallas implementation of ResidualConvUnit.forward.

    x_nchw: (B, C, H, W) f32 (PyTorch NCHW), w1/w2: (C, C, 3, 3) OIHW, b1/b2: (C,)
    returns (B, C, H, W) f32
    """
    B, C, H, W = x_nchw.shape

    # Boundary layout glue only: PyTorch NCHW/OIHW -> channels-last so the conv
    # contraction / output channels sit on the MXU lane axis.
    x = jnp.transpose(x_nchw, (0, 2, 3, 1))                       # (B, H, W, C)
    w1r = jnp.transpose(w1, (2, 3, 1, 0)).reshape(3, 3 * C, C)    # (kh, kw*Cin, Cout)
    w2r = jnp.transpose(w2, (2, 3, 1, 0)).reshape(3, 3 * C, C)
    b1r = b1.reshape(1, C)
    b2r = b2.reshape(1, C)

    TH = _pick_row_tile(H, W, C) if row_tile is None else int(row_tile)
    if H % TH != 0 or (TH != H and TH % 2 != 0):
        raise ValueError(f"row_tile={TH} must be an even divisor of H={H}")
    RT = H // TH
    th_blk = max(TH // 2, 1)        # row-tile extent in 2-row halo blocks
    n_hblk = max(H // 2, 1)         # number of 2-row halo blocks along H

    # x is passed three times: its own rows, plus 2-row halo blocks above/below
    # (clamped at the image border and masked to zero inside the kernel).
    x_top_spec = pl.BlockSpec(
        (None, 2, W, C), lambda b, r: (b, jnp.maximum(r * th_blk - 1, 0), 0, 0))
    x_mid_spec = pl.BlockSpec((None, TH, W, C), lambda b, r: (b, r, 0, 0))
    x_bot_spec = pl.BlockSpec(
        (None, 2, W, C),
        lambda b, r: (b, jnp.minimum((r + 1) * th_blk, n_hblk - 1), 0, 0))
    w_spec = pl.BlockSpec((3, 3 * C, C), lambda b, r: (0, 0, 0))
    b_spec = pl.BlockSpec((1, C), lambda b, r: (0, 0))
    out_spec = pl.BlockSpec((None, TH, W, C), lambda b, r: (b, r, 0, 0))

    y = pl.pallas_call(
        _fused_rcu_kernel,
        out_shape=jax.ShapeDtypeStruct((B, H, W, C), x.dtype),
        grid_spec=pltpu.PrefetchScalarGridSpec(
            num_scalar_prefetch=0,
            grid=(B, RT),
            in_specs=[x_top_spec, x_mid_spec, x_bot_spec,
                      w_spec, b_spec, w_spec, b_spec],
            out_specs=out_spec,
            scratch_shapes=[pltpu.VMEM((TH + 4, W + 2, C), jnp.float32),
                            pltpu.VMEM((TH + 2, W + 2, C), jnp.float32)]),
        compiler_params=pltpu.CompilerParams(
            dimension_semantics=("parallel", "parallel"),
            vmem_limit_bytes=32 * 1024 * 1024),
    )(x, x, x, w1r, b1r, w2r, b2r)

    return jnp.transpose(y, (0, 3, 1, 2))                         # back to NCHW


def _reference(x_nchw, w1, b1, w2, b2):
    """Pure-JAX reference mirroring the PyTorch forward (sanity check)."""
    dn = ("NCHW", "OIHW", "NCHW")
    out = jnp.maximum(x_nchw, 0.0)
    out = lax.conv_general_dilated(out, w1, (1, 1), "SAME",
                                   dimension_numbers=dn) + b1[None, :, None, None]
    out = jnp.maximum(out, 0.0)
    out = lax.conv_general_dilated(out, w2, (1, 1), "SAME",
                                   dimension_numbers=dn) + b2[None, :, None, None]
    return out + x_nchw


if __name__ == "__main__":
    B, C, H, W = 2, 4, 16, 16

    key = jax.random.PRNGKey(0)
    kx, kw1, kb1, kw2, kb2 = jax.random.split(key, 5)

    x = jax.random.normal(kx, (B, C, H, W), dtype=jnp.float32)
    w1 = 0.1 * jax.random.normal(kw1, (C, C, 3, 3), dtype=jnp.float32)
    b1 = 0.1 * jax.random.normal(kb1, (C,), dtype=jnp.float32)
    w2 = 0.1 * jax.random.normal(kw2, (C, C, 3, 3), dtype=jnp.float32)
    b2 = 0.1 * jax.random.normal(kb2, (C,), dtype=jnp.float32)

    y_ref = _reference(x, w1, b1, w2, b2)

    # Auto-picked row tile (full image rows here).
    y = jax.block_until_ready(residual_conv_unit(x, w1, b1, w2, b2))
    assert y.shape == (B, C, H, W)
    assert jnp.max(jnp.abs(y - y_ref)) < 1e-4, "mismatch vs reference (auto tile)"

    # Forced multi-row-tile path: exercises halo fetch + border masking.
    y4 = jax.block_until_ready(residual_conv_unit(x, w1, b1, w2, b2, row_tile=4))
    assert jnp.max(jnp.abs(y4 - y_ref)) < 1e-4, "mismatch vs reference (row_tile=4)"

    print("KERNEL_OK")
</pallas_src>

<mosaic_0001>
module attributes {stable_mosaic.version = 11 : i64} {
  func.func @_fused_rcu_kernel(%arg0: i32, %arg1: i32, %arg2: memref<1x2x16x4xf32, #tpu.memory_space<vmem>>, %arg3: memref<1x16x16x4xf32, #tpu.memory_space<vmem>>, %arg4: memref<1x2x16x4xf32, #tpu.memory_space<vmem>>, %arg5: memref<3x12x4xf32, #tpu.memory_space<vmem>>, %arg6: memref<1x4xf32, #tpu.memory_space<vmem>>, %arg7: memref<3x12x4xf32, #tpu.memory_space<vmem>>, %arg8: memref<1x4xf32, #tpu.memory_space<vmem>>, %arg9: memref<1x16x16x4xf32, #tpu.memory_space<vmem>>, %arg10: memref<20x18x4xf32, #tpu.memory_space<vmem>>, %arg11: memref<18x18x4xf32, #tpu.memory_space<vmem>>) attributes {dimension_semantics = [#tpu.dimension_semantics<parallel>, #tpu.dimension_semantics<parallel>], iteration_bounds = array<i64: 2, 1>, scalar_prefetch = 0 : i64, scratch_operands = 2 : i64, tpu.core_type = #tpu.core_type<tc>, window_params = [{transform_indices = @transform_0, window_bounds = array<i64: 1, 2, 16, 4>}, {transform_indices = @transform_1, window_bounds = array<i64: 1, 16, 16, 4>}, {transform_indices = @transform_2, window_bounds = array<i64: 1, 2, 16, 4>}, {pipeline_mode = #tpu.pipeline_mode<synchronous>, transform_indices = @transform_3, window_bounds = array<i64: 3, 12, 4>}, {pipeline_mode = #tpu.pipeline_mode<synchronous>, transform_indices = @transform_4, window_bounds = array<i64: 1, 4>}, {pipeline_mode = #tpu.pipeline_mode<synchronous>, transform_indices = @transform_5, window_bounds = array<i64: 3, 12, 4>}, {pipeline_mode = #tpu.pipeline_mode<synchronous>, transform_indices = @transform_6, window_bounds = array<i64: 1, 4>}, {transform_indices = @transform_7, window_bounds = array<i64: 1, 16, 16, 4>}]} {
    %cst = arith.constant 0.000000e+00 : f32
    %0 = vector.broadcast %cst : f32 to vector<20x18x4xf32>
    %c0 = arith.constant 0 : index
    %c0_0 = arith.constant 0 : index
    %c0_1 = arith.constant 0 : index
    %1 = vector.load %arg10[%c0, %c0_0, %c0_1] : memref<20x18x4xf32, #tpu.memory_space<vmem>>, vector<20x18x4xf32>
    tpu.vector_store %arg10[%c0, %c0_0, %c0_1], %0 {strides = array<i32>} : memref<20x18x4xf32, #tpu.memory_space<vmem>>, vector<20x18x4xf32>,
    %c0_2 = arith.constant 0 : index
    %c0_3 = arith.constant 0 : index
    %c0_4 = arith.constant 0 : index
    %c0_5 = arith.constant 0 : index
    %2 = vector.load %arg3[%c0_2, %c0_3, %c0_4, %c0_5] : memref<1x16x16x4xf32, #tpu.memory_space<vmem>>, vector<1x16x16x4xf32>
    %3 = vector.shape_cast %2 : vector<1x16x16x4xf32> to vector<16x16x4xf32>
    %cst_6 = arith.constant 0.000000e+00 : f32
    %4 = vector.broadcast %cst_6 : f32 to vector<16x16x4xf32>
    %5 = arith.maximumf %3, %4 : vector<16x16x4xf32>
    %c2 = arith.constant 2 : index
    %c1 = arith.constant 1 : index
    %c0_7 = arith.constant 0 : index
    %6 = vector.load %arg10[%c2, %c1, %c0_7] : memref<20x18x4xf32, #tpu.memory_space<vmem>>, vector<16x16x4xf32>
    tpu.vector_store %arg10[%c2, %c1, %c0_7], %5 {strides = array<i32>} : memref<20x18x4xf32, #tpu.memory_space<vmem>>, vector<16x16x4xf32>,
    %c0_i32 = arith.constant 0 : i32
    %7 = arith.cmpi sgt, %arg1, %c0_i32 : i32
    %8 = arith.extui %7 : i1 to i32
    %c0_i32_8 = arith.constant 0 : i32
    %9 = arith.cmpi ne, %8, %c0_i32_8 : i32
    scf.if %9 {
      %c0_113 = arith.constant 0 : index
      %c0_114 = arith.constant 0 : index
      %c0_115 = arith.constant 0 : index
      %c0_116 = arith.constant 0 : index
      %91 = vector.load %arg2[%c0_113, %c0_114, %c0_115, %c0_116] : memref<1x2x16x4xf32, #tpu.memory_space<vmem>>, vector<1x2x16x4xf32>
      %92 = vector.shape_cast %91 : vector<1x2x16x4xf32> to vector<2x16x4xf32>
      %cst_117 = arith.constant 0.000000e+00 : f32
      %93 = vector.broadcast %cst_117 : f32 to vector<2x16x4xf32>
      %94 = arith.maximumf %92, %93 : vector<2x16x4xf32>
      %c0_118 = arith.constant 0 : index
      %c1_119 = arith.constant 1 : index
      %c0_120 = arith.constant 0 : index
      %95 = vector.load %arg10[%c0_118, %c1_119, %c0_120] : memref<20x18x4xf32, #tpu.memory_space<vmem>>, vector<2x16x4xf32>
      tpu.vector_store %arg10[%c0_118, %c1_119, %c0_120], %94 {strides = array<i32>} : memref<20x18x4xf32, #tpu.memory_space<vmem>>, vector<2x16x4xf32>,
    } else {
    }
    %c0_i32_9 = arith.constant 0 : i32
    %10 = arith.cmpi slt, %arg1, %c0_i32_9 : i32
    %11 = arith.extui %10 : i1 to i32
    %c0_i32_10 = arith.constant 0 : i32
    %12 = arith.cmpi ne, %11, %c0_i32_10 : i32
    scf.if %12 {
      %c0_113 = arith.constant 0 : index
      %c0_114 = arith.constant 0 : index
      %c0_115 = arith.constant 0 : index
      %c0_116 = arith.constant 0 : index
      %91 = vector.load %arg4[%c0_113, %c0_114, %c0_115, %c0_116] : memref<1x2x16x4xf32, #tpu.memory_space<vmem>>, vector<1x2x16x4xf32>
      %92 = vector.shape_cast %91 : vector<1x2x16x4xf32> to vector<2x16x4xf32>
      %cst_117 = arith.constant 0.000000e+00 : f32
      %93 = vector.broadcast %cst_117 : f32 to vector<2x16x4xf32>
      %94 = arith.maximumf %92, %93 : vector<2x16x4xf32>
      %c18 = arith.constant 18 : index
      %c1_118 = arith.constant 1 : index
      %c0_119 = arith.constant 0 : index
      %95 = vector.load %arg10[%c18, %c1_118, %c0_119] : memref<20x18x4xf32, #tpu.memory_space<vmem>>, vector<2x16x4xf32>
      tpu.vector_store %arg10[%c18, %c1_118, %c0_119], %94 {strides = array<i32>} : memref<20x18x4xf32, #tpu.memory_space<vmem>>, vector<2x16x4xf32>,
    } else {
    }
    %c0_11 = arith.constant 0 : index
    %c0_12 = arith.constant 0 : index
    %c0_13 = arith.constant 0 : index
    %13 = vector.load %arg10[%c0_11, %c0_12, %c0_13] : memref<20x18x4xf32, #tpu.memory_space<vmem>>, vector<18x16x4xf32>
    %c0_14 = arith.constant 0 : index
    %c1_15 = arith.constant 1 : index
    %c0_16 = arith.constant 0 : index
    %14 = vector.load %arg10[%c0_14, %c1_15, %c0_16] : memref<20x18x4xf32, #tpu.memory_space<vmem>>, vector<18x16x4xf32>
    %c0_17 = arith.constant 0 : index
    %c2_18 = arith.constant 2 : index
    %c0_19 = arith.constant 0 : index
    %15 = vector.load %arg10[%c0_17, %c2_18, %c0_19] : memref<20x18x4xf32, #tpu.memory_space<vmem>>, vector<18x16x4xf32>
    %16 = tpu.concatenate %13, %14, %15 in 2 : vector<18x16x4xf32>, vector<18x16x4xf32>, vector<18x16x4xf32> -> vector<18x16x12xf32>
    %17 = vector.shape_cast %16 : vector<18x16x12xf32> to vector<288x12xf32>
    %c0_20 = arith.constant 0 : index
    %c0_21 = arith.constant 0 : index
    %c0_22 = arith.constant 0 : index
    %18 = vector.load %arg5[%c0_20, %c0_21, %c0_22] : memref<3x12x4xf32, #tpu.memory_space<vmem>>, vector<1x12x4xf32>
    %19 = vector.shape_cast %18 : vector<1x12x4xf32> to vector<12x4xf32>
    %cst_23 = arith.constant dense<0.000000e+00> : vector<288x4xf32>
    %20 = tpu.matmul %17, %19, %cst_23 {dimension_numbers = #tpu.dot_dimension_numbers<[1], [0], [0], [1], [0, 0, 1, 1], [], []>} : vector<288x12xf32>, vector<12x4xf32>, vector<288x4xf32> -> vector<288x4xf32>
    %c1_24 = arith.constant 1 : index
    %c0_25 = arith.constant 0 : index
    %c0_26 = arith.constant 0 : index
    %21 = vector.load %arg10[%c1_24, %c0_25, %c0_26] : memref<20x18x4xf32, #tpu.memory_space<vmem>>, vector<18x16x4xf32>
    %c1_27 = arith.constant 1 : index
    %c1_28 = arith.constant 1 : index
    %c0_29 = arith.constant 0 : index
    %22 = vector.load %arg10[%c1_27, %c1_28, %c0_29] : memref<20x18x4xf32, #tpu.memory_space<vmem>>, vector<18x16x4xf32>
    %c1_30 = arith.constant 1 : index
    %c2_31 = arith.constant 2 : index
    %c0_32 = arith.constant 0 : index
    %23 = vector.load %arg10[%c1_30, %c2_31, %c0_32] : memref<20x18x4xf32, #tpu.memory_space<vmem>>, vector<18x16x4xf32>
    %24 = tpu.concatenate %21, %22, %23 in 2 : vector<18x16x4xf32>, vector<18x16x4xf32>, vector<18x16x4xf32> -> vector<18x16x12xf32>
    %25 = vector.shape_cast %24 : vector<18x16x12xf32> to vector<288x12xf32>
    %c1_33 = arith.constant 1 : index
    %c0_34 = arith.constant 0 : index
    %c0_35 = arith.constant 0 : index
    %26 = vector.load %arg5[%c1_33, %c0_34, %c0_35] : memref<3x12x4xf32, #tpu.memory_space<vmem>>, vector<1x12x4xf32>
    %27 = vector.shape_cast %26 : vector<1x12x4xf32> to vector<12x4xf32>
    %cst_36 = arith.constant dense<0.000000e+00> : vector<288x4xf32>
    %28 = tpu.matmul %25, %27, %cst_36 {dimension_numbers = #tpu.dot_dimension_numbers<[1], [0], [0], [1], [0, 0, 1, 1], [], []>} : vector<288x12xf32>, vector<12x4xf32>, vector<288x4xf32> -> vector<288x4xf32>
    %c2_37 = arith.constant 2 : index
    %c0_38 = arith.constant 0 : index
    %c0_39 = arith.constant 0 : index
    %29 = vector.load %arg10[%c2_37, %c0_38, %c0_39] : memref<20x18x4xf32, #tpu.memory_space<vmem>>, vector<18x16x4xf32>
    %c2_40 = arith.constant 2 : index
    %c1_41 = arith.constant 1 : index
    %c0_42 = arith.constant 0 : index
    %30 = vector.load %arg10[%c2_40, %c1_41, %c0_42] : memref<20x18x4xf32, #tpu.memory_space<vmem>>, vector<18x16x4xf32>
    %c2_43 = arith.constant 2 : index
    %c2_44 = arith.constant 2 : index
    %c0_45 = arith.constant 0 : index
    %31 = vector.load %arg10[%c2_43, %c2_44, %c0_45] : memref<20x18x4xf32, #tpu.memory_space<vmem>>, vector<18x16x4xf32>
    %32 = tpu.concatenate %29, %30, %31 in 2 : vector<18x16x4xf32>, vector<18x16x4xf32>, vector<18x16x4xf32> -> vector<18x16x12xf32>
    %33 = vector.shape_cast %32 : vector<18x16x12xf32> to vector<288x12xf32>
    %c2_46 = arith.constant 2 : index
    %c0_47 = arith.constant 0 : index
    %c0_48 = arith.constant 0 : index
    %34 = vector.load %arg5[%c2_46, %c0_47, %c0_48] : memref<3x12x4xf32, #tpu.memory_space<vmem>>, vector<1x12x4xf32>
    %35 = vector.shape_cast %34 : vector<1x12x4xf32> to vector<12x4xf32>
    %cst_49 = arith.constant dense<0.000000e+00> : vector<288x4xf32>
    %36 = tpu.matmul %33, %35, %cst_49 {dimension_numbers = #tpu.dot_dimension_numbers<[1], [0], [0], [1], [0, 0, 1, 1], [], []>} : vector<288x12xf32>, vector<12x4xf32>, vector<288x4xf32> -> vector<288x4xf32>
    %37 = arith.addf %20, %28 : vector<288x4xf32>
    %38 = arith.addf %37, %36 : vector<288x4xf32>
    %c0_50 = arith.constant 0 : index
    %c0_51 = arith.constant 0 : index
    %39 = vector.load %arg6[%c0_50, %c0_51] : memref<1x4xf32, #tpu.memory_space<vmem>>, vector<1x4xf32>
    %40 = vector.broadcast %39 : vector<1x4xf32> to vector<288x4xf32>
    %41 = arith.addf %38, %40 : vector<288x4xf32>
    %cst_52 = arith.constant 0.000000e+00 : f32
    %42 = vector.broadcast %cst_52 : f32 to vector<288x4xf32>
    %43 = arith.maximumf %41, %42 : vector<288x4xf32>
    %44 = vector.shape_cast %43 : vector<288x4xf32> to vector<18x16x4xf32>
    %cst_53 = arith.constant 0.000000e+00 : f32
    %45 = vector.broadcast %cst_53 : f32 to vector<18x18x4xf32>
    %c0_54 = arith.constant 0 : index
    %c0_55 = arith.constant 0 : index
    %c0_56 = arith.constant 0 : index
    %46 = vector.load %arg11[%c0_54, %c0_55, %c0_56] : memref<18x18x4xf32, #tpu.memory_space<vmem>>, vector<18x18x4xf32>
    tpu.vector_store %arg11[%c0_54, %c0_55, %c0_56], %45 {strides = array<i32>} : memref<18x18x4xf32, #tpu.memory_space<vmem>>, vector<18x18x4xf32>,
    %47 = vector.extract_strided_slice %44 {offsets = [1, 0, 0], sizes = [16, 16, 4], strides = [1, 1, 1]} : vector<18x16x4xf32> to vector<16x16x4xf32>
    %c1_57 = arith.constant 1 : index
    %c1_58 = arith.constant 1 : index
    %c0_59 = arith.constant 0 : index
    %48 = vector.load %arg11[%c1_57, %c1_58, %c0_59] : memref<18x18x4xf32, #tpu.memory_space<vmem>>, vector<16x16x4xf32>
    tpu.vector_store %arg11[%c1_57, %c1_58, %c0_59], %47 {strides = array<i32>} : memref<18x18x4xf32, #tpu.memory_space<vmem>>, vector<16x16x4xf32>,
    %c0_i32_60 = arith.constant 0 : i32
    %49 = arith.cmpi sgt, %arg1, %c0_i32_60 : i32
    %50 = arith.extui %49 : i1 to i32
    %c0_i32_61 = arith.constant 0 : i32
    %51 = arith.cmpi ne, %50, %c0_i32_61 : i32
    scf.if %51 {
      %91 = vector.extract_strided_slice %44 {offsets = [0, 0, 0], sizes = [1, 16, 4], strides = [1, 1, 1]} : vector<18x16x4xf32> to vector<1x16x4xf32>
      %c0_113 = arith.constant 0 : index
      %c1_114 = arith.constant 1 : index
      %c0_115 = arith.constant 0 : index
      %92 = vector.load %arg11[%c0_113, %c1_114, %c0_115] : memref<18x18x4xf32, #tpu.memory_space<vmem>>, vector<1x16x4xf32>
      tpu.vector_store %arg11[%c0_113, %c1_114, %c0_115], %91 {strides = array<i32>} : memref<18x18x4xf32, #tpu.memory_space<vmem>>, vector<1x16x4xf32>,
    } else {
    }
    %c0_i32_62 = arith.constant 0 : i32
    %52 = arith.cmpi slt, %arg1, %c0_i32_62 : i32
    %53 = arith.extui %52 : i1 to i32
    %c0_i32_63 = arith.constant 0 : i32
    %54 = arith.cmpi ne, %53, %c0_i32_63 : i32
    scf.if %54 {
      %91 = vector.extract_strided_slice %44 {offsets = [17, 0, 0], sizes = [1, 16, 4], strides = [1, 1, 1]} : vector<18x16x4xf32> to vector<1x16x4xf32>
      %c17 = arith.constant 17 : index
      %c1_113 = arith.constant 1 : index
      %c0_114 = arith.constant 0 : index
      %92 = vector.load %arg11[%c17, %c1_113, %c0_114] : memref<18x18x4xf32, #tpu.memory_space<vmem>>, vector<1x16x4xf32>
      tpu.vector_store %arg11[%c17, %c1_113, %c0_114], %91 {strides = array<i32>} : memref<18x18x4xf32, #tpu.memory_space<vmem>>, vector<1x16x4xf32>,
    } else {
    }
    %c0_64 = arith.constant 0 : index
    %c0_65 = arith.constant 0 : index
    %c0_66 = arith.constant 0 : index
    %55 = vector.load %arg11[%c0_64, %c0_65, %c0_66] : memref<18x18x4xf32, #tpu.memory_space<vmem>>, vector<16x16x4xf32>
    %c0_67 = arith.constant 0 : index
    %c1_68 = arith.constant 1 : index
    %c0_69 = arith.constant 0 : index
    %56 = vector.load %arg11[%c0_67, %c1_68, %c0_69] : memref<18x18x4xf32, #tpu.memory_space<vmem>>, vector<16x16x4xf32>
    %c0_70 = arith.constant 0 : index
    %c2_71 = arith.constant 2 : index
    %c0_72 = arith.constant 0 : index
    %57 = vector.load %arg11[%c0_70, %c2_71, %c0_72] : memref<18x18x4xf32, #tpu.memory_space<vmem>>, vector<16x16x4xf32>
    %58 = tpu.concatenate %55, %56, %57 in 2 : vector<16x16x4xf32>, vector<16x16x4xf32>, vector<16x16x4xf32> -> vector<16x16x12xf32>
    %59 = vector.shape_cast %58 : vector<16x16x12xf32> to vector<256x12xf32>
    %c0_73 = arith.constant 0 : index
    %c0_74 = arith.constant 0 : index
    %c0_75 = arith.constant 0 : index
    %60 = vector.load %arg7[%c0_73, %c0_74, %c0_75] : memref<3x12x4xf32, #tpu.memory_space<vmem>>, vector<1x12x4xf32>
    %61 = vector.shape_cast %60 : vector<1x12x4xf32> to vector<12x4xf32>
    %cst_76 = arith.constant dense<0.000000e+00> : vector<256x4xf32>
    %62 = tpu.matmul %59, %61, %cst_76 {dimension_numbers = #tpu.dot_dimension_numbers<[1], [0], [0], [1], [0, 0, 1, 1], [], []>} : vector<256x12xf32>, vector<12x4xf32>, vector<256x4xf32> -> vector<256x4xf32>
    %c1_77 = arith.constant 1 : index
    %c0_78 = arith.constant 0 : index
    %c0_79 = arith.constant 0 : index
    %63 = vector.load %arg11[%c1_77, %c0_78, %c0_79] : memref<18x18x4xf32, #tpu.memory_space<vmem>>, vector<16x16x4xf32>
    %c1_80 = arith.constant 1 : index
    %c1_81 = arith.constant 1 : index
    %c0_82 = arith.constant 0 : index
    %64 = vector.load %arg11[%c1_80, %c1_81, %c0_82] : memref<18x18x4xf32, #tpu.memory_space<vmem>>, vector<16x16x4xf32>
    %c1_83 = arith.constant 1 : index
    %c2_84 = arith.constant 2 : index
    %c0_85 = arith.constant 0 : index
    %65 = vector.load %arg11[%c1_83, %c2_84, %c0_85] : memref<18x18x4xf32, #tpu.memory_space<vmem>>, vector<16x16x4xf32>
    %66 = tpu.concatenate %63, %64, %65 in 2 : vector<16x16x4xf32>, vector<16x16x4xf32>, vector<16x16x4xf32> -> vector<16x16x12xf32>
    %67 = vector.shape_cast %66 : vector<16x16x12xf32> to vector<256x12xf32>
    %c1_86 = arith.constant 1 : index
    %c0_87 = arith.constant 0 : index
    %c0_88 = arith.constant 0 : index
    %68 = vector.load %arg7[%c1_86, %c0_87, %c0_88] : memref<3x12x4xf32, #tpu.memory_space<vmem>>, vector<1x12x4xf32>
    %69 = vector.shape_cast %68 : vector<1x12x4xf32> to vector<12x4xf32>
    %cst_89 = arith.constant dense<0.000000e+00> : vector<256x4xf32>
    %70 = tpu.matmul %67, %69, %cst_89 {dimension_numbers = #tpu.dot_dimension_numbers<[1], [0], [0], [1], [0, 0, 1, 1], [], []>} : vector<256x12xf32>, vector<12x4xf32>, vector<256x4xf32> -> vector<256x4xf32>
    %c2_90 = arith.constant 2 : index
    %c0_91 = arith.constant 0 : index
    %c0_92 = arith.constant 0 : index
    %71 = vector.load %arg11[%c2_90, %c0_91, %c0_92] : memref<18x18x4xf32, #tpu.memory_space<vmem>>, vector<16x16x4xf32>
    %c2_93 = arith.constant 2 : index
    %c1_94 = arith.constant 1 : index
    %c0_95 = arith.constant 0 : index
    %72 = vector.load %arg11[%c2_93, %c1_94, %c0_95] : memref<18x18x4xf32, #tpu.memory_space<vmem>>, vector<16x16x4xf32>
    %c2_96 = arith.constant 2 : index
    %c2_97 = arith.constant 2 : index
    %c0_98 = arith.constant 0 : index
    %73 = vector.load %arg11[%c2_96, %c2_97, %c0_98] : memref<18x18x4xf32, #tpu.memory_space<vmem>>, vector<16x16x4xf32>
    %74 = tpu.concatenate %71, %72, %73 in 2 : vector<16x16x4xf32>, vector<16x16x4xf32>, vector<16x16x4xf32> -> vector<16x16x12xf32>
    %75 = vector.shape_cast %74 : vector<16x16x12xf32> to vector<256x12xf32>
    %c2_99 = arith.constant 2 : index
    %c0_100 = arith.constant 0 : index
    %c0_101 = arith.constant 0 : index
    %76 = vector.load %arg7[%c2_99, %c0_100, %c0_101] : memref<3x12x4xf32, #tpu.memory_space<vmem>>, vector<1x12x4xf32>
    %77 = vector.shape_cast %76 : vector<1x12x4xf32> to vector<12x4xf32>
    %cst_102 = arith.constant dense<0.000000e+00> : vector<256x4xf32>
    %78 = tpu.matmul %75, %77, %cst_102 {dimension_numbers = #tpu.dot_dimension_numbers<[1], [0], [0], [1], [0, 0, 1, 1], [], []>} : vector<256x12xf32>, vector<12x4xf32>, vector<256x4xf32> -> vector<256x4xf32>
    %79 = arith.addf %62, %70 : vector<256x4xf32>
    %80 = arith.addf %79, %78 : vector<256x4xf32>
    %c0_103 = arith.constant 0 : index
    %c0_104 = arith.constant 0 : index
    %81 = vector.load %arg8[%c0_103, %c0_104] : memref<1x4xf32, #tpu.memory_space<vmem>>, vector<1x4xf32>
    %82 = vector.broadcast %81 : vector<1x4xf32> to vector<256x4xf32>
    %83 = arith.addf %80, %82 : vector<256x4xf32>
    %84 = vector.shape_cast %83 : vector<256x4xf32> to vector<16x16x4xf32>
    %c0_105 = arith.constant 0 : index
    %c0_106 = arith.constant 0 : index
    %c0_107 = arith.constant 0 : index
    %c0_108 = arith.constant 0 : index
    %85 = vector.load %arg3[%c0_105, %c0_106, %c0_107, %c0_108] : memref<1x16x16x4xf32, #tpu.memory_space<vmem>>, vector<1x16x16x4xf32>
    %86 = vector.shape_cast %85 : vector<1x16x16x4xf32> to vector<16x16x4xf32>
    %87 = arith.addf %84, %86 : vector<16x16x4xf32>
    %c0_109 = arith.constant 0 : index
    %c0_110 = arith.constant 0 : index
    %c0_111 = arith.constant 0 : index
    %c0_112 = arith.constant 0 : index
    %88 = vector.load %arg9[%c0_109, %c0_110, %c0_111, %c0_112] : memref<1x16x16x4xf32, #tpu.memory_space<vmem>>, vector<1x16x16x4xf32>
    %89 = vector.shape_cast %88 : vector<1x16x16x4xf32> to vector<16x16x4xf32>
    %90 = vector.shape_cast %87 : vector<16x16x4xf32> to vector<1x16x16x4xf32>
    tpu.vector_store %arg9[%c0_109, %c0_110, %c0_111, %c0_112], %90 {strides = array<i32>} : memref<1x16x16x4xf32, #tpu.memory_space<vmem>>, vector<1x16x16x4xf32>,
    return
  }
  func.func @transform_0(%arg0: i32, %arg1: i32) -> (i32, i32, i32, i32) {
    %c8_i32 = arith.constant 8 : i32
    %0 = arith.muli %arg1, %c8_i32 : i32
    %c1_i32 = arith.constant 1 : i32
    %1 = arith.subi %0, %c1_i32 : i32
    %c0_i32 = arith.constant 0 : i32
    %2 = arith.maxsi %1, %c0_i32 : i32
    %c0_i32_0 = arith.constant 0 : i32
    %c0_i32_1 = arith.constant 0 : i32
    %c0_i32_2 = arith.constant 0 : i32
    return %arg0, %2, %c0_i32_0, %c0_i32_1 : i32, i32, i32, i32
  }
  func.func @transform_1(%arg0: i32, %arg1: i32) -> (i32, i32, i32, i32) {
    %c0_i32 = arith.constant 0 : i32
    %c0_i32_0 = arith.constant 0 : i32
    %c0_i32_1 = arith.constant 0 : i32
    return %arg0, %arg1, %c0_i32, %c0_i32_0 : i32, i32, i32, i32
  }
  func.func @transform_2(%arg0: i32, %arg1: i32) -> (i32, i32, i32, i32) {
    %c1_i32 = arith.constant 1 : i32
    %0 = arith.addi %arg1, %c1_i32 : i32
    %c8_i32 = arith.constant 8 : i32
    %1 = arith.muli %0, %c8_i32 : i32
    %c7_i32 = arith.constant 7 : i32
    %2 = arith.minsi %1, %c7_i32 : i32
    %c0_i32 = arith.constant 0 : i32
    %c0_i32_0 = arith.constant 0 : i32
    %c0_i32_1 = arith.constant 0 : i32
    return %arg0, %2, %c0_i32, %c0_i32_0 : i32, i32, i32, i32
  }
  func.func @transform_3(%arg0: i32, %arg1: i32) -> (i32, i32, i32) {
    %c0_i32 = arith.constant 0 : i32
    %c0_i32_0 = arith.constant 0 : i32
    %c0_i32_1 = arith.constant 0 : i32
    %c0_i32_2 = arith.constant 0 : i32
    return %c0_i32, %c0_i32_0, %c0_i32_1 : i32, i32, i32
  }
  func.func @transform_4(%arg0: i32, %arg1: i32) -> (i32, i32) {
    %c0_i32 = arith.constant 0 : i32
    %c0_i32_0 = arith.constant 0 : i32
    %c0_i32_1 = arith.constant 0 : i32
    return %c0_i32, %c0_i32_0 : i32, i32
  }
  func.func @transform_5(%arg0: i32, %arg1: i32) -> (i32, i32, i32) {
    %c0_i32 = arith.constant 0 : i32
    %c0_i32_0 = arith.constant 0 : i32
    %c0_i32_1 = arith.constant 0 : i32
    %c0_i32_2 = arith.constant 0 : i32
    return %c0_i32, %c0_i32_0, %c0_i32_1 : i32, i32, i32
  }
  func.func @transform_6(%arg0: i32, %arg1: i32) -> (i32, i32) {
    %c0_i32 = arith.constant 0 : i32
    %c0_i32_0 = arith.constant 0 : i32
    %c0_i32_1 = arith.constant 0 : i32
    return %c0_i32, %c0_i32_0 : i32, i32
  }
  func.func @transform_7(%arg0: i32, %arg1: i32) -> (i32, i32, i32, i32) {
    %c0_i32 = arith.constant 0 : i32
    %c0_i32_0 = arith.constant 0 : i32
    %c0_i32_1 = arith.constant 0 : i32
    return %arg0, %arg1, %c0_i32, %c0_i32_0 : i32, i32, i32, i32
  }
}

</mosaic_0001>

<bundles_post_ra>
// kernel: residual_conv_unit.1
= control target key start
LH: loop header
LB: loop body
LE: loop exit
PB: predicated region body
PF: predicated region fallthrough
CT: control target
= control target key end

     0   :  { %s6928_s23 = smov 0   ;;  %s6930_s24 = smov 0   ;;  %s9313_s0 = inlined_call_operand.vmem [shape: f32[2,16,16,4], index: 0, kind: input, shape index: {}, may-alias: {0,1,2}]   ;;  %s9314_s1 = inlined_call_operand.vmem [shape: f32[2,16,16,4], index: 1, kind: input, shape index: {}, may-alias: {0,1,2}]   ;;  %s9315_s2 = inlined_call_operand.vmem [shape: f32[2,16,16,4], index: 2, kind: input, shape index: {}, may-alias: {0,1,2}]   ;;  %s9316_s3 = inlined_call_operand.vmem [shape: f32[3,12,4], index: 3, kind: input, shape index: {}]   ;;  %s9317_s4 = inlined_call_operand.vmem [shape: f32[1,4], index: 4, kind: input, shape index: {}]   ;;  %s9318_s5 = inlined_call_operand.vmem [shape: f32[3,12,4], index: 5, kind: input, shape index: {}]   ;;  %s9319_s6 = inlined_call_operand.vmem [shape: f32[1,4], index: 6, kind: input, shape index: {}]   ;;  %s9320_s7 = inlined_call_operand.vmem [shape: f32[2,16,16,4], index: 7, kind: output, shape index: {}]  }
   0x1   :  { %s6932_s2 = smov 0  }
   0x2 LB: > { %s29_s25 = sadd.s32 1, %s6878_s24  ;;  %p5884_p0 = scmp.ge.s32.totalorder %s6882_s2, 1  ;;  %s6882_s2 = sphi %s6932_s2, %s17_s2   ;;  %s6878_s24 = sphi %s6930_s24, %s9369_s24   ;;  %s6874_s23 = sphi %s6928_s23, %s9368_s23  }
   0x3   : > { %p31_p1 = scmp.ge.s32.totalorder %s29_s25, 2  ;;  %p327_p2 = scmp.lt.s32.totalorder %s6882_s2, 3 }
   0x5   : > { %s9371_s25 = smov (%p31_p1, %s29_s25), 0  ;;  %p328_p3 = pnand %p5884_p0, %p327_p2 }
   0x7   : > { %331 = sbr.rel (%p328_p3) target bundleno = 1423 (0x58f), region = 48 }
   0xe   : > { %vm457_vm0 = vcmask 31744   ;;  %vm460_vm1 = vcmask 25600   ;;  %v6951_v0 = vld [vmem:[%s9316_s3 + $0x10] sm:$0xff]  ;;  %v6884_v1 = vmov 0.0   ;;  %p417_p4 = scmp.lt.s32.totalorder %s6874_s23, 1  ;;  %vm1701_vm2 = vcmask 1043456  }
   0xf   : > { %462 = vst.msk [vmem:[#allocation2 + $0x18] sm:$0xff] %vm457_vm0, %v6884_v1  ;;  %463 = vst.msk [vmem:[#allocation2 + $0x20] sm:$0xff] %vm457_vm0, %v6884_v1  ;;  %v5894_v2 = vld [vmem:[%s9316_s3 + $0x18] sm:$0xf]  ;;  %vm6885_vm3 = vmmov 1   ;;  %s6886_s11 = smov 8  }
  0x10   : > { %458 = vst.msk [vmem:[#allocation2] sm:$0xff] %vm457_vm0, %v6884_v1  ;;  %459 = vst.msk [vmem:[#allocation2 + $0x8] sm:$0xff] %vm457_vm0, %v6884_v1  ;;  %v6666_v3 = vpack.c.bf16 %v5894_v2, %v6951_v0  ;;  %s9373_s23 = smov (!%p417_p4, %s6874_s23), 1  ;;  %s6887_s12 = smov 4   ;;  %vm1081_vm5 = vcmask 64512   ;;  %vm1592_vm6 = vcmask 97280  }
  0x11   : > { %465 = vst.msk [vmem:[#allocation2 + $0x30] sm:$0xff] %vm457_vm0, %v6884_v1  ;;  %466 = vst.msk [vmem:[#allocation2 + $0x38] sm:$0xff] %vm457_vm0, %v6884_v1  ;;  %s6116_s30 = sshll.u32 %s9373_s23, 8 }
  0x12   : > { %468 = vst.msk [vmem:[#allocation2 + $0x48] sm:$0xff] %vm457_vm0, %v6884_v1  ;;  %469 = vst.msk [vmem:[#allocation2 + $0x50] sm:$0xff] %vm457_vm0, %v6884_v1  ;;  %s7207_s10 = scalar_lea.vmem %s9314_s1, %s6116_s30  ;;  %s9177_s20 = scalar_lea.vmem %s9320_s7, %s6116_s30 }
  0x13   : > { %471 = vst.msk [vmem:[#allocation2 + $0x60] sm:$0xff] %vm457_vm0, %v6884_v1  ;;  %472 = vst.msk [vmem:[#allocation2 + $0x68] sm:$0xff] %vm457_vm0, %v6884_v1  ;;  %v520_v5 = vld [vmem:[%s7207_s10 + $0x8] sm:$0xff]  ;;  %v519_v6 = vld [vmem:[%s7207_s10] sm:$0xff] }
  0x14   : > { %474 = vst.msk [vmem:[#allocation2 + $0x78] sm:$0xff] %vm457_vm0, %v6884_v1  ;;  %475 = vst.msk [vmem:[#allocation2 + $0x80] sm:$0xff] %vm457_vm0, %v6884_v1  ;;  %v522_v7 = vld [vmem:[%s7207_s10 + $0x18] sm:$0xff]  ;;  %v552_v11 = vmax.f32 %v520_v5, 0.0  ;;  %v551_v12 = vmax.f32 %v519_v6, 0.0  ;;  %v521_v15 = vld [vmem:[%s7207_s10 + $0x10] sm:$0xff] }
  0x15   : > { %477 = vst.msk [vmem:[#allocation2 + $0x90] sm:$0xff] %vm457_vm0, %v6884_v1  ;;  %478 = vst.msk [vmem:[#allocation2 + $0x98] sm:$0xff] %vm457_vm0, %v6884_v1  ;;  %v554_v13 = vmax.f32 %v522_v7, 0.0  ;;  %v524_v16 = vld [vmem:[%s7207_s10 + $0x28] sm:$0xff]  ;;  %v553_v17 = vmax.f32 %v521_v15, 0.0  ;;  %v523_v19 = vld [vmem:[%s7207_s10 + $0x20] sm:$0xff] }
  0x16   : > { %480 = vst.msk [vmem:[#allocation2 + $0xa8] sm:$0xff] %vm457_vm0, %v6884_v1  ;;  %481 = vst.msk [vmem:[#allocation2 + $0xb0] sm:$0xff] %vm457_vm0, %v6884_v1  ;;  %v1193_v8 = vld [vmem:[#allocation2 + $0x1a] sm:$0xff]  ;;  %v556_v18 = vmax.f32 %v524_v16, 0.0  ;;  %v525_v21 = vld [vmem:[%s7207_s10 + $0x30] sm:$0xff]  ;;  %v555_v22 = vmax.f32 %v523_v19, 0.0 }
  0x17   : > { %483 = vst.msk [vmem:[#allocation2 + $0xc0] sm:$0xff] %vm457_vm0, %v6884_v1  ;;  %484 = vst.msk [vmem:[#allocation2 + $0xc8] sm:$0xff] %vm457_vm0, %v6884_v1  ;;  %v1157_v9 = vld [vmem:[#allocation2 + $0x19] sm:$0xff]  ;;  %1409 = vrot.lane.b32.xlu1 %v1193_v8, %s6886_s11  ;;  %v557_v24 = vmax.f32 %v525_v21, 0.0  ;;  %v528_v25 = vld [vmem:[%s7207_s10 + $0x48] sm:$0xff] }
  0x18   : > { %486 = vst.msk [vmem:[#allocation2 + $0xd8] sm:$0xff] %vm457_vm0, %v6884_v1  ;;  %487 = vst.msk [vmem:[#allocation2 + $0xe0] sm:$0xff] %vm457_vm0, %v6884_v1  ;;  %1265 = vrot.lane.b32.xlu0 %v1157_v9, %s6887_s12  ;;  %v526_v20 = vld [vmem:[%s7207_s10 + $0x38] sm:$0xff]  ;;  %v527_v26 = vld [vmem:[%s7207_s10 + $0x40] sm:$0xff]  ;;  %v560_v28 = vmax.f32 %v528_v25, 0.0 }
  0x19   : > { %489 = vst.msk [vmem:[#allocation2 + $0xf0] sm:$0xff] %vm457_vm0, %v6884_v1  ;;  %490 = vst.msk [vmem:[#allocation2 + $0xf8] sm:$0xff] %vm457_vm0, %v6884_v1  ;;  %v558_v23 = vmax.f32 %v526_v20, 0.0  ;;  %v530_v27 = vld [vmem:[%s7207_s10 + $0x58] sm:$0xff]  ;;  %v559_v29 = vmax.f32 %v527_v26, 0.0  ;;  %v529_v31 = vld [vmem:[%s7207_s10 + $0x50] sm:$0xff] }
  0x1a   : > { %492 = vst.msk [vmem:[#allocation2 + $0x108] sm:$0xff] %vm457_vm0, %v6884_v1  ;;  %493 = vst.msk [vmem:[#allocation2 + $0x110] sm:$0xff] %vm457_vm0, %v6884_v1  ;;  %v562_v30 = vmax.f32 %v530_v27, 0.0  ;;  %v532_v32 = vld [vmem:[%s7207_s10 + $0x68] sm:$0xff]  ;;  %v531_v33 = vld [vmem:[%s7207_s10 + $0x60] sm:$0xff]  ;;  %v561_v34 = vmax.f32 %v529_v31, 0.0 }
  0x1b   : > { %495 = vst.msk [vmem:[#allocation2 + $0x120] sm:$0xff] %vm457_vm0, %v6884_v1  ;;  %496 = vst.msk [vmem:[#allocation2 + $0x128] sm:$0xff] %vm457_vm0, %v6884_v1  ;;  %v564_v35 = vmax.f32 %v532_v32, 0.0  ;;  %v563_v36 = vmax.f32 %v531_v33, 0.0  ;;  %v534_v37 = vld [vmem:[%s7207_s10 + $0x78] sm:$0xff]  ;;  %v533_v38 = vld [vmem:[%s7207_s10 + $0x70] sm:$0xff] }
  0x1c   : > { %498 = vst.msk [vmem:[#allocation2 + $0x138] sm:$0xff] %vm457_vm0, %v6884_v1  ;;  %499 = vst.msk [vmem:[#allocation2 + $0x140] sm:$0xff] %vm457_vm0, %v6884_v1  ;;  %v566_v39 = vmax.f32 %v534_v37, 0.0  ;;  %v565_v40 = vmax.f32 %v533_v38, 0.0  ;;  %v536_v41 = vld [vmem:[%s7207_s10 + $0x88] sm:$0xff]  ;;  %v535_v42 = vld [vmem:[%s7207_s10 + $0x80] sm:$0xff] }
  0x1d   : > { %501 = vst.msk [vmem:[#allocation2 + $0x150] sm:$0xff] %vm457_vm0, %v6884_v1  ;;  %502 = vst.msk [vmem:[#allocation2 + $0x158] sm:$0xff] %vm457_vm0, %v6884_v1  ;;  %v538_v43 = vld [vmem:[%s7207_s10 + $0x98] sm:$0xff]  ;;  %v568_v44 = vmax.f32 %v536_v41, 0.0  ;;  %v567_v45 = vmax.f32 %v535_v42, 0.0  ;;  %v537_v47 = vld [vmem:[%s7207_s10 + $0x90] sm:$0xff] }
  0x1e   : > { %504 = vst.msk [vmem:[#allocation2 + $0x168] sm:$0xff] %vm457_vm0, %v6884_v1  ;;  %505 = vst.msk [vmem:[#allocation2 + $0x170] sm:$0xff] %vm457_vm0, %v6884_v1  ;;  %v570_v46 = vmax.f32 %v538_v43, 0.0  ;;  %v540_v48 = vld [vmem:[%s7207_s10 + $0xa8] sm:$0xff]  ;;  %v539_v49 = vld [vmem:[%s7207_s10 + $0xa0] sm:$0xff]  ;;  %v569_v50 = vmax.f32 %v537_v47, 0.0 }
  0x1f   : > { %507 = vst.msk [vmem:[#allocation2 + $0x180] sm:$0xff] %vm457_vm0, %v6884_v1  ;;  %508 = vst.msk [vmem:[#allocation2 + $0x188] sm:$0xff] %vm457_vm0, %v6884_v1  ;;  %v572_v51 = vmax.f32 %v540_v48, 0.0  ;;  %v571_v52 = vmax.f32 %v539_v49, 0.0  ;;  %v542_v53 = vld [vmem:[%s7207_s10 + $0xb8] sm:$0xff]  ;;  %v541_v54 = vld [vmem:[%s7207_s10 + $0xb0] sm:$0xff] }
  0x20   : > { %510 = vst.msk [vmem:[#allocation2 + $0x198] sm:$0xff] %vm457_vm0, %v6884_v1  ;;  %511 = vst.msk [vmem:[#allocation2 + $0x1a0] sm:$0xff] %vm457_vm0, %v6884_v1  ;;  %v544_v55 = vld [vmem:[%s7207_s10 + $0xc8] sm:$0xff]  ;;  %v574_v58 = vmax.f32 %v542_v53, 0.0  ;;  %v573_v59 = vmax.f32 %v541_v54, 0.0  ;;  %v543_v6 = vld [vmem:[%s7207_s10 + $0xc0] sm:$0xff] }
  0x21   : > { %513 = vst.msk [vmem:[#allocation2 + $0x1b0] sm:$0xff] %vm457_vm0, %v6884_v1  ;;  %514 = vst.msk [vmem:[#allocation2 + $0x1b8] sm:$0xff] %vm457_vm0, %v6884_v1  ;;  %v576_v60 = vmax.f32 %v544_v55, 0.0  ;;  %v575_v7 = vmax.f32 %v543_v6, 0.0  ;;  %v546_v8 = vld [vmem:[%s7207_s10 + $0xd8] sm:$0xff]  ;;  %v545_v9 = vld [vmem:[%s7207_s10 + $0xd0] sm:$0xff] }
  0x22   : > { %516 = vst.msk [vmem:[#allocation2 + $0x1c8] sm:$0xff] %vm457_vm0, %v6884_v1  ;;  %517 = vst.msk [vmem:[#allocation2 + $0x1d0] sm:$0xff] %vm457_vm0, %v6884_v1  ;;  %v548_v48 = vld [vmem:[%s7207_s10 + $0xe8] sm:$0xff]  ;;  %v547_v49 = vld [vmem:[%s7207_s10 + $0xe0] sm:$0xff] }
  0x23   : > { %3248 = vst.msk [vmem:[#allocation3] sm:$0xff] %vm457_vm0, %v6884_v1  ;;  %3249 = vst.msk [vmem:[#allocation3 + $0x8] sm:$0xff] %vm457_vm0, %v6884_v1 }
  0x24   : > { %3251 = vst.msk [vmem:[#allocation3 + $0x18] sm:$0xff] %vm457_vm0, %v6884_v1  ;;  %3252 = vst.msk [vmem:[#allocation3 + $0x20] sm:$0xff] %vm457_vm0, %v6884_v1 }
  0x25   : > { %3254 = vst.msk [vmem:[#allocation3 + $0x30] sm:$0xff] %vm457_vm0, %v6884_v1  ;;  %3255 = vst.msk [vmem:[#allocation3 + $0x38] sm:$0xff] %vm457_vm0, %v6884_v1 }
  0x26   : > { %3257 = vst.msk [vmem:[#allocation3 + $0x48] sm:$0xff] %vm457_vm0, %v6884_v1  ;;  %3258 = vst.msk [vmem:[#allocation3 + $0x50] sm:$0xff] %vm457_vm0, %v6884_v1 }
  0x27   : > { %3260 = vst.msk [vmem:[#allocation3 + $0x60] sm:$0xff] %vm457_vm0, %v6884_v1  ;;  %3261 = vst.msk [vmem:[#allocation3 + $0x68] sm:$0xff] %vm457_vm0, %v6884_v1 }
  0x28   : > { %3263 = vst.msk [vmem:[#allocation3 + $0x78] sm:$0xff] %vm457_vm0, %v6884_v1  ;;  %3264 = vst.msk [vmem:[#allocation3 + $0x80] sm:$0xff] %vm457_vm0, %v6884_v1 }
  0x29   : > { %3266 = vst.msk [vmem:[#allocation3 + $0x90] sm:$0xff] %vm457_vm0, %v6884_v1  ;;  %3267 = vst.msk [vmem:[#allocation3 + $0x98] sm:$0xff] %vm457_vm0, %v6884_v1 }
  0x2a   : > { %3269 = vst.msk [vmem:[#allocation3 + $0xa8] sm:$0xff] %vm457_vm0, %v6884_v1  ;;  %3270 = vst.msk [vmem:[#allocation3 + $0xb0] sm:$0xff] %vm457_vm0, %v6884_v1 }
  0x2b   : > { %3272 = vst.msk [vmem:[#allocation3 + $0xc0] sm:$0xff] %vm457_vm0, %v6884_v1  ;;  %3273 = vst.msk [vmem:[#allocation3 + $0xc8] sm:$0xff] %vm457_vm0, %v6884_v1 }
  0x2c   : > { %3275 = vst.msk [vmem:[#allocation3 + $0xd8] sm:$0xff] %vm457_vm0, %v6884_v1  ;;  %3276 = vst.msk [vmem:[#allocation3 + $0xe0] sm:$0xff] %vm457_vm0, %v6884_v1 }
  0x2d   : > { %3278 = vst.msk [vmem:[#allocation3 + $0xf0] sm:$0xff] %vm457_vm0, %v6884_v1  ;;  %3279 = vst.msk [vmem:[#allocation3 + $0xf8] sm:$0xff] %vm457_vm0, %v6884_v1 }
  0x2e   : > { %3281 = vst.msk [vmem:[#allocation3 + $0x108] sm:$0xff] %vm457_vm0, %v6884_v1  ;;  %3282 = vst.msk [vmem:[#allocation3 + $0x110] sm:$0xff] %vm457_vm0, %v6884_v1 }
  0x2f   : > { %3284 = vst.msk [vmem:[#allocation3 + $0x120] sm:$0xff] %vm457_vm0, %v6884_v1  ;;  %3285 = vst.msk [vmem:[#allocation3 + $0x128] sm:$0xff] %vm457_vm0, %v6884_v1 }
  0x30   : > { %3287 = vst.msk [vmem:[#allocation3 + $0x138] sm:$0xff] %vm457_vm0, %v6884_v1  ;;  %3288 = vst.msk [vmem:[#allocation3 + $0x140] sm:$0xff] %vm457_vm0, %v6884_v1 }
  0x31   : > { %3290 = vst.msk [vmem:[#allocation3 + $0x150] sm:$0xff] %vm457_vm0, %v6884_v1  ;;  %3291 = vst.msk [vmem:[#allocation3 + $0x158] sm:$0xff] %vm457_vm0, %v6884_v1 }
  0x32   : > { %3293 = vst.msk [vmem:[#allocation3 + $0x168] sm:$0xff] %vm457_vm0, %v6884_v1  ;;  %3294 = vst.msk [vmem:[#allocation3 + $0x170] sm:$0xff] %vm457_vm0, %v6884_v1 }
  0x33   : > { %3296 = vst.msk [vmem:[#allocation3 + $0x180] sm:$0xff] %vm457_vm0, %v6884_v1  ;;  %3297 = vst.msk [vmem:[#allocation3 + $0x188] sm:$0xff] %vm457_vm0, %v6884_v1 }
  0x34   : > { %3299 = vst.msk [vmem:[#allocation3 + $0x198] sm:$0xff] %vm457_vm0, %v6884_v1  ;;  %3300 = vst.msk [vmem:[#allocation3 + $0x1a0] sm:$0xff] %vm457_vm0, %v6884_v1 }
  0x35   : > { %464 = vst.msk [vmem:[#allocation2 + $0x28] sm:$0x3] %vm460_vm1, %v6884_v1  ;;  %461 = vst.msk [vmem:[#allocation2 + $0x10] sm:$0x3] %vm460_vm1, %v6884_v1 }
  0x36   : > { %467 = vst.msk [vmem:[#allocation2 + $0x40] sm:$0x3] %vm460_vm1, %v6884_v1  ;;  %470 = vst.msk [vmem:[#allocation2 + $0x58] sm:$0x3] %vm460_vm1, %v6884_v1 }
  0x37   : > { %473 = vst.msk [vmem:[#allocation2 + $0x70] sm:$0x3] %vm460_vm1, %v6884_v1  ;;  %476 = vst.msk [vmem:[#allocation2 + $0x88] sm:$0x3] %vm460_vm1, %v6884_v1 }
  0x38   : > { %479 = vst.msk [vmem:[#allocation2 + $0xa0] sm:$0x3] %vm460_vm1, %v6884_v1  ;;  %482 = vst.msk [vmem:[#allocation2 + $0xb8] sm:$0x3] %vm460_vm1, %v6884_v1 }
  0x39   : > { %485 = vst.msk [vmem:[#allocation2 + $0xd0] sm:$0x3] %vm460_vm1, %v6884_v1  ;;  %488 = vst.msk [vmem:[#allocation2 + $0xe8] sm:$0x3] %vm460_vm1, %v6884_v1 }
  0x3a   : > { %491 = vst.msk [vmem:[#allocation2 + $0x100] sm:$0x3] %vm460_vm1, %v6884_v1  ;;  %494 = vst.msk [vmem:[#allocation2 + $0x118] sm:$0x3] %vm460_vm1, %v6884_v1 }
  0x3b   : > { %497 = vst.msk [vmem:[#allocation2 + $0x130] sm:$0x3] %vm460_vm1, %v6884_v1  ;;  %500 = vst.msk [vmem:[#allocation2 + $0x148] sm:$0x3] %vm460_vm1, %v6884_v1 }
  0x3c   : > { %503 = vst.msk [vmem:[#allocation2 + $0x160] sm:$0x3] %vm460_vm1, %v6884_v1  ;;  %506 = vst.msk [vmem:[#allocation2 + $0x178] sm:$0x3] %vm460_vm1, %v6884_v1  ;;  %v1194_v10 = vld [vmem:[#allocation2 + $0x22] sm:$0xff] }
  0x3d   : > { %509 = vst.msk [vmem:[#allocation2 + $0x190] sm:$0x3] %vm460_vm1, %v6884_v1  ;;  %512 = vst.msk [vmem:[#allocation2 + $0x1a8] sm:$0x3] %vm460_vm1, %v6884_v1  ;;  %v1158_v14 = vld [vmem:[#allocation2 + $0x21] sm:$0xff]  ;;  %1411 = vrot.lane.b32.xlu1 %v1194_v10, %s6886_s11 }
  0x3e   : > { %515 = vst.msk [vmem:[#allocation2 + $0x1c0] sm:$0x3] %vm460_vm1, %v6884_v1  ;;  %518 = vst.msk [vmem:[#allocation2 + $0x1d8] sm:$0x3] %vm460_vm1, %v6884_v1  ;;  %1267 = vrot.lane.b32.xlu0 %v1158_v14, %s6887_s12 }
  0x3f   : > { %3250 = vst.msk [vmem:[#allocation3 + $0x10] sm:$0x3] %vm460_vm1, %v6884_v1  ;;  %3253 = vst.msk [vmem:[#allocation3 + $0x28] sm:$0x3] %vm460_vm1, %v6884_v1 }
  0x40   : > { %3256 = vst.msk [vmem:[#allocation3 + $0x40] sm:$0x3] %vm460_vm1, %v6884_v1  ;;  %3259 = vst.msk [vmem:[#allocation3 + $0x58] sm:$0x3] %vm460_vm1, %v6884_v1 }
  0x41   : > { %3262 = vst.msk [vmem:[#allocation3 + $0x70] sm:$0x3] %vm460_vm1, %v6884_v1  ;;  %3265 = vst.msk [vmem:[#allocation3 + $0x88] sm:$0x3] %vm460_vm1, %v6884_v1 }
  0x42   : > { %3268 = vst.msk [vmem:[#allocation3 + $0xa0] sm:$0x3] %vm460_vm1, %v6884_v1  ;;  %3271 = vst.msk [vmem:[#allocation3 + $0xb8] sm:$0x3] %vm460_vm1, %v6884_v1 }
  0x43   : > { %3274 = vst.msk [vmem:[#allocation3 + $0xd0] sm:$0x3] %vm460_vm1, %v6884_v1  ;;  %3277 = vst.msk [vmem:[#allocation3 + $0xe8] sm:$0x3] %vm460_vm1, %v6884_v1 }
  0x44   : > { %3280 = vst.msk [vmem:[#allocation3 + $0x100] sm:$0x3] %vm460_vm1, %v6884_v1  ;;  %3283 = vst.msk [vmem:[#allocation3 + $0x118] sm:$0x3] %vm460_vm1, %v6884_v1 }
  0x45   : > { %3286 = vst.msk [vmem:[#allocation3 + $0x130] sm:$0x3] %vm460_vm1, %v6884_v1  ;;  %3289 = vst.msk [vmem:[#allocation3 + $0x148] sm:$0x3] %vm460_vm1, %v6884_v1 }
  0x46   : > { %3292 = vst.msk [vmem:[#allocation3 + $0x160] sm:$0x3] %vm460_vm1, %v6884_v1  ;;  %3295 = vst.msk [vmem:[#allocation3 + $0x178] sm:$0x3] %vm460_vm1, %v6884_v1 }
  0x47   : > { %3298 = vst.msk [vmem:[#allocation3 + $0x190] sm:$0x3] %vm460_vm1, %v6884_v1  ;;  %3301 = vst.msk [vmem:[#allocation3 + $0x1a8] sm:$0x3] %vm460_vm1, %v6884_v1 }
  0x48   : > { %vm7186_vm4 = vmpackc.low %vm1701_vm2, %vm6885_vm3  ;;  %585 = vst.msk [vmem:[#allocation2 + $0x39] sm:$0xff] %vm457_vm0, %v552_v11 }
  0x49   : > { %6668 = vmatprep.subr.msk.bf16.mxu0 %vm7186_vm4, %v6666_v3  ;;  %6702 = vmatprep.subr.msk.bf16.mxu1 %vm7186_vm4, %v6666_v3  ;;  %584 = vst.msk [vmem:[#allocation2 + $0x31] sm:$0xff] %vm457_vm0, %v551_v12  ;;  %587 = vst.msk [vmem:[#allocation2 + $0x51] sm:$0xff] %vm457_vm0, %v554_v13  ;;  %v578_v12 = vmax.f32 %v546_v8, 0.0  ;;  %v577_v13 = vmax.f32 %v545_v9, 0.0  ;;  %v5932_v9 = vld [vmem:[%s9316_s3 + $0x20] sm:$0xff] }
  0x4a   : > { %6671 = vmatpush3.bf16.msk.msra.mxu0 %vm7186_vm4, %v6666_v3  ;;  %6703 = vmatpush3.bf16.msk.msra.mxu1 %vm7186_vm4, %v6666_v3  ;;  %586 = vst.msk [vmem:[#allocation2 + $0x49] sm:$0xff] %vm457_vm0, %v553_v17  ;;  %589 = vst.msk [vmem:[#allocation2 + $0x69] sm:$0xff] %vm457_vm0, %v556_v18 }
  0x4b   : > { %588 = vst.msk [vmem:[#allocation2 + $0x61] sm:$0xff] %vm457_vm0, %v555_v22  ;;  %591 = vst.msk [vmem:[#allocation2 + $0x81] sm:$0xff] %vm457_vm0, %v558_v23 }
  0x4c   : > { %590 = vst.msk [vmem:[#allocation2 + $0x79] sm:$0xff] %vm457_vm0, %v557_v24  ;;  %593 = vst.msk [vmem:[#allocation2 + $0x99] sm:$0xff] %vm457_vm0, %v560_v28 }
  0x4d   : > { %592 = vst.msk [vmem:[#allocation2 + $0x91] sm:$0xff] %vm457_vm0, %v559_v29  ;;  %595 = vst.msk [vmem:[#allocation2 + $0xb1] sm:$0xff] %vm457_vm0, %v562_v30 }
  0x4e   : > { %594 = vst.msk [vmem:[#allocation2 + $0xa9] sm:$0xff] %vm457_vm0, %v561_v34  ;;  %597 = vst.msk [vmem:[#allocation2 + $0xc9] sm:$0xff] %vm457_vm0, %v564_v35 }
  0x4f   : > { %596 = vst.msk [vmem:[#allocation2 + $0xc1] sm:$0xff] %vm457_vm0, %v563_v36  ;;  %599 = vst.msk [vmem:[#allocation2 + $0xe1] sm:$0xff] %vm457_vm0, %v566_v39  ;;  %v7254_v56 = vld [vmem:[#allocation2 + $0x39] sm:$0xff] }
  0x50   : > { %598 = vst.msk [vmem:[#allocation2 + $0xd9] sm:$0xff] %vm457_vm0, %v565_v40  ;;  %v7256_v57 = vld [vmem:[#allocation2 + $0x31] sm:$0xff]  ;;  %601 = vst.msk [vmem:[#allocation2 + $0xf9] sm:$0xff] %vm457_vm0, %v568_v44  ;;  %1271 = vrot.lane.b32.xlu1 %v7254_v56, %s6887_s12  ;;  %v7268_v61 = vld [vmem:[#allocation2 + $0x3a] sm:$0xff] }
  0x51   : > { %600 = vst.msk [vmem:[#allocation2 + $0xf1] sm:$0xff] %vm457_vm0, %v567_v45  ;;  %603 = vst.msk [vmem:[#allocation2 + $0x111] sm:$0xff] %vm457_vm0, %v570_v46  ;;  %1269 = vrot.lane.b32.xlu0 %v7256_v57, %s6887_s12  ;;  %v7270_v62 = vld [vmem:[#allocation2 + $0x32] sm:$0xff]  ;;  %v7281_v0 = vld [vmem:[#allocation2 + $0x49] sm:$0xff] }
  0x52   : > { %602 = vst.msk [vmem:[#allocation2 + $0x109] sm:$0xff] %vm457_vm0, %v569_v50  ;;  %605 = vst.msk [vmem:[#allocation2 + $0x129] sm:$0xff] %vm457_vm0, %v572_v51  ;;  %v7279_v63 = vld [vmem:[#allocation2 + $0x51] sm:$0xff]  ;;  %v7295_v3 = vld [vmem:[#allocation2 + $0x69] sm:$0xff]  ;;  %v580_v50 = vmax.f32 %v548_v48, 0.0  ;;  %v579_v51 = vmax.f32 %v547_v49, 0.0 }
  0x53   : > { %604 = vst.msk [vmem:[#allocation2 + $0x121] sm:$0xff] %vm457_vm0, %v571_v52  ;;  %607 = vst.msk [vmem:[#allocation2 + $0x141] sm:$0xff] %vm457_vm0, %v574_v58  ;;  %v7287_v1 = vld [vmem:[#allocation2 + $0x52] sm:$0xff]  ;;  %v7289_v2 = vld [vmem:[#allocation2 + $0x4a] sm:$0xff] }
  0x54   : > { %606 = vst.msk [vmem:[#allocation2 + $0x139] sm:$0xff] %vm457_vm0, %v573_v59  ;;  %609 = vst.msk [vmem:[#allocation2 + $0x159] sm:$0xff] %vm457_vm0, %v576_v60  ;;  %1415 = vrot.lane.b32.xlu1 %v7268_v61, %s6886_s11  ;;  %v7297_v5 = vld [vmem:[#allocation2 + $0x61] sm:$0xff]  ;;  %v7306_v10 = vld [vmem:[#allocation2 + $0x6a] sm:$0xff] }
  0x55   : > { %1413 = vrot.lane.b32.xlu0 %v7270_v62, %s6886_s11  ;;  %v7308_v11 = vld [vmem:[#allocation2 + $0x62] sm:$0xff]  ;;  %608 = vst.msk [vmem:[#allocation2 + $0x151] sm:$0xff] %vm457_vm0, %v575_v7  ;;  %611 = vst.msk [vmem:[#allocation2 + $0x171] sm:$0xff] %vm457_vm0, %v578_v12  ;;  %v7319_v15 = vld [vmem:[#allocation2 + $0x79] sm:$0xff] }
  0x56   : > { %610 = vst.msk [vmem:[#allocation2 + $0x169] sm:$0xff] %vm457_vm0, %v577_v13  ;;  %v7317_v14 = vld [vmem:[#allocation2 + $0x81] sm:$0xff]  ;;  %v7333_v18 = vld [vmem:[#allocation2 + $0x99] sm:$0xff]  ;;  %v7335_v19 = vld [vmem:[#allocation2 + $0x91] sm:$0xff] }
  0x57   : > { %v7325_v16 = vld [vmem:[#allocation2 + $0x82] sm:$0xff]  ;;  %v7327_v17 = vld [vmem:[#allocation2 + $0x7a] sm:$0xff]  ;;  %v7343_v21 = vld [vmem:[#allocation2 + $0x92] sm:$0xff]  ;;  %613 = vst.msk [vmem:[#allocation2 + $0x189] sm:$0xff] %vm457_vm0, %v580_v50 }
  0x58   : > { %1275 = vrot.lane.b32.xlu1 %v7279_v63, %s6887_s12  ;;  %v7341_v20 = vld [vmem:[#allocation2 + $0x9a] sm:$0xff]  ;;  %v7349_v22 = vld [vmem:[#allocation2 + $0xb1] sm:$0xff]  ;;  %v7351_v23 = vld [vmem:[#allocation2 + $0xa9] sm:$0xff]  ;;  %612 = vst.msk [vmem:[#allocation2 + $0x181] sm:$0xff] %vm457_vm0, %v579_v51 }
  0x59   : > { %1273 = vrot.lane.b32.xlu0 %v7281_v0, %s6887_s12  ;;  %v7357_v24 = vld [vmem:[#allocation2 + $0xb2] sm:$0xff]  ;;  %v7359_v25 = vld [vmem:[#allocation2 + $0xaa] sm:$0xff]  ;;  %v7367_v27 = vld [vmem:[#allocation2 + $0xc1] sm:$0xff] }
  0x5a   : > { %v7365_v26 = vld [vmem:[#allocation2 + $0xc9] sm:$0xff]  ;;  %v7381_v30 = vld [vmem:[#allocation2 + $0xe1] sm:$0xff]  ;;  %v7383_v31 = vld [vmem:[#allocation2 + $0xd9] sm:$0xff] }
  0x5b   : > { %v7373_v28 = vld [vmem:[#allocation2 + $0xca] sm:$0xff]  ;;  %v7375_v29 = vld [vmem:[#allocation2 + $0xc2] sm:$0xff]  ;;  %v7391_v33 = vld [vmem:[#allocation2 + $0xda] sm:$0xff] }
  0x5c   : > { %1419 = vrot.lane.b32.xlu1 %v7287_v1, %s6886_s11  ;;  %v7389_v32 = vld [vmem:[#allocation2 + $0xe2] sm:$0xff]  ;;  %v7397_v34 = vld [vmem:[#allocation2 + $0xf9] sm:$0xff]  ;;  %v7399_v35 = vld [vmem:[#allocation2 + $0xf1] sm:$0xff] }
  0x5d   : > { %1417 = vrot.lane.b32.xlu0 %v7289_v2, %s6886_s11  ;;  %v7405_v36 = vld [vmem:[#allocation2 + $0xfa] sm:$0xff]  ;;  %v7407_v37 = vld [vmem:[#allocation2 + $0xf2] sm:$0xff]  ;;  %v7415_v39 = vld [vmem:[#allocation2 + $0x109] sm:$0xff] }
  0x5e   : > { %v7413_v38 = vld [vmem:[#allocation2 + $0x111] sm:$0xff]  ;;  %v7429_v42 = vld [vmem:[#allocation2 + $0x129] sm:$0xff]  ;;  %v7431_v43 = vld [vmem:[#allocation2 + $0x121] sm:$0xff] }
  0x5f   : > { %v7421_v40 = vld [vmem:[#allocation2 + $0x112] sm:$0xff]  ;;  %v7423_v41 = vld [vmem:[#allocation2 + $0x10a] sm:$0xff]  ;;  %v7439_v45 = vld [vmem:[#allocation2 + $0x122] sm:$0xff] }
  0x60   : > { %1279 = vrot.lane.b32.xlu1 %v7295_v3, %s6887_s12  ;;  %v7437_v44 = vld [vmem:[#allocation2 + $0x12a] sm:$0xff]  ;;  %v7445_v46 = vld [vmem:[#allocation2 + $0x141] sm:$0xff]  ;;  %v7447_v47 = vld [vmem:[#allocation2 + $0x139] sm:$0xff] }
  0x61   : > { %1277 = vrot.lane.b32.xlu0 %v7297_v5, %s6887_s12  ;;  %v7455_v52 = vld [vmem:[#allocation2 + $0x142] sm:$0xff]  ;;  %v7457_v53 = vld [vmem:[#allocation2 + $0x13a] sm:$0xff]  ;;  %v7467_v55 = vld [vmem:[#allocation2 + $0x151] sm:$0xff] }
  0x62   : > { %v7465_v54 = vld [vmem:[#allocation2 + $0x159] sm:$0xff]  ;;  %v549_v59 = vld [vmem:[%s7207_s10 + $0xf0] sm:$0xff]  ;;  %v5933_v12 = vld [vmem:[%s9316_s3 + $0x28] sm:$0xf] }
  0x63   : > { %v550_v58 = vld [vmem:[%s7207_s10 + $0xf8] sm:$0xff]  ;;  %v581_v6 = vmax.f32 %v549_v59, 0.0  ;;  %v6672_v13 = vpack.c.bf16 %v5933_v12, %v5932_v9  ;;  %v7493_v49 = vld [vmem:[#allocation2 + $0x169] sm:$0xff]  ;;  %v1122_v12 = vld [vmem:[#allocation2 + $0x20] sm:$0xff] }
  0x64   : > { %1423 = vrot.lane.b32.xlu1 %v7306_v10, %s6886_s11  ;;  %v582_v60 = vmax.f32 %v550_v58, 0.0  ;;  %v7475_v7 = vld [vmem:[#allocation2 + $0x15a] sm:$0xff]  ;;  %v7477_v8 = vld [vmem:[#allocation2 + $0x152] sm:$0xff]  ;;  %9341 = vst [vmem:[#allocation7_spill] sm:$0xff] %v7493_v49 }
  0x65   : > { %1421 = vrot.lane.b32.xlu0 %v7308_v11, %s6886_s11  ;;  %9338 = vst [vmem:[#allocation4_spill] sm:$0xff] %v7475_v7  ;;  %9339 = vst [vmem:[#allocation5_spill] sm:$0xff] %v7477_v8  ;;  %v7491_v48 = vld [vmem:[#allocation2 + $0x171] sm:$0xff]  ;;  %6674 = vmatprep.subr.msk.bf16.mxu0 %vm7186_vm4, %v6672_v13 }
  0x66   : > { %615 = vst.msk [vmem:[#allocation2 + $0x1a1] sm:$0xff] %vm457_vm0, %v582_v60  ;;  %614 = vst.msk [vmem:[#allocation2 + $0x199] sm:$0xff] %vm457_vm0, %v581_v6  ;;  %v1121_v50 = vld [vmem:[#allocation2 + $0x18] sm:$0xff]  ;;  %v7503_v60 = vld [vmem:[#allocation2 + $0x16a] sm:$0xff] }
  0x67   : > { %9340 = vst [vmem:[#allocation6_spill] sm:$0xff] %v7491_v48  ;;  %v7501_v59 = vld [vmem:[#allocation2 + $0x172] sm:$0xff] }
  0x68   : > { %1283 = vrot.lane.b32.xlu1 %v7317_v14, %s6887_s12 }
  0x69   : > { %1281 = vrot.lane.b32.xlu0 %v7319_v15, %s6887_s12 }
  0x6c   : > { %1427 = vrot.lane.b32.xlu1 %v7325_v16, %s6886_s11 }
  0x6d   : > { %1425 = vrot.lane.b32.xlu0 %v7327_v17, %s6886_s11 }
  0x70   : > { %1287 = vrot.lane.b32.xlu1 %v7333_v18, %s6887_s12 }
  0x71   : > { %1285 = vrot.lane.b32.xlu0 %v7335_v19, %s6887_s12 }
  0x74   : > { %1431 = vrot.lane.b32.xlu1 %v7341_v20, %s6886_s11 }
  0x75   : > { %1429 = vrot.lane.b32.xlu0 %v7343_v21, %s6886_s11 }
  0x78   : > { %1291 = vrot.lane.b32.xlu1 %v7349_v22, %s6887_s12 }
  0x79   : > { %1289 = vrot.lane.b32.xlu0 %v7351_v23, %s6887_s12 }
  0x7c   : > { %1435 = vrot.lane.b32.xlu1 %v7357_v24, %s6886_s11 }
  0x7d   : > { %1433 = vrot.lane.b32.xlu0 %v7359_v25, %s6886_s11 }
  0x80   : > { %1295 = vrot.lane.b32.xlu1 %v7365_v26, %s6887_s12 }
  0x81   : > { %1293 = vrot.lane.b32.xlu0 %v7367_v27, %s6887_s12 }
  0x84   : > { %1439 = vrot.lane.b32.xlu1 %v7373_v28, %s6886_s11 }
  0x85   : > { %1437 = vrot.lane.b32.xlu0 %v7375_v29, %s6886_s11 }
  0x88   : > { %1299 = vrot.lane.b32.xlu1 %v7381_v30, %s6887_s12 }
  0x89   : > { %1297 = vrot.lane.b32.xlu0 %v7383_v31, %s6887_s12  ;;  %v1410_v51 = vpop.permute.xlu1 %1409 }
  0x8a   : > { %v1266_v58 = vpop.permute.xlu0 %1265 }
  0x8b   : > { %v1517_v6 = vsel %vm457_vm0, %v1121_v50, %v1266_v58  ;;  %v7521_v58 = vld [vmem:[#allocation2 + $0x38] sm:$0xff] }
  0x8c   : > { %1443 = vrot.lane.b32.xlu1 %v7389_v32, %s6886_s11  ;;  %v1553_v9 = vsel %vm1081_vm5, %v1517_v6, %v1410_v51  ;;  %v7523_v6 = vld [vmem:[#allocation2 + $0x30] sm:$0xff] }
  0x8d   : > { %1441 = vrot.lane.b32.xlu0 %v7391_v33, %s6886_s11  ;;  %6340 = vmatprep.mubr.msk.f32.mxu0 %vm1592_vm6, %v1553_v9  ;;  %v7543_v9 = vld [vmem:[#allocation2 + $0x48] sm:$0xff] }
  0x90   : > { %1303 = vrot.lane.b32.xlu1 %v7397_v34, %s6887_s12 }
  0x91   : > { %1301 = vrot.lane.b32.xlu0 %v7399_v35, %s6887_s12 }
  0x94   : > { %1447 = vrot.lane.b32.xlu1 %v7405_v36, %s6886_s11 }
  0x95   : > { %1445 = vrot.lane.b32.xlu0 %v7407_v37, %s6886_s11 }
  0x98   : > { %1307 = vrot.lane.b32.xlu1 %v7413_v38, %s6887_s12 }
  0x99   : > { %1305 = vrot.lane.b32.xlu0 %v7415_v39, %s6887_s12 }
  0x9c   : > { %1451 = vrot.lane.b32.xlu1 %v7421_v40, %s6886_s11 }
  0x9d   : > { %1449 = vrot.lane.b32.xlu0 %v7423_v41, %s6886_s11 }
  0xa0   : > { %1311 = vrot.lane.b32.xlu1 %v7429_v42, %s6887_s12 }
  0xa1   : > { %1309 = vrot.lane.b32.xlu0 %v7431_v43, %s6887_s12 }
  0xa4   : > { %1455 = vrot.lane.b32.xlu1 %v7437_v44, %s6886_s11 }
  0xa5   : > { %1453 = vrot.lane.b32.xlu0 %v7439_v45, %s6886_s11 }
  0xa8   : > { %1315 = vrot.lane.b32.xlu1 %v7445_v46, %s6887_s12 }
  0xa9   : > { %1313 = vrot.lane.b32.xlu0 %v7447_v47, %s6887_s12 }
  0xac   : > { %1459 = vrot.lane.b32.xlu1 %v7455_v52, %s6886_s11 }
  0xad   : > { %1457 = vrot.lane.b32.xlu0 %v7457_v53, %s6886_s11 }
  0xb0   : > { %1319 = vrot.lane.b32.xlu1 %v7465_v54, %s6887_s12 }
  0xb1   : > { %1317 = vrot.lane.b32.xlu0 %v7467_v55, %s6887_s12 }
  0xb4   : > { %1463 = vrot.lane.b32.xlu1 %v7475_v7, %s6886_s11 }
  0xb5   : > { %1461 = vrot.lane.b32.xlu0 %v7477_v8, %s6886_s11 }
  0xb8   : > { %1323 = vrot.lane.b32.xlu1 %v7491_v48, %s6887_s12  ;;  %v1268_v48 = vpop.permute.xlu0 %1267 }
  0xb9   : > { %1321 = vrot.lane.b32.xlu0 %v7493_v49, %s6887_s12  ;;  %v1412_v49 = vpop.permute.xlu1 %1411  ;;  %v1518_v8 = vsel %vm457_vm0, %v1122_v12, %v1268_v48 }
  0xba   : > { %v1554_v7 = vsel %vm1081_vm5, %v1518_v8, %v1412_v49  ;;  %v7541_v49 = vld [vmem:[#allocation2 + $0x50] sm:$0xff] }
  0xbb   : > { %6341 = vmatmul.mubr.msk.f32.vlgmr.msra.gmra.mrb[0].mxu0 %vm1592_vm6, %v1554_v7 }
  0xbc   : > { %1467 = vrot.lane.b32.xlu1 %v7501_v59, %s6886_s11  ;;  %6677 = vmatpush3.bf16.msk.msra.mxu0 %vm7186_vm4, %v6672_v13 }
  0xbd   : > { %1465 = vrot.lane.b32.xlu0 %v7503_v60, %s6886_s11 }
  0xc0   : > { %2096 = vrot.lane.b32.xlu1 %v7254_v56, %s6887_s12 }
  0xc1   : > { %2094 = vrot.lane.b32.xlu0 %v7256_v57, %s6887_s12 }
  0xc2   : > { %v1272_v50 = vpop.permute.xlu1 %1271 }
  0xc3   : > { %v1270_v51 = vpop.permute.xlu0 %1269  ;;  %v1520_v56 = vsel %vm457_vm0, %v7521_v58, %v1272_v50 }
  0xc4   : > { %2240 = vrot.lane.b32.xlu1 %v7268_v61, %s6886_s11  ;;  %v1519_v57 = vsel %vm457_vm0, %v7523_v6, %v1270_v51 }
  0xc5   : > { %2238 = vrot.lane.b32.xlu0 %v7270_v62, %s6886_s11 }
  0xc6   : > { %v1416_v7 = vpop.permute.xlu1 %1415 }
  0xc7   : > { %v1414_v8 = vpop.permute.xlu0 %1413  ;;  %v1556_v13 = vsel %vm1081_vm5, %v1520_v56, %v1416_v7  ;;  %v7563_v7 = vld [vmem:[#allocation2 + $0x60] sm:$0xff] }
  0xc8   : > { %v1555_v48 = vsel %vm1081_vm5, %v1519_v57, %v1414_v8  ;;  %2100 = vrot.lane.b32.xlu1 %v7279_v63, %s6887_s12  ;;  %v7561_v57 = vld [vmem:[#allocation2 + $0x68] sm:$0xff] }
  0xc9   : > { %2098 = vrot.lane.b32.xlu0 %v7281_v0, %s6887_s12  ;;  %6343 = vmatprep.mubr.msk.f32.mxu0 %vm1592_vm6, %v1555_v48 }
  0xca   : > { %6344 = vmatmul.mubr.msk.f32.gmra.mrb[2].mxu0 %vm1592_vm6, %v1556_v13  ;;  %v1276_v61 = vpop.permute.xlu1 %1275 }
  0xcb   : > { %v1274_v62 = vpop.permute.xlu0 %1273  ;;  %v1522_v63 = vsel %vm457_vm0, %v7541_v49, %v1276_v61 }
  0xcc   : > { %2244 = vrot.lane.b32.xlu1 %v7287_v1, %s6886_s11  ;;  %v1521_v0 = vsel %vm457_vm0, %v7543_v9, %v1274_v62  ;;  %v7581_v62 = vld [vmem:[#allocation2 + $0x80] sm:$0xff] }
  0xcd   : > { %2242 = vrot.lane.b32.xlu0 %v7289_v2, %s6886_s11 }
  0xce   : > { %v1420_v12 = vpop.permute.xlu1 %1419 }
  0xcf   : > { %v1418_v50 = vpop.permute.xlu0 %1417  ;;  %v1558_v51 = vsel %vm1081_vm5, %v1522_v63, %v1420_v12  ;;  %v7583_v63 = vld [vmem:[#allocation2 + $0x78] sm:$0xff] }
  0xd0   : > { %v1557_v56 = vsel %vm1081_vm5, %v1521_v0, %v1418_v50  ;;  %2104 = vrot.lane.b32.xlu1 %v7295_v3, %s6887_s12 }
  0xd1   : > { %2102 = vrot.lane.b32.xlu0 %v7297_v5, %s6887_s12  ;;  %6346 = vmatprep.mubr.msk.f32.mxu0 %vm1592_vm6, %v1557_v56  ;;  %v7601_v56 = vld [vmem:[#allocation2 + $0x98] sm:$0xff] }
  0xd2   : > { %6347 = vmatmul.mubr.msk.f32.gmra.mrb[4].mxu0 %vm1592_vm6, %v1558_v51  ;;  %v1280_v1 = vpop.permute.xlu1 %1279 }
  0xd3   : > { %v1278_v2 = vpop.permute.xlu0 %1277  ;;  %v1524_v3 = vsel %vm457_vm0, %v7561_v57, %v1280_v1  ;;  %v7603_v1 = vld [vmem:[#allocation2 + $0x90] sm:$0xff] }
  0xd4   : > { %2248 = vrot.lane.b32.xlu1 %v7306_v10, %s6886_s11  ;;  %v1523_v5 = vsel %vm457_vm0, %v7563_v7, %v1278_v2 }
  0xd5   : > { %2246 = vrot.lane.b32.xlu0 %v7308_v11, %s6886_s11 }
  0xd6   : > { %v1424_v8 = vpop.permute.xlu1 %1423 }
  0xd7   : > { %v1422_v13 = vpop.permute.xlu0 %1421  ;;  %v1560_v48 = vsel %vm1081_vm5, %v1524_v3, %v1424_v8 }
  0xd8   : > { %v1559_v61 = vsel %vm1081_vm5, %v1523_v5, %v1422_v13  ;;  %2108 = vrot.lane.b32.xlu1 %v7317_v14, %s6887_s12  ;;  %v7621_v13 = vld [vmem:[#allocation2 + $0xb0] sm:$0xff] }
  0xd9   : > { %2106 = vrot.lane.b32.xlu0 %v7319_v15, %s6887_s12  ;;  %6349 = vmatprep.mubr.msk.f32.mxu0 %vm1592_vm6, %v1559_v61 }
  0xda   : > { %6350 = vmatmul.mubr.msk.f32.gmra.mrb[6].mxu0 %vm1592_vm6, %v1560_v48  ;;  %v1284_v10 = vpop.permute.xlu1 %1283  ;;  %v7623_v48 = vld [vmem:[#allocation2 + $0xa8] sm:$0xff] }
  0xdb   : > { %v1282_v11 = vpop.permute.xlu0 %1281  ;;  %v1526_v14 = vsel %vm457_vm0, %v7581_v62, %v1284_v10 }
  0xdc   : > { %2252 = vrot.lane.b32.xlu1 %v7325_v16, %s6886_s11  ;;  %v1525_v15 = vsel %vm457_vm0, %v7583_v63, %v1282_v11 }
  0xdd   : > { %2250 = vrot.lane.b32.xlu0 %v7327_v17, %s6886_s11 }
  0xde   : > { %v1428_v0 = vpop.permute.xlu1 %1427 }
  0xdf   : > { %v1426_v12 = vpop.permute.xlu0 %1425  ;;  %v1562_v50 = vsel %vm1081_vm5, %v1526_v14, %v1428_v0  ;;  %v7643_v0 = vld [vmem:[#allocation2 + $0xc0] sm:$0xff] }
  0xe0   : > { %v1561_v51 = vsel %vm1081_vm5, %v1525_v15, %v1426_v12  ;;  %2112 = vrot.lane.b32.xlu1 %v7333_v18, %s6887_s12  ;;  %v7641_v15 = vld [vmem:[#allocation2 + $0xc8] sm:$0xff] }
  0xe1   : > { %2110 = vrot.lane.b32.xlu0 %v7335_v19, %s6887_s12  ;;  %6352 = vmatprep.mubr.msk.f32.mxu0 %vm1592_vm6, %v1561_v51 }
  0xe2   : > { %6353 = vmatmul.mubr.msk.f32.gmra.mrb[8].mxu0 %vm1592_vm6, %v1562_v50  ;;  %v1288_v16 = vpop.permute.xlu1 %1287 }
  0xe3   : > { %v1286_v17 = vpop.permute.xlu0 %1285  ;;  %v1528_v18 = vsel %vm457_vm0, %v7601_v56, %v1288_v16 }
  0xe4   : > { %2256 = vrot.lane.b32.xlu1 %v7341_v20, %s6886_s11  ;;  %v1527_v19 = vsel %vm457_vm0, %v7603_v1, %v1286_v17  ;;  %v7661_v17 = vld [vmem:[#allocation2 + $0xe0] sm:$0xff] }
  0xe5   : > { %2254 = vrot.lane.b32.xlu0 %v7343_v21, %s6886_s11 }
  0xe6   : > { %v1432_v2 = vpop.permute.xlu1 %1431 }
  0xe7   : > { %v1430_v3 = vpop.permute.xlu0 %1429  ;;  %v1564_v5 = vsel %vm1081_vm5, %v1528_v18, %v1432_v2  ;;  %v7663_v18 = vld [vmem:[#allocation2 + $0xd8] sm:$0xff] }
  0xe8   : > { %v1563_v8 = vsel %vm1081_vm5, %v1527_v19, %v1430_v3  ;;  %2116 = vrot.lane.b32.xlu1 %v7349_v22, %s6887_s12 }
  0xe9   : > { %2114 = vrot.lane.b32.xlu0 %v7351_v23, %s6887_s12  ;;  %6355 = vmatprep.mubr.msk.f32.mxu0 %vm1592_vm6, %v1563_v8  ;;  %v7681_v8 = vld [vmem:[#allocation2 + $0xf8] sm:$0xff] }
  0xea   : > { %6356 = vmatmul.mubr.msk.f32.gmra.mrb[10].mxu0 %vm1592_vm6, %v1564_v5  ;;  %v1292_v20 = vpop.permute.xlu1 %1291 }
  0xeb   : > { %v1290_v21 = vpop.permute.xlu0 %1289  ;;  %v1530_v22 = vsel %vm457_vm0, %v7621_v13, %v1292_v20  ;;  %v7683_v20 = vld [vmem:[#allocation2 + $0xf0] sm:$0xff] }
  0xec   : > { %2260 = vrot.lane.b32.xlu1 %v7357_v24, %s6886_s11  ;;  %v1529_v23 = vsel %vm457_vm0, %v7623_v48, %v1290_v21 }
  0xed   : > { %2258 = vrot.lane.b32.xlu0 %v7359_v25, %s6886_s11 }
  0xee   : > { %v1436_v61 = vpop.permute.xlu1 %1435 }
  0xef   : > { %v1434_v10 = vpop.permute.xlu0 %1433  ;;  %v1566_v11 = vsel %vm1081_vm5, %v1530_v22, %v1436_v61 }
  0xf0   : > { %v1565_v14 = vsel %vm1081_vm5, %v1529_v23, %v1434_v10  ;;  %2120 = vrot.lane.b32.xlu1 %v7365_v26, %s6887_s12  ;;  %v7701_v10 = vld [vmem:[#allocation2 + $0x110] sm:$0xff] }
  0xf1   : > { %2118 = vrot.lane.b32.xlu0 %v7367_v27, %s6887_s12  ;;  %6358 = vmatprep.mubr.msk.f32.mxu0 %vm1592_vm6, %v1565_v14 }
  0xf2   : > { %6359 = vmatmul.mubr.msk.f32.gmra.mrb[12].mxu0 %vm1592_vm6, %v1566_v11  ;;  %v1296_v24 = vpop.permute.xlu1 %1295  ;;  %v7703_v11 = vld [vmem:[#allocation2 + $0x108] sm:$0xff] }
  0xf3   : > { %v1294_v25 = vpop.permute.xlu0 %1293  ;;  %v1532_v26 = vsel %vm457_vm0, %v7641_v15, %v1296_v24 }
  0xf4   : > { %2264 = vrot.lane.b32.xlu1 %v7373_v28, %s6886_s11  ;;  %v1531_v27 = vsel %vm457_vm0, %v7643_v0, %v1294_v25 }
  0xf5   : > { %2262 = vrot.lane.b32.xlu0 %v7375_v29, %s6886_s11 }
  0xf6   : > { %v1440_v12 = vpop.permute.xlu1 %1439 }
  0xf7   : > { %v1438_v50 = vpop.permute.xlu0 %1437  ;;  %v1568_v51 = vsel %vm1081_vm5, %v1532_v26, %v1440_v12 }
  0xf8   : > { %v1567_v16 = vsel %vm1081_vm5, %v1531_v27, %v1438_v50  ;;  %2124 = vrot.lane.b32.xlu1 %v7381_v30, %s6887_s12 }
  0xf9   : > { %2122 = vrot.lane.b32.xlu0 %v7383_v31, %s6887_s12  ;;  %6361 = vmatprep.mubr.msk.f32.mxu0 %vm1592_vm6, %v1567_v16 }
  0xfa   : > { %6362 = vmatmul.mubr.msk.f32.gmra.mrb[14].mxu0 %vm1592_vm6, %v1568_v51  ;;  %v1300_v28 = vpop.permute.xlu1 %1299  ;;  %v7731_v51 = vld [vmem:[#allocation2 + $0x120] sm:$0xff] }
  0xfb   : > { %v1298_v29 = vpop.permute.xlu0 %1297  ;;  %v1534_v30 = vsel %vm457_vm0, %v7661_v17, %v1300_v28 }
  0xfc   : > { %2268 = vrot.lane.b32.xlu1 %v7389_v32, %s6886_s11  ;;  %v1533_v31 = vsel %vm457_vm0, %v7663_v18, %v1298_v29 }
  0xfd   : > { %2266 = vrot.lane.b32.xlu0 %v7391_v33, %s6886_s11 }
  0xfe   : > { %v1444_v19 = vpop.permute.xlu1 %1443 }
  0xff   : > { %v1442_v2 = vpop.permute.xlu0 %1441  ;;  %v1570_v3 = vsel %vm1081_vm5, %v1534_v30, %v1444_v19  ;;  %v7752_v19 = vld [vmem:[#allocation2 + $0x140] sm:$0xff] }
 0x100   : > { %v1569_v5 = vsel %vm1081_vm5, %v1533_v31, %v1442_v2  ;;  %2128 = vrot.lane.b32.xlu1 %v7397_v34, %s6887_s12  ;;  %v7754_v2 = vld [vmem:[#allocation2 + $0x138] sm:$0xff] }
 0x101   : > { %2126 = vrot.lane.b32.xlu0 %v7399_v35, %s6887_s12  ;;  %6364 = vmatprep.mubr.msk.f32.mxu0 %vm1592_vm6, %v1569_v5 }
 0x102   : > { %6365 = vmatmul.mubr.msk.f32.gmra.mrb[16].mxu0 %vm1592_vm6, %v1570_v3  ;;  %v1304_v32 = vpop.permute.xlu1 %1303 }
 0x103   : > { %v1302_v33 = vpop.permute.xlu0 %1301  ;;  %v1536_v34 = vsel %vm457_vm0, %v7681_v8, %v1304_v32 }
 0x104   : > { %2272 = vrot.lane.b32.xlu1 %v7405_v36, %s6886_s11  ;;  %v1535_v35 = vsel %vm457_vm0, %v7683_v20, %v1302_v33 }
 0x105   : > { %2270 = vrot.lane.b32.xlu0 %v7407_v37, %s6886_s11 }
 0x106   : > { %v1448_v21 = vpop.permute.xlu1 %1447 }
 0x107   : > { %v1446_v22 = vpop.permute.xlu0 %1445  ;;  %v1572_v23 = vsel %vm1081_vm5, %v1536_v34, %v1448_v21  ;;  %v7772_v34 = vld [vmem:[#allocation2 + $0x158] sm:$0xff]  ;;  %v9342_v21 = vld [vmem:[#allocation4_spill] sm:$0xff] }
 0x108   : > { %v1571_v61 = vsel %vm1081_vm5, %v1535_v35, %v1446_v22  ;;  %2132 = vrot.lane.b32.xlu1 %v7413_v38, %s6887_s12  ;;  %v7774_v35 = vld [vmem:[#allocation2 + $0x150] sm:$0xff]  ;;  %v9343_v22 = vld [vmem:[#allocation5_spill] sm:$0xff] }
 0x109   : > { %2130 = vrot.lane.b32.xlu0 %v7415_v39, %s6887_s12  ;;  %6367 = vmatprep.mubr.msk.f32.mxu0 %vm1592_vm6, %v1571_v61 }
 0x10a   : > { %6368 = vmatmul.mubr.msk.f32.gmra.mrb[18].mxu0 %vm1592_vm6, %v1572_v23  ;;  %v1308_v36 = vpop.permute.xlu1 %1307 }
 0x10b   : > { %v1306_v37 = vpop.permute.xlu0 %1305  ;;  %v1538_v38 = vsel %vm457_vm0, %v7701_v10, %v1308_v36 }
 0x10c   : > { %2276 = vrot.lane.b32.xlu1 %v7421_v40, %s6886_s11  ;;  %v1537_v39 = vsel %vm457_vm0, %v7703_v11, %v1306_v37  ;;  %v1118_v40 = vld [vmem:[%s9316_s3] sm:$0xff] }
 0x10d   : > { %2274 = vrot.lane.b32.xlu0 %v7423_v41, %s6886_s11  ;;  %v1119_v41 = vld [vmem:[%s9316_s3 + $0x8] sm:$0xf] }
 0x10e   : > { %v1452_v14 = vpop.permute.xlu1 %1451  ;;  %v7727_v50 = vpack.c.bf16 %v1119_v41, %v1118_v40  ;;  %v7800_v40 = vld [vmem:[#allocation2 + $0x189] sm:$0xff]  ;;  %v7802_v41 = vld [vmem:[#allocation2 + $0x181] sm:$0xff] }
 0x10f   : > { %v1450_v24 = vpop.permute.xlu0 %1449  ;;  %v1574_v25 = vsel %vm1081_vm5, %v1538_v38, %v1452_v14  ;;  %v9344_v38 = vld [vmem:[#allocation6_spill] sm:$0xff] }
 0x110   : > { %v1573_v26 = vsel %vm1081_vm5, %v1537_v39, %v1450_v24  ;;  %2136 = vrot.lane.b32.xlu1 %v7429_v42, %s6887_s12  ;;  %v7729_v42 = vld [vmem:[#allocation2 + $0x128] sm:$0xff]  ;;  %6680 = vmatprep.subr.msk.bf16.mxu0 %vm7186_vm4, %v7727_v50 }
 0x111   : > { %2134 = vrot.lane.b32.xlu0 %v7431_v43, %s6887_s12  ;;  %6370 = vmatprep.mubr.msk.f32.mxu0 %vm1592_vm6, %v1573_v26  ;;  %v9345_v39 = vld [vmem:[#allocation7_spill] sm:$0xff] }
 0x112   : > { %6371 = vmatmul.mubr.msk.f32.gmra.mrb[20].mxu0 %vm1592_vm6, %v1574_v25  ;;  %v1312_v27 = vpop.permute.xlu1 %1311  ;;  %v7792_v25 = vld [vmem:[#allocation2 + $0x170] sm:$0xff]  ;;  %v7794_v26 = vld [vmem:[#allocation2 + $0x168] sm:$0xff] }
 0x113   : > { %v1310_v12 = vpop.permute.xlu0 %1309  ;;  %v1540_v43 = vsel %vm457_vm0, %v7729_v42, %v1312_v27 }
 0x114   : > { %2280 = vrot.lane.b32.xlu1 %v7437_v44, %s6886_s11  ;;  %v1539_v16 = vsel %vm457_vm0, %v7731_v51, %v1310_v12 }
 0x115   : > { %2278 = vrot.lane.b32.xlu0 %v7439_v45, %s6886_s11 }
 0x116   : > { %v1456_v28 = vpop.permute.xlu1 %1455 }
 0x117   : > { %v1454_v29 = vpop.permute.xlu0 %1453  ;;  %v1576_v30 = vsel %vm1081_vm5, %v1540_v43, %v1456_v28 }
 0x118   : > { %v1575_v31 = vsel %vm1081_vm5, %v1539_v16, %v1454_v29  ;;  %2140 = vrot.lane.b32.xlu1 %v7445_v46, %s6887_s12 }
 0x119   : > { %2138 = vrot.lane.b32.xlu0 %v7447_v47, %s6887_s12  ;;  %6373 = vmatprep.mubr.msk.f32.mxu0 %vm1592_vm6, %v1575_v31 }
 0x11a   : > { %6374 = vmatmul.mubr.msk.f32.gmra.mrb[22].mxu0 %vm1592_vm6, %v1576_v30  ;;  %v1316_v44 = vpop.permute.xlu1 %1315 }
 0x11b   : > { %v1314_v45 = vpop.permute.xlu0 %1313  ;;  %v1542_v46 = vsel %vm457_vm0, %v7752_v19, %v1316_v44  ;;  %v7824_v44 = vld [vmem:[#allocation2 + $0x1a1] sm:$0xff] }
 0x11c   : > { %2284 = vrot.lane.b32.xlu1 %v7455_v52, %s6886_s11  ;;  %v1541_v47 = vsel %vm457_vm0, %v7754_v2, %v1314_v45  ;;  %v7826_v45 = vld [vmem:[#allocation2 + $0x199] sm:$0xff] }
 0x11d   : > { %2282 = vrot.lane.b32.xlu0 %v7457_v53, %s6886_s11 }
 0x11e   : > { %v1460_v3 = vpop.permute.xlu1 %1459 }
 0x11f   : > { %v1458_v5 = vpop.permute.xlu0 %1457  ;;  %v1578_v32 = vsel %vm1081_vm5, %v1542_v46, %v1460_v3 }
 0x120   : > { %v1577_v33 = vsel %vm1081_vm5, %v1541_v47, %v1458_v5  ;;  %2144 = vrot.lane.b32.xlu1 %v7465_v54, %s6887_s12 }
 0x121   : > { %2142 = vrot.lane.b32.xlu0 %v7467_v55, %s6887_s12  ;;  %6376 = vmatprep.mubr.msk.f32.mxu0 %vm1592_vm6, %v1577_v33 }
 0x122   : > { %6377 = vmatmul.mubr.msk.f32.gmra.mrb[24].mxu0 %vm1592_vm6, %v1578_v32  ;;  %v1320_v52 = vpop.permute.xlu1 %1319 }
 0x123   : > { %v1318_v53 = vpop.permute.xlu0 %1317  ;;  %v1544_v54 = vsel %vm457_vm0, %v7772_v34, %v1320_v52  ;;  %v7839_v52 = vld [vmem:[#allocation2 + $0x1a2] sm:$0xff] }
 0x124   : > { %2288 = vrot.lane.b32.xlu1 %v9342_v21, %s6886_s11  ;;  %v1543_v55 = vsel %vm457_vm0, %v7774_v35, %v1318_v53  ;;  %v2019_v21 = vld [vmem:[#allocation2 + $0x1b9] sm:$0xff] }
 0x125   : > { %2286 = vrot.lane.b32.xlu0 %v9343_v22, %s6886_s11  ;;  %v2018_v22 = vld [vmem:[#allocation2 + $0x1b1] sm:$0xff] }
 0x126   : > { %v1464_v23 = vpop.permute.xlu1 %1463 }
 0x127   : > { %v1462_v61 = vpop.permute.xlu0 %1461  ;;  %v1580_v36 = vsel %vm1081_vm5, %v1544_v54, %v1464_v23 }
 0x128   : > { %v1579_v37 = vsel %vm1081_vm5, %v1543_v55, %v1462_v61  ;;  %2148 = vrot.lane.b32.xlu1 %v9344_v38, %s6887_s12  ;;  %v2054_v38 = vld [vmem:[#allocation2 + $0x1b2] sm:$0xff] }
 0x129   : > { %2146 = vrot.lane.b32.xlu0 %v9345_v39, %s6887_s12  ;;  %6379 = vmatprep.mubr.msk.f32.mxu0 %vm1592_vm6, %v1579_v37  ;;  %v2055_v37 = vld [vmem:[#allocation2 + $0x1ba] sm:$0xff] }
 0x12a   : > { %6380 = vmatmul.mubr.msk.f32.gmra.mrb[26].mxu0 %vm1592_vm6, %v1580_v36  ;;  %v1324_v14 = vpop.permute.xlu1 %1323 }
 0x12b   : > { %v1322_v24 = vpop.permute.xlu0 %1321  ;;  %v1546_v27 = vsel %vm457_vm0, %v7792_v25, %v1324_v14  ;;  %v2020_v14 = vld [vmem:[#allocation2 + $0x1c9] sm:$0xff] }
 0x12c   : > { %2292 = vrot.lane.b32.xlu1 %v7501_v59, %s6886_s11  ;;  %v1545_v12 = vsel %vm457_vm0, %v7794_v26, %v1322_v24  ;;  %v7815_v59 = vld [vmem:[#allocation2 + $0x18a] sm:$0xff] }
 0x12d   : > { %2290 = vrot.lane.b32.xlu0 %v7503_v60, %s6886_s11  ;;  %v7817_v60 = vld [vmem:[#allocation2 + $0x182] sm:$0xff] }
 0x12e   : > { %v1468_v43 = vpop.permute.xlu1 %1467 }
 0x12f   : > { %v1466_v16 = vpop.permute.xlu0 %1465  ;;  %v1582_v28 = vsel %vm1081_vm5, %v1546_v27, %v1468_v43 }
 0x130   : > { %v1581_v29 = vsel %vm1081_vm5, %v1545_v12, %v1466_v16  ;;  %2152 = vrot.lane.b32.xlu1 %v7800_v40, %s6887_s12 }
 0x131   : > { %2150 = vrot.lane.b32.xlu0 %v7802_v41, %s6887_s12  ;;  %6382 = vmatprep.mubr.msk.f32.mxu0 %vm1592_vm6, %v1581_v29  ;;  %v2057_v29 = vld [vmem:[#allocation2 + $0x1d2] sm:$0xff] }
 0x132   : > { %6383 = vmatmul.mubr.msk.f32.gmra.mrb[28].mxu0 %vm1592_vm6, %v1582_v28  ;;  %v2097_v30 = vpop.permute.xlu1 %2096 }
 0x133   : > { %v2095_v31 = vpop.permute.xlu0 %2094  ;;  %v2347_v46 = vsel %vm457_vm0, %v7521_v58, %v2097_v30  ;;  %v7841_v58 = vld [vmem:[#allocation2 + $0x19a] sm:$0xff]  ;;  %v2056_v30 = vld [vmem:[#allocation2 + $0x1ca] sm:$0xff] }
 0x134   : > { %2296 = vrot.lane.b32.xlu1 %v7815_v59, %s6886_s11  ;;  %v2346_v47 = vsel %vm457_vm0, %v7523_v6, %v2095_v31 }
 0x135   : > { %2294 = vrot.lane.b32.xlu0 %v7817_v60, %s6886_s11 }
 0x136   : > { %v2241_v3 = vpop.permute.xlu1 %2240 }
 0x137   : > { %v2239_v5 = vpop.permute.xlu0 %2238  ;;  %v2383_v32 = vsel %vm1081_vm5, %v2347_v46, %v2241_v3  ;;  %v685_v46 = vld [vmem:[#allocation2 + $0x1] sm:$0xff] }
 0x138   : > { %v2382_v33 = vsel %vm1081_vm5, %v2346_v47, %v2239_v5  ;;  %2156 = vrot.lane.b32.xlu1 %v7824_v44, %s6887_s12 }
 0x139   : > { %2154 = vrot.lane.b32.xlu0 %v7826_v45, %s6887_s12  ;;  %6398 = vmatprep.mubr.msk.f32.mxu0 %vm1592_vm6, %v2382_v33 }
 0x13a   : > { %6399 = vmatmul.mubr.msk.f32.vlgmr.msra.gmra.mrb[30].mxu0 %vm1592_vm6, %v2383_v32  ;;  %v2101_v6 = vpop.permute.xlu1 %2100 }
 0x13b   : > { %v2099_v53 = vpop.permute.xlu0 %2098  ;;  %6683 = vmatpush3.bf16.msk.msra.mxu0 %vm7186_vm4, %v7727_v50  ;;  %v2349_v54 = vsel %vm457_vm0, %v7541_v49, %v2101_v6 }
 0x13c   : > { %2300 = vrot.lane.b32.xlu1 %v7839_v52, %s6886_s11  ;;  %v2348_v55 = vsel %vm457_vm0, %v7543_v9, %v2099_v53  ;;  %v2021_v9 = vld [vmem:[#allocation2 + $0x1d1] sm:$0xff] }
 0x13d   : > { %2298 = vrot.lane.b32.xlu0 %v7841_v58, %s6886_s11  ;;  %v722_v53 = vld [vmem:[#allocation2 + $0xa] sm:$0xff] }
 0x13e   : > { %v2245_v23 = vpop.permute.xlu1 %2244 }
 0x13f   : > { %v2243_v61 = vpop.permute.xlu0 %2242  ;;  %v2385_v36 = vsel %vm1081_vm5, %v2349_v54, %v2245_v23  ;;  %v687_v54 = vld [vmem:[#allocation2 + $0x19] sm:$0xff] }
 0x140   : > { %v2384_v50 = vsel %vm1081_vm5, %v2348_v55, %v2243_v61  ;;  %2160 = vrot.lane.b32.xlu1 %v2019_v21, %s6887_s12  ;;  %v721_v21 = vld [vmem:[#allocation2 + $0x2] sm:$0xff] }
 0x141   : > { %2158 = vrot.lane.b32.xlu0 %v2018_v22, %s6887_s12  ;;  %6401 = vmatprep.mubr.msk.f32.mxu0 %vm1592_vm6, %v2384_v50 }
 0x142   : > { %6402 = vmatmul.mubr.msk.f32.gmra.mrb[2].mxu0 %vm1592_vm6, %v2385_v36  ;;  %v2105_v49 = vpop.permute.xlu1 %2104 }
 0x143   : > { %v2103_v39 = vpop.permute.xlu0 %2102  ;;  %v2351_v24 = vsel %vm457_vm0, %v7561_v57, %v2105_v49  ;;  %v723_v49 = vld [vmem:[#allocation2 + $0x1a] sm:$0xff] }
 0x144   : > { %2304 = vrot.lane.b32.xlu1 %v2055_v37, %s6886_s11  ;;  %v2350_v27 = vsel %vm457_vm0, %v7563_v7, %v2103_v39  ;;  %v686_v7 = vld [vmem:[#allocation2 + $0x9] sm:$0xff] }
 0x145   : > { %2302 = vrot.lane.b32.xlu0 %v2054_v38, %s6886_s11  ;;  %v724_v38 = vld [vmem:[#allocation2 + $0x22] sm:$0xff] }
 0x146   : > { %v2249_v12 = vpop.permute.xlu1 %2248 }
 0x147   : > { %v2247_v43 = vpop.permute.xlu0 %2246  ;;  %v2387_v16 = vsel %vm1081_vm5, %v2351_v24, %v2249_v12  ;;  %v689_v12 = vld [vmem:[#allocation2 + $0x31] sm:$0xff] }
 0x148   : > { %v2386_v28 = vsel %vm1081_vm5, %v2350_v27, %v2247_v43  ;;  %2164 = vrot.lane.b32.xlu1 %v2021_v9, %s6887_s12 }
 0x149   : > { %2162 = vrot.lane.b32.xlu0 %v2020_v14, %s6887_s12  ;;  %6404 = vmatprep.mubr.msk.f32.mxu0 %vm1592_vm6, %v2386_v28  ;;  %v726_v28 = vld [vmem:[#allocation2 + $0x3a] sm:$0xff] }
 0x14a   : > { %6405 = vmatmul.mubr.msk.f32.gmra.mrb[4].mxu0 %vm1592_vm6, %v2387_v16  ;;  %v2109_v57 = vpop.permute.xlu1 %2108 }
 0x14b   : > { %v2107_v31 = vpop.permute.xlu0 %2106  ;;  %v2353_v47 = vsel %vm457_vm0, %v7581_v62, %v2109_v57 }
 0x14c   : > { %2308 = vrot.lane.b32.xlu1 %v2057_v29, %s6886_s11  ;;  %v2352_v3 = vsel %vm457_vm0, %v7583_v63, %v2107_v31  ;;  %v688_v63 = vld [vmem:[#allocation2 + $0x21] sm:$0xff] }
 0x14d   : > { %2306 = vrot.lane.b32.xlu0 %v2056_v30, %s6886_s11  ;;  %v725_v30 = vld [vmem:[#allocation2 + $0x32] sm:$0xff] }
 0x14e   : > { %v2253_v5 = vpop.permute.xlu1 %2252 }
 0x14f   : > { %v2251_v32 = vpop.permute.xlu0 %2250  ;;  %v2389_v33 = vsel %vm1081_vm5, %v2353_v47, %v2253_v5  ;;  %v691_v47 = vld [vmem:[#allocation2 + $0x49] sm:$0xff] }
 0x150   : > { %v2388_v6 = vsel %vm1081_vm5, %v2352_v3, %v2251_v32  ;;  %795 = vrot.lane.b32.xlu1 %v686_v7, %s6887_s12  ;;  %v728_v32 = vld [vmem:[#allocation2 + $0x52] sm:$0xff] }
 0x151   : > { %793 = vrot.lane.b32.xlu0 %v685_v46, %s6887_s12  ;;  %6407 = vmatprep.mubr.msk.f32.mxu0 %vm1592_vm6, %v2388_v6  ;;  %v727_v6 = vld [vmem:[#allocation2 + $0x4a] sm:$0xff] }
 0x152   : > { %6408 = vmatmul.mubr.msk.f32.gmra.mrb[6].mxu0 %vm1592_vm6, %v2389_v33  ;;  %v2113_v62 = vpop.permute.xlu1 %2112 }
 0x153   : > { %v2111_v22 = vpop.permute.xlu0 %2110  ;;  %v2355_v55 = vsel %vm457_vm0, %v7601_v56, %v2113_v62 }
 0x154   : > { %939 = vrot.lane.b32.xlu1 %v722_v53, %s6886_s11  ;;  %v2354_v23 = vsel %vm457_vm0, %v7603_v1, %v2111_v22  ;;  %v690_v1 = vld [vmem:[#allocation2 + $0x39] sm:$0xff] }
 0x155   : > { %937 = vrot.lane.b32.xlu0 %v721_v21, %s6886_s11 }
 0x156   : > { %v2257_v61 = vpop.permute.xlu1 %2256 }
 0x157   : > { %v2255_v36 = vpop.permute.xlu0 %2254  ;;  %v2391_v50 = vsel %vm1081_vm5, %v2355_v55, %v2257_v61 }
 0x158   : > { %v2390_v37 = vsel %vm1081_vm5, %v2354_v23, %v2255_v36  ;;  %799 = vrot.lane.b32.xlu1 %v688_v63, %s6887_s12  ;;  %v693_v63 = vld [vmem:[#allocation2 + $0x61] sm:$0xff]  ;;  %v730_v23 = vld [vmem:[#allocation2 + $0x6a] sm:$0xff] }
 0x159   : > { %797 = vrot.lane.b32.xlu0 %v687_v54, %s6887_s12  ;;  %6410 = vmatprep.mubr.msk.f32.mxu0 %vm1592_vm6, %v2390_v37  ;;  %v729_v36 = vld [vmem:[#allocation2 + $0x62] sm:$0xff] }
 0x15a   : > { %6411 = vmatmul.mubr.msk.f32.gmra.mrb[8].mxu0 %vm1592_vm6, %v2391_v50  ;;  %v2117_v56 = vpop.permute.xlu1 %2116 }
 0x15b   : > { %v2115_v39 = vpop.permute.xlu0 %2114  ;;  %v2357_v9 = vsel %vm457_vm0, %v7621_v13, %v2117_v56  ;;  %v695_v56 = vld [vmem:[#allocation2 + $0x79] sm:$0xff] }
 0x15c   : > { %943 = vrot.lane.b32.xlu1 %v724_v38, %s6886_s11  ;;  %v2356_v14 = vsel %vm457_vm0, %v7623_v48, %v2115_v39  ;;  %v692_v48 = vld [vmem:[#allocation2 + $0x51] sm:$0xff] }
 0x15d   : > { %941 = vrot.lane.b32.xlu0 %v723_v49, %s6886_s11 }
 0x15e   : > { %v2261_v24 = vpop.permute.xlu1 %2260 }
 0x15f   : > { %v2259_v27 = vpop.permute.xlu0 %2258  ;;  %v2393_v43 = vsel %vm1081_vm5, %v2357_v9, %v2261_v24  ;;  %v732_v9 = vld [vmem:[#allocation2 + $0x82] sm:$0xff]  ;;  %v731_v24 = vld [vmem:[#allocation2 + $0x7a] sm:$0xff] }
 0x160   : > { %v2392_v16 = vsel %vm1081_vm5, %v2356_v14, %v2259_v27  ;;  %803 = vrot.lane.b32.xlu1 %v690_v1, %s6887_s12 }
 0x161   : > { %6413 = vmatprep.mubr.msk.f32.mxu0 %vm1592_vm6, %v2392_v16  ;;  %801 = vrot.lane.b32.xlu0 %v689_v12, %s6887_s12 }
 0x162   : > { %6414 = vmatmul.mubr.msk.f32.gmra.mrb[10].mxu0 %vm1592_vm6, %v2393_v43  ;;  %v2121_v13 = vpop.permute.xlu1 %2120 }
 0x163   : > { %v2119_v29 = vpop.permute.xlu0 %2118  ;;  %v2359_v57 = vsel %vm457_vm0, %v7641_v15, %v2121_v13 }
 0x164   : > { %947 = vrot.lane.b32.xlu1 %v726_v28, %s6886_s11  ;;  %v2358_v31 = vsel %vm457_vm0, %v7643_v0, %v2119_v29  ;;  %v694_v0 = vld [vmem:[#allocation2 + $0x69] sm:$0xff]  ;;  %v697_v28 = vld [vmem:[#allocation2 + $0x91] sm:$0xff] }
 0x165   : > { %945 = vrot.lane.b32.xlu0 %v725_v30, %s6886_s11  ;;  %v734_v30 = vld [vmem:[#allocation2 + $0x9a] sm:$0xff] }
 0x166   : > { %v2265_v7 = vpop.permute.xlu1 %2264 }
 0x167   : > { %v2263_v46 = vpop.permute.xlu0 %2262  ;;  %v2395_v3 = vsel %vm1081_vm5, %v2359_v57, %v2265_v7  ;;  %v733_v57 = vld [vmem:[#allocation2 + $0x92] sm:$0xff] }
 0x168   : > { %v2394_v5 = vsel %vm1081_vm5, %v2358_v31, %v2263_v46  ;;  %807 = vrot.lane.b32.xlu1 %v692_v48, %s6887_s12 }
 0x169   : > { %6416 = vmatprep.mubr.msk.f32.mxu0 %vm1592_vm6, %v2394_v5  ;;  %805 = vrot.lane.b32.xlu0 %v691_v47, %s6887_s12 }
 0x16a   : > { %6417 = vmatmul.mubr.msk.f32.gmra.mrb[12].mxu0 %vm1592_vm6, %v2395_v3  ;;  %v2125_v15 = vpop.permute.xlu1 %2124  ;;  %v699_v3 = vld [vmem:[#allocation2 + $0xa9] sm:$0xff] }
 0x16b   : > { %v2123_v33 = vpop.permute.xlu0 %2122  ;;  %v2361_v53 = vsel %vm457_vm0, %v7661_v17, %v2125_v15  ;;  %v736_v15 = vld [vmem:[#allocation2 + $0xb2] sm:$0xff] }
 0x16c   : > { %951 = vrot.lane.b32.xlu1 %v728_v32, %s6886_s11  ;;  %v2360_v21 = vsel %vm457_vm0, %v7663_v18, %v2123_v33  ;;  %v696_v18 = vld [vmem:[#allocation2 + $0x81] sm:$0xff] }
 0x16d   : > { %949 = vrot.lane.b32.xlu0 %v727_v6, %s6886_s11  ;;  %v735_v6 = vld [vmem:[#allocation2 + $0xaa] sm:$0xff] }
 0x16e   : > { %v2269_v62 = vpop.permute.xlu1 %2268 }
 0x16f   : > { %v2267_v22 = vpop.permute.xlu0 %2266  ;;  %v2397_v54 = vsel %vm1081_vm5, %v2361_v53, %v2269_v62 }
 0x170   : > { %v2396_v55 = vsel %vm1081_vm5, %v2360_v21, %v2267_v22  ;;  %811 = vrot.lane.b32.xlu1 %v694_v0, %s6887_s12  ;;  %v701_v22 = vld [vmem:[#allocation2 + $0xc1] sm:$0xff] }
 0x171   : > { %6419 = vmatprep.mubr.msk.f32.mxu0 %vm1592_vm6, %v2396_v55  ;;  %809 = vrot.lane.b32.xlu0 %v693_v63, %s6887_s12  ;;  %v738_v55 = vld [vmem:[#allocation2 + $0xca] sm:$0xff] }
 0x172   : > { %6420 = vmatmul.mubr.msk.f32.gmra.mrb[14].mxu0 %vm1592_vm6, %v2397_v54  ;;  %v2129_v17 = vpop.permute.xlu1 %2128 }
 0x173   : > { %v2127_v61 = vpop.permute.xlu0 %2126  ;;  %v2363_v50 = vsel %vm457_vm0, %v7681_v8, %v2129_v17  ;;  %v737_v17 = vld [vmem:[#allocation2 + $0xc2] sm:$0xff] }
 0x174   : > { %955 = vrot.lane.b32.xlu1 %v730_v23, %s6886_s11  ;;  %v2362_v37 = vsel %vm457_vm0, %v7683_v20, %v2127_v61  ;;  %v698_v20 = vld [vmem:[#allocation2 + $0x99] sm:$0xff] }
 0x175   : > { %953 = vrot.lane.b32.xlu0 %v729_v36, %s6886_s11  ;;  %v704_v36 = vld [vmem:[#allocation2 + $0xe1] sm:$0xff] }
 0x176   : > { %v2273_v38 = vpop.permute.xlu1 %2272 }
 0x177   : > { %v2271_v49 = vpop.permute.xlu0 %2270  ;;  %v2399_v39 = vsel %vm1081_vm5, %v2363_v50, %v2273_v38 }
 0x178   : > { %v2398_v1 = vsel %vm1081_vm5, %v2362_v37, %v2271_v49  ;;  %815 = vrot.lane.b32.xlu1 %v696_v18, %s6887_s12  ;;  %v703_v49 = vld [vmem:[#allocation2 + $0xd9] sm:$0xff] }
 0x179   : > { %6422 = vmatprep.mubr.msk.f32.mxu0 %vm1592_vm6, %v2398_v1  ;;  %813 = vrot.lane.b32.xlu0 %v695_v56, %s6887_s12  ;;  %v740_v1 = vld [vmem:[#allocation2 + $0xe2] sm:$0xff] }
 0x17a   : > { %6423 = vmatmul.mubr.msk.f32.gmra.mrb[16].mxu0 %vm1592_vm6, %v2399_v39  ;;  %v2133_v8 = vpop.permute.xlu1 %2132 }
 0x17b   : > { %v2131_v14 = vpop.permute.xlu0 %2130  ;;  %v2365_v27 = vsel %vm457_vm0, %v7701_v10, %v2133_v8  ;;  %v739_v8 = vld [vmem:[#allocation2 + $0xda] sm:$0xff] }
 0x17c   : > { %959 = vrot.lane.b32.xlu1 %v732_v9, %s6886_s11  ;;  %v2364_v12 = vsel %vm457_vm0, %v7703_v11, %v2131_v14  ;;  %v700_v11 = vld [vmem:[#allocation2 + $0xb1] sm:$0xff] }
 0x17d   : > { %957 = vrot.lane.b32.xlu0 %v731_v24, %s6886_s11 }
 0x17e   : > { %v2277_v43 = vpop.permute.xlu1 %2276 }
 0x17f   : > { %v2275_v16 = vpop.permute.xlu0 %2274  ;;  %v2401_v13 = vsel %vm1081_vm5, %v2365_v27, %v2277_v43 }
 0x180   : > { %v2400_v29 = vsel %vm1081_vm5, %v2364_v12, %v2275_v16  ;;  %819 = vrot.lane.b32.xlu1 %v698_v20, %s6887_s12  ;;  %v705_v12 = vld [vmem:[#allocation2 + $0xf1] sm:$0xff] }
 0x181   : > { %6425 = vmatprep.mubr.msk.f32.mxu0 %vm1592_vm6, %v2400_v29  ;;  %817 = vrot.lane.b32.xlu0 %v697_v28, %s6887_s12  ;;  %v742_v28 = vld [vmem:[#allocation2 + $0xfa] sm:$0xff]  ;;  %v741_v29 = vld [vmem:[#allocation2 + $0xf2] sm:$0xff] }
 0x182   : > { %6426 = vmatmul.mubr.msk.f32.gmra.mrb[18].mxu0 %vm1592_vm6, %v2401_v13  ;;  %v2137_v10 = vpop.permute.xlu1 %2136 }
 0x183   : > { %v2135_v48 = vpop.permute.xlu0 %2134  ;;  %v2367_v31 = vsel %vm457_vm0, %v7729_v42, %v2137_v10  ;;  %v708_v10 = vld [vmem:[#allocation2 + $0x111] sm:$0xff] }
 0x184   : > { %963 = vrot.lane.b32.xlu1 %v734_v30, %s6886_s11  ;;  %v2366_v7 = vsel %vm457_vm0, %v7731_v51, %v2135_v48  ;;  %v702_v51 = vld [vmem:[#allocation2 + $0xc9] sm:$0xff]  ;;  %v8007_v30 = vld [vmem:[#allocation2 + $0x180] sm:$0xff] }
 0x185   : > { %961 = vrot.lane.b32.xlu0 %v733_v57, %s6886_s11 }
 0x186   : > { %v2281_v46 = vpop.permute.xlu1 %2280 }
 0x187   : > { %v2279_v47 = vpop.permute.xlu0 %2278  ;;  %v2403_v5 = vsel %vm1081_vm5, %v2367_v31, %v2281_v46 }
 0x188   : > { %v2402_v32 = vsel %vm1081_vm5, %v2366_v7, %v2279_v47  ;;  %823 = vrot.lane.b32.xlu1 %v700_v11, %s6887_s12  ;;  %v707_v7 = vld [vmem:[#allocation2 + $0x109] sm:$0xff] }
 0x189   : > { %6428 = vmatprep.mubr.msk.f32.mxu0 %vm1592_vm6, %v2402_v32  ;;  %821 = vrot.lane.b32.xlu0 %v699_v3, %s6887_s12  ;;  %v744_v3 = vld [vmem:[#allocation2 + $0x112] sm:$0xff] }
 0x18a   : > { %6429 = vmatmul.mubr.msk.f32.gmra.mrb[20].mxu0 %vm1592_vm6, %v2403_v5  ;;  %v2141_v42 = vpop.permute.xlu1 %2140 }
 0x18b   : > { %v2139_v33 = vpop.permute.xlu0 %2138  ;;  %v2369_v0 = vsel %vm457_vm0, %v7752_v19, %v2141_v42  ;;  %v8021_v42 = vld [vmem:[#allocation2 + $0x1a0] sm:$0xff] }
 0x18c   : > { %967 = vrot.lane.b32.xlu1 %v736_v15, %s6886_s11  ;;  %v2368_v53 = vsel %vm457_vm0, %v7754_v2, %v2139_v33  ;;  %v743_v15 = vld [vmem:[#allocation2 + $0x10a] sm:$0xff]  ;;  %v8023_v33 = vld [vmem:[#allocation2 + $0x198] sm:$0xff] }
 0x18d   : > { %965 = vrot.lane.b32.xlu0 %v735_v6, %s6886_s11  ;;  %v710_v6 = vld [vmem:[#allocation2 + $0x129] sm:$0xff] }
 0x18e   : > { %v2285_v21 = vpop.permute.xlu1 %2284  ;;  %v6342_v2 = vpop.f32.mrb[0].mxu0 }
 0x18f   : > { %v2283_v62 = vpop.permute.xlu0 %2282  ;;  %v2405_v63 = vsel %vm1081_vm5, %v2369_v0, %v2285_v21  ;;  %v1771_v61 = vpop.f32.mrb[1].mxu0  ;;  %v1982_v2 = vld [vmem:[#allocation2 + $0x1b0] sm:$0xff] }
 0x190   : > { %v2404_v54 = vsel %vm1081_vm5, %v2368_v53, %v2283_v62  ;;  %827 = vrot.lane.b32.xlu1 %v702_v51, %s6887_s12  ;;  %v709_v62 = vld [vmem:[#allocation2 + $0x121] sm:$0xff] }
 0x191   : > { %6431 = vmatprep.mubr.msk.f32.mxu0 %vm1592_vm6, %v2404_v54  ;;  %825 = vrot.lane.b32.xlu0 %v701_v22, %s6887_s12  ;;  %v746_v54 = vld [vmem:[#allocation2 + $0x12a] sm:$0xff]  ;;  %v712_v61 = vld [vmem:[#allocation2 + $0x141] sm:$0xff] }
 0x192   : > { %6432 = vmatmul.mubr.msk.f32.gmra.mrb[22].mxu0 %vm1592_vm6, %v2405_v63  ;;  %v2145_v19 = vpop.permute.xlu1 %2144 }
 0x193   : > { %v2143_v23 = vpop.permute.xlu0 %2142  ;;  %v2371_v18 = vsel %vm457_vm0, %v7772_v34, %v2145_v19 }
 0x194   : > { %971 = vrot.lane.b32.xlu1 %v738_v55, %s6886_s11  ;;  %v2370_v50 = vsel %vm457_vm0, %v7774_v35, %v2143_v23  ;;  %v706_v35 = vld [vmem:[#allocation2 + $0xf9] sm:$0xff]  ;;  %v745_v23 = vld [vmem:[#allocation2 + $0x122] sm:$0xff] }
 0x195   : > { %969 = vrot.lane.b32.xlu0 %v737_v17, %s6886_s11  ;;  %v1983_v17 = vld [vmem:[#allocation2 + $0x1b8] sm:$0xff] }
 0x196   : > { %v2289_v37 = vpop.permute.xlu1 %2288 }
 0x197   : > { %v2287_v38 = vpop.permute.xlu0 %2286  ;;  %v2407_v56 = vsel %vm1081_vm5, %v2371_v18, %v2289_v37 }
 0x198   : > { %v2406_v39 = vsel %vm1081_vm5, %v2370_v50, %v2287_v38  ;;  %831 = vrot.lane.b32.xlu1 %v704_v36, %s6887_s12  ;;  %v711_v38 = vld [vmem:[#allocation2 + $0x139] sm:$0xff] }
 0x199   : > { %6434 = vmatprep.mubr.msk.f32.mxu0 %vm1592_vm6, %v2406_v39  ;;  %829 = vrot.lane.b32.xlu0 %v703_v49, %s6887_s12  ;;  %v748_v39 = vld [vmem:[#allocation2 + $0x142] sm:$0xff] }
 0x19a   : > { %6435 = vmatmul.mubr.msk.f32.gmra.mrb[24].mxu0 %vm1592_vm6, %v2407_v56  ;;  %v2149_v34 = vpop.permute.xlu1 %2148 }
 0x19b   : > { %v2147_v9 = vpop.permute.xlu0 %2146  ;;  %v2373_v14 = vsel %vm457_vm0, %v7792_v25, %v2149_v34 }
 0x19c   : > { %975 = vrot.lane.b32.xlu1 %v740_v1, %s6886_s11  ;;  %v2372_v24 = vsel %vm457_vm0, %v7794_v26, %v2147_v9  ;;  %v8005_v26 = vld [vmem:[#allocation2 + $0x188] sm:$0xff]  ;;  %v747_v9 = vld [vmem:[#allocation2 + $0x13a] sm:$0xff] }
 0x19d   : > { %973 = vrot.lane.b32.xlu0 %v739_v8, %s6886_s11  ;;  %v1985_v8 = vld [vmem:[#allocation2 + $0x1d0] sm:$0xff] }
 0x19e   : > { %v2293_v20 = vpop.permute.xlu1 %2292 }
 0x19f   : > { %v2291_v27 = vpop.permute.xlu0 %2290  ;;  %v2409_v43 = vsel %vm1081_vm5, %v2373_v14, %v2293_v20  ;;  %v714_v14 = vld [vmem:[#allocation2 + $0x159] sm:$0xff] }
 0x1a0   : > { %v2408_v16 = vsel %vm1081_vm5, %v2372_v24, %v2291_v27  ;;  %835 = vrot.lane.b32.xlu1 %v706_v35, %s6887_s12  ;;  %v1984_v35 = vld [vmem:[#allocation2 + $0x1c8] sm:$0xff] }
 0x1a1   : > { %6437 = vmatprep.mubr.msk.f32.mxu0 %vm1592_vm6, %v2408_v16  ;;  %833 = vrot.lane.b32.xlu0 %v705_v12, %s6887_s12 }
 0x1a2   : > { %6438 = vmatmul.mubr.msk.f32.gmra.mrb[26].mxu0 %vm1592_vm6, %v2409_v43  ;;  %v2153_v25 = vpop.permute.xlu1 %2152  ;;  %v713_v43 = vld [vmem:[#allocation2 + $0x151] sm:$0xff] }
 0x1a3   : > { %v2151_v13 = vpop.permute.xlu0 %2150  ;;  %v2375_v48 = vsel %vm457_vm0, %v8005_v26, %v2153_v25  ;;  %v750_v25 = vld [vmem:[#allocation2 + $0x15a] sm:$0xff] }
 0x1a4   : > { %979 = vrot.lane.b32.xlu1 %v742_v28, %s6886_s11  ;;  %v2374_v57 = vsel %vm457_vm0, %v8007_v30, %v2151_v13 }
 0x1a5   : > { %977 = vrot.lane.b32.xlu0 %v741_v29, %s6886_s11 }
 0x1a6   : > { %v2297_v11 = vpop.permute.xlu1 %2296 }
 0x1a7   : > { %v2295_v31 = vpop.permute.xlu0 %2294  ;;  %v2411_v46 = vsel %vm1081_vm5, %v2375_v48, %v2297_v11  ;;  %v650_v48 = vld [vmem:[#allocation2 + $0x8] sm:$0xff] }
 0x1a8   : > { %v2410_v47 = vsel %vm1081_vm5, %v2374_v57, %v2295_v31  ;;  %839 = vrot.lane.b32.xlu1 %v708_v10, %s6887_s12  ;;  %v749_v10 = vld [vmem:[#allocation2 + $0x152] sm:$0xff]  ;;  %v649_v57 = vld [vmem:[#allocation2] sm:$0xff] }
 0x1a9   : > { %6440 = vmatprep.mubr.msk.f32.mxu0 %vm1592_vm6, %v2410_v47  ;;  %837 = vrot.lane.b32.xlu0 %v707_v7, %s6887_s12  ;;  %v715_v47 = vld [vmem:[#allocation2 + $0x169] sm:$0xff] }
 0x1aa   : > { %6441 = vmatmul.mubr.msk.f32.gmra.mrb[28].mxu0 %vm1592_vm6, %v2411_v46  ;;  %v2157_v5 = vpop.permute.xlu1 %2156 }
 0x1ab   : > { %v2155_v32 = vpop.permute.xlu0 %2154  ;;  %v2377_v51 = vsel %vm457_vm0, %v8021_v42, %v2157_v5 }
 0x1ac   : > { %983 = vrot.lane.b32.xlu1 %v744_v3, %s6886_s11  ;;  %v2376_v0 = vsel %vm457_vm0, %v8023_v33, %v2155_v32  ;;  %v751_v32 = vld [vmem:[#allocation2 + $0x16a] sm:$0xff] }
 0x1ad   : > { %981 = vrot.lane.b32.xlu0 %v743_v15, %s6886_s11 }
 0x1ae   : > { %v2301_v53 = vpop.permute.xlu1 %2300 }
 0x1af   : > { %v2299_v21 = vpop.permute.xlu0 %2298  ;;  %v2413_v22 = vsel %vm1081_vm5, %v2377_v51, %v2301_v53  ;;  %v716_v51 = vld [vmem:[#allocation2 + $0x171] sm:$0xff] }
 0x1b0   : > { %v2412_v63 = vsel %vm1081_vm5, %v2376_v0, %v2299_v21  ;;  %843 = vrot.lane.b32.xlu1 %v710_v6, %s6887_s12  ;;  %v652_v0 = vld [vmem:[#allocation2 + $0x20] sm:$0xff]  ;;  %v651_v53 = vld [vmem:[#allocation2 + $0x18] sm:$0xff] }
 0x1b1   : > { %6443 = vmatprep.mubr.msk.f32.mxu0 %vm1592_vm6, %v2412_v63  ;;  %841 = vrot.lane.b32.xlu0 %v709_v62, %s6887_s12 }
 0x1b2   : > { %6444 = vmatmul.mubr.msk.f32.gmra.mrb[32].mxu0 %vm1592_vm6, %v2413_v22  ;;  %v2161_v55 = vpop.permute.xlu1 %2160 }
 0x1b3   : > { %v2159_v19 = vpop.permute.xlu0 %2158  ;;  %v2379_v36 = vsel %vm457_vm0, %v1983_v17, %v2161_v55  ;;  %v654_v17 = vld [vmem:[#allocation2 + $0x38] sm:$0xff] }
 0x1b4   : > { %987 = vrot.lane.b32.xlu1 %v746_v54, %s6886_s11  ;;  %v2378_v18 = vsel %vm457_vm0, %v1982_v2, %v2159_v19 }
 0x1b5   : > { %985 = vrot.lane.b32.xlu0 %v745_v23, %s6886_s11  ;;  %v752_v23 = vld [vmem:[#allocation2 + $0x172] sm:$0xff] }
 0x1b6   : > { %v2305_v50 = vpop.permute.xlu1 %2304 }
 0x1b7   : > { %v2303_v37 = vpop.permute.xlu0 %2302  ;;  %v2415_v49 = vsel %vm1081_vm5, %v2379_v36, %v2305_v50 }
 0x1b8   : > { %v2414_v56 = vsel %vm1081_vm5, %v2378_v18, %v2303_v37  ;;  %847 = vrot.lane.b32.xlu1 %v712_v61, %s6887_s12  ;;  %v653_v61 = vld [vmem:[#allocation2 + $0x30] sm:$0xff] }
 0x1b9   : > { %6446 = vmatprep.mubr.msk.f32.mxu0 %vm1592_vm6, %v2414_v56  ;;  %845 = vrot.lane.b32.xlu0 %v711_v38, %s6887_s12 }
 0x1ba   : > { %6447 = vmatmul.mubr.msk.f32.gmra.mrb[34].mxu0 %vm1592_vm6, %v2415_v49  ;;  %v2165_v1 = vpop.permute.xlu1 %2164 }
 0x1bb   : > { %v2163_v34 = vpop.permute.xlu0 %2162  ;;  %v2381_v24 = vsel %vm457_vm0, %v1985_v8, %v2165_v1 }
 0x1bc   : > { %991 = vrot.lane.b32.xlu1 %v748_v39, %s6886_s11  ;;  %v2380_v20 = vsel %vm457_vm0, %v1984_v35, %v2163_v34  ;;  %v656_v39 = vld [vmem:[#allocation2 + $0x50] sm:$0xff]  ;;  %v655_v34 = vld [vmem:[#allocation2 + $0x48] sm:$0xff] }
 0x1bd   : > { %989 = vrot.lane.b32.xlu0 %v747_v9, %s6886_s11 }
 0x1be   : > { %v2309_v27 = vpop.permute.xlu1 %2308 }
 0x1bf   : > { %v2307_v12 = vpop.permute.xlu0 %2306  ;;  %v2417_v16 = vsel %vm1081_vm5, %v2381_v24, %v2309_v27 }
 0x1c0   : > { %v2416_v28 = vsel %vm1081_vm5, %v2380_v20, %v2307_v12  ;;  %851 = vrot.lane.b32.xlu1 %v714_v14, %s6887_s12  ;;  %v657_v20 = vld [vmem:[#allocation2 + $0x60] sm:$0xff] }
 0x1c1   : > { %6449 = vmatprep.mubr.msk.f32.mxu0 %vm1592_vm6, %v2416_v28  ;;  %849 = vrot.lane.b32.xlu0 %v713_v43, %s6887_s12 }
 0x1c2   : > { %6450 = vmatmul.mubr.msk.f32.gmra.mrb[36].mxu0 %vm1592_vm6, %v2417_v16  ;;  %v796_v13 = vpop.permute.xlu1 %795 }
 0x1c3   : > { %v794_v29 = vpop.permute.xlu0 %793  ;;  %v1046_v11 = vsel %vm457_vm0, %v650_v48, %v796_v13  ;;  %v659_v13 = vld [vmem:[#allocation2 + $0x78] sm:$0xff] }
 0x1c4   : > { %995 = vrot.lane.b32.xlu1 %v750_v25, %s6886_s11  ;;  %v1045_v31 = vsel %vm457_vm0, %v649_v57, %v794_v29  ;;  %v660_v25 = vld [vmem:[#allocation2 + $0x80] sm:$0xff] }
 0x1c5   : > { %993 = vrot.lane.b32.xlu0 %v749_v10, %s6886_s11 }
 0x1c6   : > { %v940_v7 = vpop.permute.xlu1 %939 }
 0x1c7   : > { %v938_v46 = vpop.permute.xlu0 %937  ;;  %v1083_v3 = vsel %vm1081_vm5, %v1046_v11, %v940_v7  ;;  %v662_v7 = vld [vmem:[#allocation2 + $0x98] sm:$0xff] }
 0x1c8   : > { %v1082_v5 = vsel %vm1081_vm5, %v1045_v31, %v938_v46  ;;  %1325 = vrot.lane.b32.xlu1 %v7802_v41, %s6887_s12 }
 0x1c9   : > { %6456 = vmatprep.mubr.msk.f32.mxu0 %vm1592_vm6, %v1082_v5  ;;  %853 = vrot.lane.b32.xlu0 %v715_v47, %s6887_s12  ;;  %v661_v47 = vld [vmem:[#allocation2 + $0x90] sm:$0xff] }
 0x1ca   : > { %6457 = vmatmul.mubr.msk.f32.vlgmr.msra.gmra.mrb[38].mxu0 %vm1592_vm6, %v1083_v3  ;;  %v800_v15 = vpop.permute.xlu1 %799 }
 0x1cb   : > { %v798_v6 = vpop.permute.xlu0 %797  ;;  %v1048_v21 = vsel %vm457_vm0, %v652_v0, %v800_v15 }
 0x1cc   : > { %997 = vrot.lane.b32.xlu1 %v751_v32, %s6886_s11  ;;  %v1047_v62 = vsel %vm457_vm0, %v651_v53, %v798_v6  ;;  %v664_v53 = vld [vmem:[#allocation2 + $0xb0] sm:$0xff] }
 0x1cd   : > { %855 = vrot.lane.b32.xlu0 %v716_v51, %s6887_s12 }
 0x1ce   : > { %v944_v22 = vpop.permute.xlu1 %943 }
 0x1cf   : > { %v942_v63 = vpop.permute.xlu0 %941  ;;  %v1085_v54 = vsel %vm1081_vm5, %v1048_v21, %v944_v22 }
 0x1d0   : > { %v1084_v55 = vsel %vm1081_vm5, %v1047_v62, %v942_v63  ;;  %1469 = vrot.lane.b32.xlu1 %v7817_v60, %s6886_s11  ;;  %v663_v62 = vld [vmem:[#allocation2 + $0xa8] sm:$0xff] }
 0x1d1   : > { %6459 = vmatprep.mubr.msk.f32.mxu0 %vm1592_vm6, %v1084_v55  ;;  %1327 = vrot.lane.b32.xlu0 %v7800_v40, %s6887_s12 }
 0x1d2   : > { %6460 = vmatmul.mubr.msk.f32.gmra.mrb[2].mxu0 %vm1592_vm6, %v1085_v54  ;;  %v804_v19 = vpop.permute.xlu1 %803 }
 0x1d3   : > { %v802_v2 = vpop.permute.xlu0 %801  ;;  %v1050_v36 = vsel %vm457_vm0, %v654_v17, %v804_v19 }
 0x1d4   : > { %1471 = vrot.lane.b32.xlu1 %v7815_v59, %s6886_s11  ;;  %v1049_v50 = vsel %vm457_vm0, %v653_v61, %v802_v2  ;;  %v666_v2 = vld [vmem:[#allocation2 + $0xc8] sm:$0xff] }
 0x1d5   : > { %999 = vrot.lane.b32.xlu0 %v752_v23, %s6886_s11 }
 0x1d6   : > { %v948_v18 = vpop.permute.xlu1 %947 }
 0x1d7   : > { %v1087_v37 = vsel %vm1081_vm5, %v1050_v36, %v948_v18  ;;  %v946_v38 = vpop.permute.xlu0 %945  ;;  %v665_v36 = vld [vmem:[#allocation2 + $0xc0] sm:$0xff] }
 0x1d8   : > { %v1086_v49 = vsel %vm1081_vm5, %v1049_v50, %v946_v38  ;;  %1329 = vrot.lane.b32.xlu1 %v7826_v45, %s6887_s12 }
 0x1d9   : > { %857 = vrot.lane.b32.xlu0 %v7802_v41, %s6887_s12  ;;  %6462 = vmatprep.mubr.msk.f32.mxu0 %vm1592_vm6, %v1086_v49 }
 0x1da   : > { %6463 = vmatmul.mubr.msk.f32.gmra.mrb[4].mxu0 %vm1592_vm6, %v1087_v37  ;;  %v808_v56 = vpop.permute.xlu1 %807 }
 0x1db   : > { %v806_v1 = vpop.permute.xlu0 %805  ;;  %v1052_v9 = vsel %vm457_vm0, %v656_v39, %v808_v56 }
 0x1dc   : > { %1001 = vrot.lane.b32.xlu1 %v7817_v60, %s6886_s11  ;;  %v1051_v8 = vsel %vm457_vm0, %v655_v34, %v806_v1  ;;  %v658_v60 = vld [vmem:[#allocation2 + $0x68] sm:$0xff]  ;;  %v668_v1 = vld [vmem:[#allocation2 + $0xe0] sm:$0xff] }
 0x1dd   : > { %859 = vrot.lane.b32.xlu0 %v7800_v40, %s6887_s12 }
 0x1de   : > { %v952_v45 = vpop.permute.xlu1 %951 }
 0x1df   : > { %v1089_v41 = vsel %vm1081_vm5, %v1052_v9, %v952_v45  ;;  %v950_v35 = vpop.permute.xlu0 %949  ;;  %v667_v9 = vld [vmem:[#allocation2 + $0xd8] sm:$0xff] }
 0x1e0   : > { %v1088_v14 = vsel %vm1081_vm5, %v1051_v8, %v950_v35  ;;  %1473 = vrot.lane.b32.xlu1 %v7841_v58, %s6886_s11 }
 0x1e1   : > { %1331 = vrot.lane.b32.xlu0 %v7824_v44, %s6887_s12  ;;  %6465 = vmatprep.mubr.msk.f32.mxu0 %vm1592_vm6, %v1088_v14 }
 0x1e2   : > { %6466 = vmatmul.mubr.msk.f32.gmra.mrb[6].mxu0 %vm1592_vm6, %v1089_v41  ;;  %v812_v40 = vpop.permute.xlu1 %811 }
 0x1e3   : > { %v810_v24 = vpop.permute.xlu0 %809  ;;  %v1054_v27 = vsel %vm457_vm0, %v658_v60, %v812_v40 }
 0x1e4   : > { %1475 = vrot.lane.b32.xlu1 %v7839_v52, %s6886_s11  ;;  %v1053_v12 = vsel %vm457_vm0, %v657_v20, %v810_v24 }
 0x1e5   : > { %1003 = vrot.lane.b32.xlu0 %v7815_v59, %s6886_s11 }
 0x1e6   : > { %v956_v58 = vpop.permute.xlu1 %955 }
 0x1e7   : > { %v1091_v44 = vsel %vm1081_vm5, %v1054_v27, %v956_v58  ;;  %v954_v43 = vpop.permute.xlu0 %953  ;;  %v670_v27 = vld [vmem:[#allocation2 + $0xf8] sm:$0xff] }
 0x1e8   : > { %v1090_v16 = vsel %vm1081_vm5, %v1053_v12, %v954_v43  ;;  %v669_v12 = vld [vmem:[#allocation2 + $0xf0] sm:$0xff] }
 0x1e9   : > { %6468 = vmatprep.mubr.msk.f32.mxu0 %vm1592_vm6, %v1090_v16 }
 0x1ea   : > { %6469 = vmatmul.mubr.msk.f32.gmra.mrb[8].mxu0 %vm1592_vm6, %v1091_v44  ;;  %v816_v28 = vpop.permute.xlu1 %815 }
 0x1eb   : > { %v814_v52 = vpop.permute.xlu0 %813  ;;  %v1056_v59 = vsel %vm457_vm0, %v660_v25, %v816_v28 }
 0x1ec   : > { %v1055_v10 = vsel %vm457_vm0, %v659_v13, %v814_v52 }
 0x1ee   : > { %v960_v29 = vpop.permute.xlu1 %959 }
 0x1ef   : > { %v1093_v48 = vsel %vm1081_vm5, %v1056_v59, %v960_v29  ;;  %v958_v57 = vpop.permute.xlu0 %957  ;;  %v672_v59 = vld [vmem:[#allocation2 + $0x110] sm:$0xff] }
 0x1f0   : > { %v1092_v11 = vsel %vm1081_vm5, %v1055_v10, %v958_v57  ;;  %v671_v10 = vld [vmem:[#allocation2 + $0x108] sm:$0xff] }
 0x1f1   : > { %6471 = vmatprep.mubr.msk.f32.mxu0 %vm1592_vm6, %v1092_v11 }
 0x1f2   : > { %6472 = vmatmul.mubr.msk.f32.gmra.mrb[10].mxu0 %vm1592_vm6, %v1093_v48  ;;  %v820_v31 = vpop.permute.xlu1 %819 }
 0x1f3   : > { %v818_v46 = vpop.permute.xlu0 %817  ;;  %v1058_v3 = vsel %vm457_vm0, %v662_v7, %v820_v31 }
 0x1f4   : > { %v1057_v32 = vsel %vm457_vm0, %v661_v47, %v818_v46 }
 0x1f6   : > { %v964_v5 = vpop.permute.xlu1 %963 }
 0x1f7   : > { %v1095_v15 = vsel %vm1081_vm5, %v1058_v3, %v964_v5  ;;  %v962_v6 = vpop.permute.xlu0 %961  ;;  %v674_v3 = vld [vmem:[#allocation2 + $0x128] sm:$0xff] }
 0x1f8   : > { %v1094_v51 = vsel %vm1081_vm5, %v1057_v32, %v962_v6  ;;  %v673_v32 = vld [vmem:[#allocation2 + $0x120] sm:$0xff] }
 0x1f9   : > { %6474 = vmatprep.mubr.msk.f32.mxu0 %vm1592_vm6, %v1094_v51 }
 0x1fa   : > { %6475 = vmatmul.mubr.msk.f32.gmra.mrb[12].mxu0 %vm1592_vm6, %v1095_v15  ;;  %v824_v0 = vpop.permute.xlu1 %823 }
 0x1fb   : > { %v822_v21 = vpop.permute.xlu0 %821  ;;  %v1060_v22 = vsel %vm457_vm0, %v664_v53, %v824_v0 }
 0x1fc   : > { %v1059_v54 = vsel %vm457_vm0, %v663_v62, %v822_v21  ;;  %v1192_v62 = vld [vmem:[#allocation2 + $0x1b9] sm:$0xff] }
 0x1fd   : > { %1335 = vrot.lane.b32.xlu1 %v1192_v62, %s6887_s12 }
 0x1fe   : > { %v968_v63 = vpop.permute.xlu1 %967 }
 0x1ff   : > { %v1097_v55 = vsel %vm1081_vm5, %v1060_v22, %v968_v63  ;;  %v966_v19 = vpop.permute.xlu0 %965  ;;  %v1191_v63 = vld [vmem:[#allocation2 + $0x1b1] sm:$0xff] }
 0x200   : > { %v1096_v23 = vsel %vm1081_vm5, %v1059_v54, %v966_v19  ;;  %v676_v54 = vld [vmem:[#allocation2 + $0x140] sm:$0xff]  ;;  %1333 = vrot.lane.b32.xlu0 %v1191_v63, %s6887_s12  ;;  %v675_v19 = vld [vmem:[#allocation2 + $0x138] sm:$0xff] }
 0x201   : > { %6477 = vmatprep.mubr.msk.f32.mxu0 %vm1592_vm6, %v1096_v23  ;;  %v1228_v23 = vld [vmem:[#allocation2 + $0x1ba] sm:$0xff] }
 0x202   : > { %6478 = vmatmul.mubr.msk.f32.gmra.mrb[14].mxu0 %vm1592_vm6, %v1097_v55  ;;  %v828_v17 = vpop.permute.xlu1 %827  ;;  %1479 = vrot.lane.b32.xlu1 %v1228_v23, %s6886_s11  ;;  %v1156_v63 = vld [vmem:[#allocation2 + $0x1b8] sm:$0xff] }
 0x203   : > { %v826_v61 = vpop.permute.xlu0 %825  ;;  %v1062_v18 = vsel %vm457_vm0, %v666_v2, %v828_v17 }
 0x204   : > { %v1061_v37 = vsel %vm457_vm0, %v665_v36, %v826_v61  ;;  %v1227_v61 = vld [vmem:[#allocation2 + $0x1b2] sm:$0xff] }
 0x205   : > { %1477 = vrot.lane.b32.xlu0 %v1227_v61, %s6886_s11 }
 0x206   : > { %v972_v50 = vpop.permute.xlu1 %971 }
 0x207   : > { %v1099_v38 = vsel %vm1081_vm5, %v1062_v18, %v972_v50  ;;  %v970_v49 = vpop.permute.xlu0 %969 }
 0x208   : > { %v1098_v56 = vsel %vm1081_vm5, %v1061_v37, %v970_v49  ;;  %v678_v49 = vld [vmem:[#allocation2 + $0x158] sm:$0xff] }
 0x209   : > { %6480 = vmatprep.mubr.msk.f32.mxu0 %vm1592_vm6, %v1098_v56 }
 0x20a   : > { %6481 = vmatmul.mubr.msk.f32.gmra.mrb[16].mxu0 %vm1592_vm6, %v1099_v38  ;;  %v832_v39 = vpop.permute.xlu1 %831 }
 0x20b   : > { %v830_v34 = vpop.permute.xlu0 %829  ;;  %v1064_v8 = vsel %vm457_vm0, %v668_v1, %v832_v39  ;;  %v677_v39 = vld [vmem:[#allocation2 + $0x150] sm:$0xff] }
 0x20c   : > { %v1063_v14 = vsel %vm457_vm0, %v667_v9, %v830_v34 }
 0x20d   : > { %v6400_v45 = vpop.f32.mrb[30].mxu0 }
 0x20e   : > { %v2598_v41 = vpop.f32.mrb[31].mxu0  ;;  %v976_v35 = vpop.permute.xlu1 %975 }
 0x20f   : > { %v1101_v40 = vsel %vm1081_vm5, %v1064_v8, %v976_v35  ;;  %v974_v60 = vpop.permute.xlu0 %973 }
 0x210   : > { %v1100_v24 = vsel %vm1081_vm5, %v1063_v14, %v974_v60  ;;  %v679_v14 = vld [vmem:[#allocation2 + $0x168] sm:$0xff] }
 0x211   : > { %6483 = vmatprep.mubr.msk.f32.mxu0 %vm1592_vm6, %v1100_v24 }
 0x212   : > { %6484 = vmatmul.mubr.msk.f32.gmra.mrb[18].mxu0 %vm1592_vm6, %v1101_v40  ;;  %v836_v20 = vpop.permute.xlu1 %835 }
 0x213   : > { %v834_v58 = vpop.permute.xlu0 %833  ;;  %v1066_v44 = vsel %vm457_vm0, %v670_v27, %v836_v20 }
 0x214   : > { %v1065_v16 = vsel %vm457_vm0, %v669_v12, %v834_v58 }
 0x216   : > { %v980_v43 = vpop.permute.xlu1 %979 }
 0x217   : > { %v1103_v28 = vsel %vm1081_vm5, %v1066_v44, %v980_v43  ;;  %v978_v25 = vpop.permute.xlu0 %977 }
 0x218   : > { %v1102_v52 = vsel %vm1081_vm5, %v1065_v16, %v978_v25  ;;  %v680_v16 = vld [vmem:[#allocation2 + $0x170] sm:$0xff] }
 0x219   : > { %6486 = vmatprep.mubr.msk.f32.mxu0 %vm1592_vm6, %v1102_v52 }
 0x21a   : > { %6487 = vmatmul.mubr.msk.f32.gmra.mrb[20].mxu0 %vm1592_vm6, %v1103_v28  ;;  %v840_v13 = vpop.permute.xlu1 %839 }
 0x21b   : > { %v838_v29 = vpop.permute.xlu0 %837  ;;  %v1068_v48 = vsel %vm457_vm0, %v672_v59, %v840_v13 }
 0x21c   : > { %v1067_v11 = vsel %vm457_vm0, %v671_v10, %v838_v29 }
 0x21e   : > { %v984_v57 = vpop.permute.xlu1 %983 }
 0x21f   : > { %v1105_v31 = vsel %vm1081_vm5, %v1068_v48, %v984_v57  ;;  %v982_v7 = vpop.permute.xlu0 %981 }
 0x220   : > { %v1104_v46 = vsel %vm1081_vm5, %v1067_v11, %v982_v7 }
 0x221   : > { %6489 = vmatprep.mubr.msk.f32.mxu0 %vm1592_vm6, %v1104_v46 }
 0x222   : > { %6490 = vmatmul.mubr.msk.f32.gmra.mrb[22].mxu0 %vm1592_vm6, %v1105_v31  ;;  %v844_v47 = vpop.permute.xlu1 %843 }
 0x223   : > { %v842_v5 = vpop.permute.xlu0 %841  ;;  %v1070_v15 = vsel %vm457_vm0, %v674_v3, %v844_v47 }
 0x224   : > { %v1069_v51 = vsel %vm457_vm0, %v673_v32, %v842_v5 }
 0x226   : > { %v988_v6 = vpop.permute.xlu1 %987 }
 0x227   : > { %v1107_v0 = vsel %vm1081_vm5, %v1070_v15, %v988_v6  ;;  %v986_v53 = vpop.permute.xlu0 %985 }
 0x228   : > { %v1106_v21 = vsel %vm1081_vm5, %v1069_v51, %v986_v53 }
 0x229   : > { %6492 = vmatprep.mubr.msk.f32.mxu0 %vm1592_vm6, %v1106_v21 }
 0x22a   : > { %6493 = vmatmul.mubr.msk.f32.gmra.mrb[24].mxu0 %vm1592_vm6, %v1107_v0  ;;  %v848_v22 = vpop.permute.xlu1 %847 }
 0x22b   : > { %v846_v55 = vpop.permute.xlu0 %845  ;;  %v1072_v17 = vsel %vm457_vm0, %v676_v54, %v848_v22 }
 0x22c   : > { %v1071_v36 = vsel %vm457_vm0, %v675_v19, %v846_v55  ;;  %v1155_v55 = vld [vmem:[#allocation2 + $0x1b0] sm:$0xff] }
 0x22e   : > { %v992_v2 = vpop.permute.xlu1 %991 }
 0x22f   : > { %v1109_v18 = vsel %vm1081_vm5, %v1072_v17, %v992_v2  ;;  %v990_v50 = vpop.permute.xlu0 %989 }
 0x230   : > { %v1108_v37 = vsel %vm1081_vm5, %v1071_v36, %v990_v50 }
 0x231   : > { %6495 = vmatprep.mubr.msk.f32.mxu0 %vm1592_vm6, %v1108_v37  ;;  %v6009_v37 = vld [vmem:[%s9318_s5 + $0x10] sm:$0xff] }
 0x232   : > { %6496 = vmatmul.mubr.msk.f32.gmra.mrb[26].mxu0 %vm1592_vm6, %v1109_v18  ;;  %v852_v38 = vpop.permute.xlu1 %851 }
 0x233   : > { %v850_v56 = vpop.permute.xlu0 %849  ;;  %v1074_v1 = vsel %vm457_vm0, %v678_v49, %v852_v38  ;;  %v6010_v38 = vld [vmem:[%s9318_s5 + $0x18] sm:$0xf] }
 0x234   : > { %v1073_v9 = vsel %vm457_vm0, %v677_v39, %v850_v56  ;;  %v6684_v56 = vpack.c.bf16 %v6010_v38, %v6009_v37 }
 0x236   : > { %v996_v34 = vpop.permute.xlu1 %995  ;;  %6686 = vmatprep.subr.msk.bf16.mxu1 %vm7186_vm4, %v6684_v56 }
 0x237   : > { %v1111_v45 = vsel %vm1081_vm5, %v1074_v1, %v996_v34  ;;  %v994_v8 = vpop.permute.xlu0 %993 }
 0x238   : > { %v1110_v41 = vsel %vm1081_vm5, %v1073_v9, %v994_v8 }
 0x239   : > { %6498 = vmatprep.mubr.msk.f32.mxu0 %vm1592_vm6, %v1110_v41 }
 0x23a   : > { %6499 = vmatmul.mubr.msk.f32.gmra.mrb[28].mxu0 %vm1592_vm6, %v1111_v45  ;;  %v1326_v35 = vpop.permute.xlu1 %1325 }
 0x23b   : > { %v854_v40 = vpop.permute.xlu0 %853  ;;  %v1547_v58 = vsel %vm457_vm0, %v8007_v30, %v1326_v35 }
 0x23c   : > { %v1075_v60 = vsel %vm457_vm0, %v679_v14, %v854_v40 }
 0x23e   : > { %v998_v24 = vpop.permute.xlu1 %997 }
 0x23f   : > { %v1112_v20 = vsel %vm1081_vm5, %v1075_v60, %v998_v24  ;;  %v856_v27 = vpop.permute.xlu0 %855 }
 0x240   : > { %6501 = vmatprep.mubr.msk.f32.mxu0 %vm1592_vm6, %v1112_v20  ;;  %v1076_v52 = vsel %vm457_vm0, %v680_v16, %v856_v27 }
 0x242   : > { %v1470_v12 = vpop.permute.xlu1 %1469 }
 0x243   : > { %v1328_v44 = vpop.permute.xlu0 %1327  ;;  %v1583_v43 = vsel %vm1081_vm5, %v1547_v58, %v1470_v12 }
 0x244   : > { %6385 = vmatprep.mubr.msk.f32.mxu1 %vm1592_vm6, %v1583_v43  ;;  %v1548_v28 = vsel %vm457_vm0, %v8005_v26, %v1328_v44 }
 0x246   : > { %v1472_v25 = vpop.permute.xlu1 %1471 }
 0x247   : > { %v1584_v13 = vsel %vm1081_vm5, %v1548_v28, %v1472_v25  ;;  %v1000_v59 = vpop.permute.xlu0 %999 }
 0x248   : > { %v1113_v29 = vsel %vm1081_vm5, %v1076_v52, %v1000_v59  ;;  %6386 = vmatmul.mubr.msk.f32.vlgmr.msra.gmra.mrb[0].mxu1 %vm1592_vm6, %v1584_v13 }
 0x249   : > { %6502 = vmatmul.mubr.msk.f32.gmra.mrb[32].mxu0 %vm1592_vm6, %v1113_v29  ;;  %6689 = vmatpush3.bf16.msk.msra.mxu1 %vm7186_vm4, %v6684_v56 }
 0x24a   : > { %v1330_v10 = vpop.permute.xlu1 %1329 }
 0x24b   : > { %v858_v48 = vpop.permute.xlu0 %857  ;;  %v1549_v46 = vsel %vm457_vm0, %v8023_v33, %v1330_v10 }
 0x24c   : > { %v1077_v57 = vsel %vm457_vm0, %v8007_v30, %v858_v48 }
 0x24e   : > { %v1002_v11 = vpop.permute.xlu1 %1001 }
 0x24f   : > { %v1114_v31 = vsel %vm1081_vm5, %v1077_v57, %v1002_v11  ;;  %v860_v7 = vpop.permute.xlu0 %859 }
 0x250   : > { %6504 = vmatprep.mubr.msk.f32.mxu0 %vm1592_vm6, %v1114_v31  ;;  %v1078_v30 = vsel %vm457_vm0, %v8005_v26, %v860_v7  ;;  %v8215_v26 = vld [vmem:[%s9317_s4] ss:$0 sm:$0xff] }
 0x252   : > { %v1474_v47 = vpop.permute.xlu1 %1473 }
 0x253   : > { %v1585_v3 = vsel %vm1081_vm5, %v1549_v46, %v1474_v47  ;;  %v1332_v5 = vpop.permute.xlu0 %1331 }
 0x254   : > { %6388 = vmatprep.mubr.msk.f32.mxu1 %vm1592_vm6, %v1585_v3  ;;  %v1550_v32 = vsel %vm457_vm0, %v8021_v42, %v1332_v5 }
 0x256   : > { %v1476_v15 = vpop.permute.xlu1 %1475 }
 0x257   : > { %v1586_v6 = vsel %vm1081_vm5, %v1550_v32, %v1476_v15  ;;  %v1004_v51 = vpop.permute.xlu0 %1003 }
 0x258   : > { %v1115_v0 = vsel %vm1081_vm5, %v1078_v30, %v1004_v51  ;;  %6389 = vmatmul.mubr.msk.f32.gmra.mrb[2].mxu1 %vm1592_vm6, %v1586_v6 }
 0x259   : > { %6505 = vmatmul.mubr.msk.f32.gmra.mrb[34].mxu0 %vm1592_vm6, %v1115_v0 }
 0x26f   : > { %v1336_v22 = vpop.permute.xlu1 %1335 }
 0x270   : > { %v1552_v54 = vsel %vm457_vm0, %v1156_v63, %v1336_v22 }
 0x272   : > { %v1334_v42 = vpop.permute.xlu0 %1333 }
 0x273   : > { %v1551_v17 = vsel %vm457_vm0, %v1155_v55, %v1334_v42 }
 0x274   : > { %v1480_v19 = vpop.permute.xlu1 %1479 }
 0x275   : > { %v1588_v2 = vsel %vm1081_vm5, %v1552_v54, %v1480_v19 }
 0x277   : > { %v1478_v61 = vpop.permute.xlu0 %1477 }
 0x278   : > { %v1587_v50 = vsel %vm1081_vm5, %v1551_v17, %v1478_v61 }
 0x279   : > { %6391 = vmatprep.mubr.msk.f32.mxu1 %vm1592_vm6, %v1587_v50 }
 0x27a   : > { %6392 = vmatmul.mubr.msk.f32.gmra.mrb[4].mxu1 %vm1592_vm6, %v1588_v2 }
 0x295   : > { %v6451_v33 = vpop.f32.mrb[36].mxu0 }
 0x296   : > { %v2768_v53 = vpop.f32.mrb[37].mxu0 }
 0x29d   : > { %v6458_v21 = vpop.f32.mrb[38].mxu0 }
 0x29e   : > { %v2954_v62 = vpop.f32.mrb[39].mxu0 }
 0x2a5   : > { %v6461_v23 = vpop.f32.mrb[2].mxu0 }
 0x2a6   : > { %v3179_v36 = vadd.f32 %v6461_v23, %v8215_v26  ;;  %v2964_v18 = vpop.f32.mrb[3].mxu0 }
 0x2a7   : > { %v3178_v49 = vadd.f32 %v8215_v26, %v2964_v18 }
 0x2a8   : > { %v3215_v39 = vmax.f32 %v3179_v36, 0.0 }
 0x2a9   : > { %v3214_v1 = vmax.f32 %v3178_v49, 0.0 }
 0x2aa   : > { %3304 = vst.msk [vmem:[#allocation3 + $0x21] sm:$0xff] %vm457_vm0, %v3215_v39 }
 0x2ab   : > { %3303 = vst.msk [vmem:[#allocation3 + $0x19] sm:$0xff] %vm457_vm0, %v3214_v1 }
 0x2ad   : > { %v6464_v34 = vpop.f32.mrb[4].mxu0 }
 0x2ae   : > { %v3181_v9 = vadd.f32 %v6464_v34, %v8215_v26  ;;  %v2974_v45 = vpop.f32.mrb[5].mxu0 }
 0x2af   : > { %v3180_v8 = vadd.f32 %v8215_v26, %v2974_v45 }
 0x2b0   : > { %v3217_v41 = vmax.f32 %v3181_v9, 0.0 }
 0x2b1   : > { %v3797_v35 = vld [vmem:[#allocation3 + $0x21] sm:$0xff]  ;;  %v3216_v14 = vmax.f32 %v3180_v8, 0.0 }
 0x2b2   : > { %3894 = vrot.lane.b32.xlu1 %v3797_v35, %s6887_s12  ;;  %v3796_v40 = vld [vmem:[#allocation3 + $0x19] sm:$0xff]  ;;  %3306 = vst.msk [vmem:[#allocation3 + $0x39] sm:$0xff] %vm457_vm0, %v3217_v41  ;;  %v3829_v60 = vld [vmem:[#allocation3 + $0x22] sm:$0xff] }
 0x2b3   : > { %3892 = vrot.lane.b32.xlu0 %v3796_v40, %s6887_s12  ;;  %3305 = vst.msk [vmem:[#allocation3 + $0x31] sm:$0xff] %vm457_vm0, %v3216_v14  ;;  %v3828_v20 = vld [vmem:[#allocation3 + $0x1a] sm:$0xff] }
 0x2b5   : > { %v6467_v24 = vpop.f32.mrb[6].mxu0 }
 0x2b6   : > { %4022 = vrot.lane.b32.xlu1 %v3829_v60, %s6886_s11  ;;  %v3183_v27 = vadd.f32 %v6467_v24, %v8215_v26  ;;  %v2984_v58 = vpop.f32.mrb[7].mxu0 }
 0x2b7   : > { %4020 = vrot.lane.b32.xlu0 %v3828_v20, %s6886_s11  ;;  %v3182_v12 = vadd.f32 %v8215_v26, %v2984_v58 }
 0x2b8   : > { %v3219_v44 = vmax.f32 %v3183_v27, 0.0 }
 0x2b9   : > { %v3218_v43 = vmax.f32 %v3182_v12, 0.0  ;;  %v3799_v16 = vld [vmem:[#allocation3 + $0x39] sm:$0xff] }
 0x2ba   : > { %3308 = vst.msk [vmem:[#allocation3 + $0x51] sm:$0xff] %vm457_vm0, %v3219_v44  ;;  %3898 = vrot.lane.b32.xlu1 %v3799_v16, %s6887_s12  ;;  %v3798_v28 = vld [vmem:[#allocation3 + $0x31] sm:$0xff]  ;;  %v8250_v52 = vld [vmem:[#allocation3 + $0x3a] sm:$0xff] }
 0x2bb   : > { %3307 = vst.msk [vmem:[#allocation3 + $0x49] sm:$0xff] %vm457_vm0, %v3218_v43  ;;  %3896 = vrot.lane.b32.xlu0 %v3798_v28, %s6887_s12  ;;  %v8255_v29 = vld [vmem:[#allocation3 + $0x32] sm:$0xff] }
 0x2bd   : > { %v6470_v25 = vpop.f32.mrb[8].mxu0 }
 0x2be   : > { %v3185_v13 = vadd.f32 %v6470_v25, %v8215_v26  ;;  %4026 = vrot.lane.b32.xlu1 %v8250_v52, %s6886_s11  ;;  %v2994_v59 = vpop.f32.mrb[9].mxu0 }
 0x2bf   : > { %v3184_v10 = vadd.f32 %v8215_v26, %v2994_v59  ;;  %4024 = vrot.lane.b32.xlu0 %v8255_v29, %s6886_s11 }
 0x2c0   : > { %v3221_v48 = vmax.f32 %v3185_v13, 0.0 }
 0x2c1   : > { %v3220_v57 = vmax.f32 %v3184_v10, 0.0  ;;  %v8264_v31 = vld [vmem:[#allocation3 + $0x51] sm:$0xff] }
 0x2c2   : > { %3310 = vst.msk [vmem:[#allocation3 + $0x69] sm:$0xff] %vm457_vm0, %v3221_v48  ;;  %4638 = vrot.lane.b32.xlu1 %v3799_v16, %s6887_s12  ;;  %v8269_v47 = vld [vmem:[#allocation3 + $0x49] sm:$0xff]  ;;  %v8274_v15 = vld [vmem:[#allocation3 + $0x52] sm:$0xff] }
 0x2c3   : > { %3309 = vst.msk [vmem:[#allocation3 + $0x61] sm:$0xff] %vm457_vm0, %v3220_v57  ;;  %4636 = vrot.lane.b32.xlu0 %v3798_v28, %s6887_s12  ;;  %v8279_v30 = vld [vmem:[#allocation3 + $0x4a] sm:$0xff] }
 0x2c5   : > { %v6473_v11 = vpop.f32.mrb[10].mxu0 }
 0x2c6   : > { %v3187_v7 = vadd.f32 %v6473_v11, %v8215_v26  ;;  %3902 = vrot.lane.b32.xlu1 %v8264_v31, %s6887_s12  ;;  %v3004_v46 = vpop.f32.mrb[11].mxu0 }
 0x2c7   : > { %v3186_v3 = vadd.f32 %v8215_v26, %v3004_v46  ;;  %3900 = vrot.lane.b32.xlu0 %v8269_v47, %s6887_s12 }
 0x2c8   : > { %v3223_v5 = vmax.f32 %v3187_v7, 0.0 }
 0x2c9   : > { %v3222_v32 = vmax.f32 %v3186_v3, 0.0  ;;  %v8284_v51 = vld [vmem:[#allocation3 + $0x69] sm:$0xff] }
 0x2ca   : > { %3312 = vst.msk [vmem:[#allocation3 + $0x81] sm:$0xff] %vm457_vm0, %v3223_v5  ;;  %4030 = vrot.lane.b32.xlu1 %v8274_v15, %s6886_s11  ;;  %v8289_v53 = vld [vmem:[#allocation3 + $0x61] sm:$0xff]  ;;  %v8294_v63 = vld [vmem:[#allocation3 + $0x6a] sm:$0xff] }
 0x2cb   : > { %3311 = vst.msk [vmem:[#allocation3 + $0x79] sm:$0xff] %vm457_vm0, %v3222_v32  ;;  %4028 = vrot.lane.b32.xlu0 %v8279_v30, %s6886_s11  ;;  %v8299_v42 = vld [vmem:[#allocation3 + $0x62] sm:$0xff] }
 0x2cd   : > { %v6476_v6 = vpop.f32.mrb[12].mxu0 }
 0x2ce   : > { %v3189_v0 = vadd.f32 %v6476_v6, %v8215_v26  ;;  %3906 = vrot.lane.b32.xlu1 %v8284_v51, %s6887_s12  ;;  %v3014_v33 = vpop.f32.mrb[13].mxu0 }
 0x2cf   : > { %v3188_v21 = vadd.f32 %v8215_v26, %v3014_v33  ;;  %3904 = vrot.lane.b32.xlu0 %v8289_v53, %s6887_s12 }
 0x2d0   : > { %v3225_v62 = vmax.f32 %v3189_v0, 0.0 }
 0x2d1   : > { %v3224_v22 = vmax.f32 %v3188_v21, 0.0  ;;  %v8304_v55 = vld [vmem:[#allocation3 + $0x81] sm:$0xff] }
 0x2d2   : > { %3314 = vst.msk [vmem:[#allocation3 + $0x99] sm:$0xff] %vm457_vm0, %v3225_v62  ;;  %4034 = vrot.lane.b32.xlu1 %v8294_v63, %s6886_s11  ;;  %v8309_v17 = vld [vmem:[#allocation3 + $0x79] sm:$0xff]  ;;  %v8314_v18 = vld [vmem:[#allocation3 + $0x82] sm:$0xff] }
 0x2d3   : > { %3313 = vst.msk [vmem:[#allocation3 + $0x91] sm:$0xff] %vm457_vm0, %v3224_v22  ;;  %4032 = vrot.lane.b32.xlu0 %v8299_v42, %s6886_s11  ;;  %v8319_v50 = vld [vmem:[#allocation3 + $0x7a] sm:$0xff] }
 0x2d5   : > { %v6479_v54 = vpop.f32.mrb[14].mxu0 }
 0x2d6   : > { %v3191_v19 = vadd.f32 %v6479_v54, %v8215_v26  ;;  %3910 = vrot.lane.b32.xlu1 %v8304_v55, %s6887_s12  ;;  %v3024_v23 = vpop.f32.mrb[15].mxu0 }
 0x2d7   : > { %v3190_v2 = vadd.f32 %v8215_v26, %v3024_v23  ;;  %3908 = vrot.lane.b32.xlu0 %v8309_v17, %s6887_s12 }
 0x2d8   : > { %v3227_v61 = vmax.f32 %v3191_v19, 0.0 }
 0x2d9   : > { %v3226_v36 = vmax.f32 %v3190_v2, 0.0  ;;  %v8324_v38 = vld [vmem:[#allocation3 + $0x99] sm:$0xff] }
 0x2da   : > { %3316 = vst.msk [vmem:[#allocation3 + $0xb1] sm:$0xff] %vm457_vm0, %v3227_v61  ;;  %4038 = vrot.lane.b32.xlu1 %v8314_v18, %s6886_s11  ;;  %v8329_v39 = vld [vmem:[#allocation3 + $0x91] sm:$0xff]  ;;  %v8334_v45 = vld [vmem:[#allocation3 + $0x9a] sm:$0xff] }
 0x2db   : > { %3315 = vst.msk [vmem:[#allocation3 + $0xa9] sm:$0xff] %vm457_vm0, %v3226_v36  ;;  %4036 = vrot.lane.b32.xlu0 %v8319_v50, %s6886_s11  ;;  %v8339_v8 = vld [vmem:[#allocation3 + $0x92] sm:$0xff] }
 0x2dd   : > { %v6482_v37 = vpop.f32.mrb[16].mxu0 }
 0x2de   : > { %v3193_v49 = vadd.f32 %v6482_v37, %v8215_v26  ;;  %3914 = vrot.lane.b32.xlu1 %v8324_v38, %s6887_s12  ;;  %v3034_v56 = vpop.f32.mrb[17].mxu0 }
 0x2df   : > { %v3192_v1 = vadd.f32 %v8215_v26, %v3034_v56  ;;  %3912 = vrot.lane.b32.xlu0 %v8329_v39, %s6887_s12 }
 0x2e0   : > { %v3229_v34 = vmax.f32 %v3193_v49, 0.0 }
 0x2e1   : > { %v3228_v9 = vmax.f32 %v3192_v1, 0.0  ;;  %v8344_v35 = vld [vmem:[#allocation3 + $0xb1] sm:$0xff] }
 0x2e2   : > { %3318 = vst.msk [vmem:[#allocation3 + $0xc9] sm:$0xff] %vm457_vm0, %v3229_v34  ;;  %4042 = vrot.lane.b32.xlu1 %v8334_v45, %s6886_s11  ;;  %v8349_v60 = vld [vmem:[#allocation3 + $0xa9] sm:$0xff]  ;;  %v8354_v58 = vld [vmem:[#allocation3 + $0xb2] sm:$0xff] }
 0x2e3   : > { %3317 = vst.msk [vmem:[#allocation3 + $0xc1] sm:$0xff] %vm457_vm0, %v3228_v9  ;;  %4040 = vrot.lane.b32.xlu0 %v8339_v8, %s6886_s11  ;;  %v8359_v12 = vld [vmem:[#allocation3 + $0xaa] sm:$0xff] }
 0x2e5   : > { %v6485_v41 = vpop.f32.mrb[18].mxu0 }
 0x2e6   : > { %v3195_v14 = vadd.f32 %v6485_v41, %v8215_v26  ;;  %3918 = vrot.lane.b32.xlu1 %v8344_v35, %s6887_s12  ;;  %v3044_v40 = vpop.f32.mrb[19].mxu0 }
 0x2e7   : > { %v3194_v24 = vadd.f32 %v8215_v26, %v3044_v40  ;;  %3916 = vrot.lane.b32.xlu0 %v8349_v60, %s6887_s12 }
 0x2e8   : > { %v3231_v20 = vmax.f32 %v3195_v14, 0.0 }
 0x2e9   : > { %v3230_v27 = vmax.f32 %v3194_v24, 0.0  ;;  %v8364_v43 = vld [vmem:[#allocation3 + $0xc9] sm:$0xff] }
 0x2ea   : > { %3320 = vst.msk [vmem:[#allocation3 + $0xe1] sm:$0xff] %vm457_vm0, %v3231_v20  ;;  %4046 = vrot.lane.b32.xlu1 %v8354_v58, %s6886_s11  ;;  %v8369_v25 = vld [vmem:[#allocation3 + $0xc1] sm:$0xff]  ;;  %v8374_v48 = vld [vmem:[#allocation3 + $0xca] sm:$0xff] }
 0x2eb   : > { %3319 = vst.msk [vmem:[#allocation3 + $0xd9] sm:$0xff] %vm457_vm0, %v3230_v27  ;;  %4044 = vrot.lane.b32.xlu0 %v8359_v12, %s6886_s11  ;;  %v8379_v57 = vld [vmem:[#allocation3 + $0xc2] sm:$0xff] }
 0x2ed   : > { %v6488_v44 = vpop.f32.mrb[20].mxu0 }
 0x2ee   : > { %v3197_v16 = vadd.f32 %v6488_v44, %v8215_v26  ;;  %3922 = vrot.lane.b32.xlu1 %v8364_v43, %s6887_s12  ;;  %v3054_v28 = vpop.f32.mrb[21].mxu0 }
 0x2ef   : > { %v3196_v13 = vadd.f32 %v8215_v26, %v3054_v28  ;;  %3920 = vrot.lane.b32.xlu0 %v8369_v25, %s6887_s12 }
 0x2f0   : > { %v3233_v59 = vmax.f32 %v3197_v16, 0.0 }
 0x2f1   : > { %v3232_v10 = vmax.f32 %v3196_v13, 0.0  ;;  %v8384_v7 = vld [vmem:[#allocation3 + $0xe1] sm:$0xff] }
 0x2f2   : > { %3322 = vst.msk [vmem:[#allocation3 + $0xf9] sm:$0xff] %vm457_vm0, %v3233_v59  ;;  %4050 = vrot.lane.b32.xlu1 %v8374_v48, %s6886_s11  ;;  %v8389_v5 = vld [vmem:[#allocation3 + $0xd9] sm:$0xff]  ;;  %v8394_v33 = vld [vmem:[#allocation3 + $0xe2] sm:$0xff] }
 0x2f3   : > { %3321 = vst.msk [vmem:[#allocation3 + $0xf1] sm:$0xff] %vm457_vm0, %v3232_v10  ;;  %4048 = vrot.lane.b32.xlu0 %v8379_v57, %s6886_s11  ;;  %v8399_v21 = vld [vmem:[#allocation3 + $0xda] sm:$0xff] }
 0x2f5   : > { %v6491_v11 = vpop.f32.mrb[22].mxu0 }
 0x2f6   : > { %v3199_v46 = vadd.f32 %v6491_v11, %v8215_v26  ;;  %3926 = vrot.lane.b32.xlu1 %v8384_v7, %s6887_s12  ;;  %v3064_v3 = vpop.f32.mrb[23].mxu0 }
 0x2f7   : > { %v3198_v32 = vadd.f32 %v8215_v26, %v3064_v3  ;;  %3924 = vrot.lane.b32.xlu0 %v8389_v5, %s6887_s12 }
 0x2f8   : > { %v3235_v6 = vmax.f32 %v3199_v46, 0.0 }
 0x2f9   : > { %v3234_v0 = vmax.f32 %v3198_v32, 0.0  ;;  %v8404_v22 = vld [vmem:[#allocation3 + $0xf9] sm:$0xff] }
 0x2fa   : > { %3324 = vst.msk [vmem:[#allocation3 + $0x111] sm:$0xff] %vm457_vm0, %v3235_v6  ;;  %4054 = vrot.lane.b32.xlu1 %v8394_v33, %s6886_s11  ;;  %v8409_v23 = vld [vmem:[#allocation3 + $0xf1] sm:$0xff]  ;;  %v8414_v37 = vld [vmem:[#allocation3 + $0xfa] sm:$0xff] }
 0x2fb   : > { %3323 = vst.msk [vmem:[#allocation3 + $0x109] sm:$0xff] %vm457_vm0, %v3234_v0  ;;  %4052 = vrot.lane.b32.xlu0 %v8399_v21, %s6886_s11  ;;  %v8419_v49 = vld [vmem:[#allocation3 + $0xf2] sm:$0xff] }
 0x2fd   : > { %v6494_v62 = vpop.f32.mrb[24].mxu0 }
 0x2fe   : > { %v3201_v54 = vadd.f32 %v6494_v62, %v8215_v26  ;;  %3930 = vrot.lane.b32.xlu1 %v8404_v22, %s6887_s12  ;;  %v3074_v19 = vpop.f32.mrb[25].mxu0 }
 0x2ff   : > { %v3200_v2 = vadd.f32 %v8215_v26, %v3074_v19  ;;  %3928 = vrot.lane.b32.xlu0 %v8409_v23, %s6887_s12 }
 0x300   : > { %v3237_v61 = vmax.f32 %v3201_v54, 0.0 }
 0x301   : > { %v3236_v36 = vmax.f32 %v3200_v2, 0.0  ;;  %v8424_v1 = vld [vmem:[#allocation3 + $0x111] sm:$0xff] }
 0x302   : > { %3326 = vst.msk [vmem:[#allocation3 + $0x129] sm:$0xff] %vm457_vm0, %v3237_v61  ;;  %4058 = vrot.lane.b32.xlu1 %v8414_v37, %s6886_s11  ;;  %v8429_v41 = vld [vmem:[#allocation3 + $0x109] sm:$0xff]  ;;  %v8434_v20 = vld [vmem:[#allocation3 + $0x112] sm:$0xff] }
 0x303   : > { %3325 = vst.msk [vmem:[#allocation3 + $0x121] sm:$0xff] %vm457_vm0, %v3236_v36  ;;  %4056 = vrot.lane.b32.xlu0 %v8419_v49, %s6886_s11  ;;  %v8439_v27 = vld [vmem:[#allocation3 + $0x10a] sm:$0xff] }
 0x305   : > { %v6497_v56 = vpop.f32.mrb[26].mxu0 }
 0x306   : > { %v3203_v34 = vadd.f32 %v6497_v56, %v8215_v26  ;;  %3934 = vrot.lane.b32.xlu1 %v8424_v1, %s6887_s12  ;;  %v3084_v9 = vpop.f32.mrb[27].mxu0 }
 0x307   : > { %v3202_v14 = vadd.f32 %v8215_v26, %v3084_v9  ;;  %3932 = vrot.lane.b32.xlu0 %v8429_v41, %s6887_s12 }
 0x308   : > { %v3239_v40 = vmax.f32 %v3203_v34, 0.0 }
 0x309   : > { %v3238_v24 = vmax.f32 %v3202_v14, 0.0  ;;  %v8444_v16 = vld [vmem:[#allocation3 + $0x129] sm:$0xff] }
 0x30a   : > { %3328 = vst.msk [vmem:[#allocation3 + $0x141] sm:$0xff] %vm457_vm0, %v3239_v40  ;;  %4062 = vrot.lane.b32.xlu1 %v8434_v20, %s6886_s11  ;;  %v8449_v59 = vld [vmem:[#allocation3 + $0x121] sm:$0xff]  ;;  %v8454_v3 = vld [vmem:[#allocation3 + $0x12a] sm:$0xff] }
 0x30b   : > { %3327 = vst.msk [vmem:[#allocation3 + $0x139] sm:$0xff] %vm457_vm0, %v3238_v24  ;;  %4060 = vrot.lane.b32.xlu0 %v8439_v27, %s6886_s11  ;;  %v8459_v32 = vld [vmem:[#allocation3 + $0x122] sm:$0xff] }
 0x30d   : > { %v6500_v44 = vpop.f32.mrb[28].mxu0 }
 0x30e   : > { %v3205_v28 = vadd.f32 %v6500_v44, %v8215_v26  ;;  %3938 = vrot.lane.b32.xlu1 %v8444_v16, %s6887_s12  ;;  %v3094_v13 = vpop.f32.mrb[29].mxu0 }
 0x30f   : > { %v3204_v10 = vadd.f32 %v8215_v26, %v3094_v13  ;;  %3936 = vrot.lane.b32.xlu0 %v8449_v59, %s6887_s12 }
 0x310   : > { %v3241_v11 = vmax.f32 %v3205_v28, 0.0 }
 0x311   : > { %v3240_v46 = vmax.f32 %v3204_v10, 0.0  ;;  %v8464_v6 = vld [vmem:[#allocation3 + $0x141] sm:$0xff] }
 0x312   : > { %3330 = vst.msk [vmem:[#allocation3 + $0x159] sm:$0xff] %vm457_vm0, %v3241_v11  ;;  %4066 = vrot.lane.b32.xlu1 %v8454_v3, %s6886_s11  ;;  %v8468_v0 = vld [vmem:[#allocation3 + $0x139] sm:$0xff]  ;;  %v8472_v62 = vld [vmem:[#allocation3 + $0x142] sm:$0xff] }
 0x313   : > { %3329 = vst.msk [vmem:[#allocation3 + $0x151] sm:$0xff] %vm457_vm0, %v3240_v46  ;;  %4064 = vrot.lane.b32.xlu0 %v8459_v32, %s6886_s11  ;;  %v8476_v54 = vld [vmem:[#allocation3 + $0x13a] sm:$0xff] }
 0x316   : > { %3942 = vrot.lane.b32.xlu1 %v8464_v6, %s6887_s12 }
 0x317   : > { %3940 = vrot.lane.b32.xlu0 %v8468_v0, %s6887_s12 }
 0x319   : > { %v8480_v34 = vld [vmem:[#allocation3 + $0x159] sm:$0xff] }
 0x31a   : > { %4070 = vrot.lane.b32.xlu1 %v8472_v62, %s6886_s11  ;;  %9346 = vst [vmem:[#allocation4_spill] sm:$0xff] %v8480_v34  ;;  %v8484_v14 = vld [vmem:[#allocation3 + $0x151] sm:$0xff]  ;;  %v8490_v28 = vld [vmem:[#allocation3 + $0x15a] sm:$0xff] }
 0x31b   : > { %4068 = vrot.lane.b32.xlu0 %v8476_v54, %s6886_s11  ;;  %v6387_v19 = vpop.f32.mrb[0].mxu1  ;;  %9347 = vst [vmem:[#allocation5_spill] sm:$0xff] %v8484_v14  ;;  %9348 = vst [vmem:[#allocation6_spill] sm:$0xff] %v8490_v28  ;;  %v8494_v10 = vld [vmem:[#allocation3 + $0x152] sm:$0xff] }
 0x31c   : > { %v6503_v2 = vpop.f32.mrb[32].mxu0  ;;  %v1921_v61 = vpop.f32.mrb[1].mxu1  ;;  %9349 = vst [vmem:[#allocation7_spill] sm:$0xff] %v8494_v10 }
 0x31d   : > { %v3110_v36 = vadd.f32 %v6503_v2, %v6387_v19  ;;  %v3104_v56 = vpop.f32.mrb[33].mxu0  ;;  %v3764_v19 = vld [vmem:[#allocation3 + $0x18] sm:$0xff] }
 0x31e   : > { %v3105_v9 = vadd.f32 %v3104_v56, %v1921_v61  ;;  %3946 = vrot.lane.b32.xlu1 %v8480_v34, %s6887_s12  ;;  %v3765_v61 = vld [vmem:[#allocation3 + $0x20] sm:$0xff] }
 0x31f   : > { %v3207_v40 = vadd.f32 %v8215_v26, %v3110_v36  ;;  %3944 = vrot.lane.b32.xlu0 %v8484_v14, %s6887_s12 }
 0x320   : > { %v3206_v24 = vadd.f32 %v8215_v26, %v3105_v9 }
 0x321   : > { %v3243_v44 = vmax.f32 %v3207_v40, 0.0 }
 0x322   : > { %v3242_v13 = vmax.f32 %v3206_v24, 0.0  ;;  %4074 = vrot.lane.b32.xlu1 %v8490_v28, %s6886_s11 }
 0x323   : > { %3332 = vst.msk [vmem:[#allocation3 + $0x171] sm:$0xff] %vm457_vm0, %v3243_v44  ;;  %4072 = vrot.lane.b32.xlu0 %v8494_v10, %s6886_s11 }
 0x324   : > { %v3895_v11 = vpop.permute.xlu1 %3894  ;;  %3331 = vst.msk [vmem:[#allocation3 + $0x169] sm:$0xff] %vm457_vm0, %v3242_v13 }
 0x325   : > { %v3893_v46 = vpop.permute.xlu0 %3892  ;;  %v4117_v9 = vsel %vm457_vm0, %v3765_v61, %v3895_v11 }
 0x326   : > { %v4116_v36 = vsel %vm457_vm0, %v3764_v19, %v3893_v46 }
 0x328   : > { %v4023_v2 = vpop.permute.xlu1 %4022 }
 0x329   : > { %v4021_v56 = vpop.permute.xlu0 %4020  ;;  %v4149_v24 = vsel %vm1081_vm5, %v4117_v9, %v4023_v2 }
 0x32a   : > { %v4148_v40 = vsel %vm1081_vm5, %v4116_v36, %v4021_v56  ;;  %v8505_v44 = vld [vmem:[#allocation3 + $0x171] sm:$0xff] }
 0x32b   : > { %6514 = vmatprep.mubr.msk.f32.mxu1 %vm1592_vm6, %v4148_v40  ;;  %9350 = vst [vmem:[#allocation8_spill] sm:$0xff] %v8505_v44  ;;  %3950 = vrot.lane.b32.xlu1 %v8505_v44, %s6887_s12  ;;  %v6390_v13 = vpop.f32.mrb[2].mxu1  ;;  %v8510_v10 = vld [vmem:[#allocation3 + $0x169] sm:$0xff]  ;;  %v8514_v56 = vld [vmem:[#allocation3 + $0x172] sm:$0xff] }
 0x32c   : > { %6515 = vmatmul.mubr.msk.f32.vlgmr.msra.gmra.mrb[6].mxu1 %vm1592_vm6, %v4149_v24  ;;  %9351 = vst [vmem:[#allocation9_spill] sm:$0xff] %v8510_v10  ;;  %v3899_v46 = vpop.permute.xlu1 %3898  ;;  %v6506_v19 = vpop.f32.mrb[34].mxu0  ;;  %3948 = vrot.lane.b32.xlu0 %v8510_v10, %s6887_s12  ;;  %9352 = vst [vmem:[#allocation10_spill] sm:$0xff] %v8514_v56  ;;  %v8519_v24 = vld [vmem:[#allocation3 + $0x16a] sm:$0xff] }
 0x32d   : > { %v3120_v11 = vadd.f32 %v6506_v19, %v6390_v13  ;;  %v1931_v61 = vpop.f32.mrb[3].mxu1  ;;  %v3897_v2 = vpop.permute.xlu0 %3896  ;;  %9353 = vst [vmem:[#allocation11_spill] sm:$0xff] %v8519_v24  ;;  %v8521_v44 = vld [vmem:[#allocation3 + $0x30] sm:$0xff]  ;;  %v8525_v13 = vld [vmem:[#allocation3 + $0x38] sm:$0xff] }
 0x32e   : > { %v3114_v36 = vpop.f32.mrb[35].mxu0  ;;  %9354 = vst [vmem:[#allocation12_spill] sm:$0xff] %v8525_v13  ;;  %v4118_v10 = vsel %vm457_vm0, %v8521_v44, %v3897_v2 }
 0x32f   : > { %v3209_v9 = vadd.f32 %v8215_v26, %v3120_v11  ;;  %v3115_v40 = vadd.f32 %v3114_v36, %v1931_v61  ;;  %4078 = vrot.lane.b32.xlu1 %v8514_v56, %s6886_s11  ;;  %v4119_v36 = vsel %vm457_vm0, %v8525_v13, %v3899_v46  ;;  %v6045_v46 = vld [vmem:[%s9318_s5 + $0x28] sm:$0xf] }
 0x330   : > { %v4027_v28 = vpop.permute.xlu1 %4026  ;;  %4076 = vrot.lane.b32.xlu0 %v8519_v24, %s6886_s11 }
 0x331   : > { %v3245_v19 = vmax.f32 %v3209_v9, 0.0  ;;  %v3208_v11 = vadd.f32 %v8215_v26, %v3115_v40  ;;  %v4025_v61 = vpop.permute.xlu0 %4024  ;;  %v4151_v34 = vsel %vm1081_vm5, %v4119_v36, %v4027_v28  ;;  %v6044_v26 = vld [vmem:[%s9318_s5 + $0x20] sm:$0xff]  ;;  %v8556_v9 = vld [vmem:[#allocation3 + $0x48] sm:$0xff] }
 0x332   : > { %v4150_v56 = vsel %vm1081_vm5, %v4118_v10, %v4025_v61  ;;  %v6690_v2 = vpack.c.bf16 %v6045_v46, %v6044_v26  ;;  %9355 = vst [vmem:[#allocation13_spill] sm:$0xff] %v8556_v9 }
 0x333   : > { %3334 = vst.msk [vmem:[#allocation3 + $0x189] sm:$0xff] %vm457_vm0, %v3245_v19  ;;  %v3244_v14 = vmax.f32 %v3208_v11, 0.0  ;;  %6517 = vmatprep.mubr.msk.f32.mxu1 %vm1592_vm6, %v4150_v56  ;;  %v8560_v19 = vld [vmem:[#allocation3 + $0x50] sm:$0xff] }
 0x334   : > { %v8536_v24 = vpop.permute.xlu1 %4638  ;;  %6518 = vmatmul.mubr.msk.f32.gmra.mrb[8].mxu1 %vm1592_vm6, %v4151_v34  ;;  %6692 = vmatprep.subr.msk.bf16.mxu1 %vm7186_vm4, %v6690_v2  ;;  %9356 = vst [vmem:[#allocation14_spill] sm:$0xff] %v8560_v19 }
 0x335   : > { %3333 = vst.msk [vmem:[#allocation3 + $0x181] sm:$0xff] %vm457_vm0, %v3244_v14  ;;  %v8546_v10 = vpop.permute.xlu0 %4636  ;;  %6695 = vmatpush3.bf16.msk.msra.mxu1 %vm7186_vm4, %v6690_v2 }
 0x338   : > { %v3903_v28 = vpop.permute.xlu1 %3902 }
 0x339   : > { %v3901_v34 = vpop.permute.xlu0 %3900  ;;  %v4121_v36 = vsel %vm457_vm0, %v8560_v19, %v3903_v28 }
 0x33a   : > { %v8552_v56 = vld [vmem:[#allocation3 + $0x189] sm:$0xff]  ;;  %v4120_v11 = vsel %vm457_vm0, %v8556_v9, %v3901_v34 }
 0x33b   : > { %3954 = vrot.lane.b32.xlu1 %v8552_v56, %s6887_s12  ;;  %v8569_v46 = vld [vmem:[#allocation3 + $0x18a] sm:$0xff] }
 0x33c   : > { %v4031_v40 = vpop.permute.xlu1 %4030  ;;  %v8558_v14 = vld [vmem:[#allocation3 + $0x181] sm:$0xff] }
 0x33d   : > { %3952 = vrot.lane.b32.xlu0 %v8558_v14, %s6887_s12  ;;  %v4029_v61 = vpop.permute.xlu0 %4028  ;;  %v4153_v2 = vsel %vm1081_vm5, %v4121_v36, %v4031_v40  ;;  %v8576_v9 = vld [vmem:[#allocation3 + $0x182] sm:$0xff] }
 0x33e   : > { %v4152_v26 = vsel %vm1081_vm5, %v4120_v11, %v4029_v61  ;;  %v8582_v11 = vld [vmem:[#allocation3 + $0x60] sm:$0xff]  ;;  %v8584_v61 = vld [vmem:[#allocation3 + $0x68] sm:$0xff] }
 0x33f   : > { %6520 = vmatprep.mubr.msk.f32.mxu1 %vm1592_vm6, %v4152_v26  ;;  %4082 = vrot.lane.b32.xlu1 %v8569_v46, %s6886_s11 }
 0x340   : > { %6521 = vmatmul.mubr.msk.f32.gmra.mrb[10].mxu1 %vm1592_vm6, %v4153_v2  ;;  %v3907_v34 = vpop.permute.xlu1 %3906 }
 0x341   : > { %4080 = vrot.lane.b32.xlu0 %v8576_v9, %s6886_s11  ;;  %v3905_v28 = vpop.permute.xlu0 %3904  ;;  %v4123_v2 = vsel %vm457_vm0, %v8584_v61, %v3907_v34  ;;  %v8602_v34 = vld [vmem:[#allocation3 + $0x78] sm:$0xff] }
 0x342   : > { %v4122_v36 = vsel %vm457_vm0, %v8582_v11, %v3905_v28 }
 0x343   : > { %4766 = vrot.lane.b32.xlu1 %v8250_v52, %s6886_s11 }
 0x344   : > { %v4035_v40 = vpop.permute.xlu1 %4034 }
 0x345   : > { %4764 = vrot.lane.b32.xlu0 %v8255_v29, %s6886_s11  ;;  %v4033_v26 = vpop.permute.xlu0 %4032  ;;  %v4155_v13 = vsel %vm1081_vm5, %v4123_v2, %v4035_v40 }
 0x346   : > { %v4154_v19 = vsel %vm1081_vm5, %v4122_v36, %v4033_v26  ;;  %v8604_v36 = vld [vmem:[#allocation3 + $0x80] sm:$0xff]  ;;  %v8622_v26 = vld [vmem:[#allocation3 + $0x90] sm:$0xff] }
 0x347   : > { %6523 = vmatprep.mubr.msk.f32.mxu1 %vm1592_vm6, %v4154_v19  ;;  %4642 = vrot.lane.b32.xlu1 %v8264_v31, %s6887_s12 }
 0x348   : > { %6524 = vmatmul.mubr.msk.f32.gmra.mrb[12].mxu1 %vm1592_vm6, %v4155_v13  ;;  %v3911_v52 = vpop.permute.xlu1 %3910 }
 0x349   : > { %4640 = vrot.lane.b32.xlu0 %v8269_v47, %s6887_s12  ;;  %v3909_v29 = vpop.permute.xlu0 %3908  ;;  %v4125_v13 = vsel %vm457_vm0, %v8604_v36, %v3911_v52  ;;  %v8624_v52 = vld [vmem:[#allocation3 + $0x98] sm:$0xff] }
 0x34a   : > { %v4124_v19 = vsel %vm457_vm0, %v8602_v34, %v3909_v29 }
 0x34b   : > { %4770 = vrot.lane.b32.xlu1 %v8274_v15, %s6886_s11 }
 0x34c   : > { %v4039_v28 = vpop.permute.xlu1 %4038 }
 0x34d   : > { %4768 = vrot.lane.b32.xlu0 %v8279_v30, %s6886_s11  ;;  %v4037_v31 = vpop.permute.xlu0 %4036  ;;  %v4157_v40 = vsel %vm1081_vm5, %v4125_v13, %v4039_v28 }
 0x34e   : > { %v4156_v47 = vsel %vm1081_vm5, %v4124_v19, %v4037_v31  ;;  %v8642_v31 = vld [vmem:[#allocation3 + $0xa8] sm:$0xff] }
 0x34f   : > { %6526 = vmatprep.mubr.msk.f32.mxu1 %vm1592_vm6, %v4156_v47  ;;  %4646 = vrot.lane.b32.xlu1 %v8284_v51, %s6887_s12  ;;  %v8644_v47 = vld [vmem:[#allocation3 + $0xb0] sm:$0xff] }
 0x350   : > { %6527 = vmatmul.mubr.msk.f32.gmra.mrb[14].mxu1 %vm1592_vm6, %v4157_v40  ;;  %v3915_v15 = vpop.permute.xlu1 %3914 }
 0x351   : > { %4644 = vrot.lane.b32.xlu0 %v8289_v53, %s6887_s12  ;;  %v3913_v30 = vpop.permute.xlu0 %3912  ;;  %v4127_v28 = vsel %vm457_vm0, %v8624_v52, %v3915_v15 }
 0x352   : > { %v4126_v29 = vsel %vm457_vm0, %v8622_v26, %v3913_v30 }
 0x353   : > { %4774 = vrot.lane.b32.xlu1 %v8294_v63, %s6886_s11 }
 0x354   : > { %v4043_v2 = vpop.permute.xlu1 %4042 }
 0x355   : > { %4772 = vrot.lane.b32.xlu0 %v8299_v42, %s6886_s11  ;;  %v4041_v51 = vpop.permute.xlu0 %4040  ;;  %v4159_v19 = vsel %vm1081_vm5, %v4127_v28, %v4043_v2  ;;  %v8662_v2 = vld [vmem:[#allocation3 + $0xc0] sm:$0xff] }
 0x356   : > { %v4158_v53 = vsel %vm1081_vm5, %v4126_v29, %v4041_v51  ;;  %v8664_v51 = vld [vmem:[#allocation3 + $0xc8] sm:$0xff] }
 0x357   : > { %6529 = vmatprep.mubr.msk.f32.mxu1 %vm1592_vm6, %v4158_v53  ;;  %4650 = vrot.lane.b32.xlu1 %v8304_v55, %s6887_s12 }
 0x358   : > { %6530 = vmatmul.mubr.msk.f32.gmra.mrb[16].mxu1 %vm1592_vm6, %v4159_v19  ;;  %v3919_v63 = vpop.permute.xlu1 %3918 }
 0x359   : > { %4648 = vrot.lane.b32.xlu0 %v8309_v17, %s6887_s12  ;;  %v3917_v42 = vpop.permute.xlu0 %3916  ;;  %v4129_v15 = vsel %vm457_vm0, %v8644_v47, %v3919_v63  ;;  %v8682_v63 = vld [vmem:[#allocation3 + $0xd8] sm:$0xff] }
 0x35a   : > { %v4128_v40 = vsel %vm457_vm0, %v8642_v31, %v3917_v42 }
 0x35b   : > { %4778 = vrot.lane.b32.xlu1 %v8314_v18, %s6886_s11 }
 0x35c   : > { %v4047_v13 = vpop.permute.xlu1 %4046 }
 0x35d   : > { %4776 = vrot.lane.b32.xlu0 %v8319_v50, %s6886_s11  ;;  %v4045_v55 = vpop.permute.xlu0 %4044  ;;  %v4161_v30 = vsel %vm1081_vm5, %v4129_v15, %v4047_v13  ;;  %v8684_v13 = vld [vmem:[#allocation3 + $0xe0] sm:$0xff] }
 0x35e   : > { %v4160_v17 = vsel %vm1081_vm5, %v4128_v40, %v4045_v55 }
 0x35f   : > { %6532 = vmatprep.mubr.msk.f32.mxu1 %vm1592_vm6, %v4160_v17  ;;  %4654 = vrot.lane.b32.xlu1 %v8324_v38, %s6887_s12  ;;  %v8702_v17 = vld [vmem:[#allocation3 + $0xf0] sm:$0xff] }
 0x360   : > { %6533 = vmatmul.mubr.msk.f32.gmra.mrb[18].mxu1 %vm1592_vm6, %v4161_v30  ;;  %v3923_v18 = vpop.permute.xlu1 %3922 }
 0x361   : > { %4652 = vrot.lane.b32.xlu0 %v8329_v39, %s6887_s12  ;;  %v3921_v50 = vpop.permute.xlu0 %3920  ;;  %v4131_v53 = vsel %vm457_vm0, %v8664_v51, %v3923_v18  ;;  %v8704_v18 = vld [vmem:[#allocation3 + $0xf8] sm:$0xff] }
 0x362   : > { %v4130_v28 = vsel %vm457_vm0, %v8662_v2, %v3921_v50 }
 0x363   : > { %4782 = vrot.lane.b32.xlu1 %v8334_v45, %s6886_s11 }
 0x364   : > { %v4051_v29 = vpop.permute.xlu1 %4050 }
 0x365   : > { %4780 = vrot.lane.b32.xlu0 %v8339_v8, %s6886_s11  ;;  %v4049_v38 = vpop.permute.xlu0 %4048  ;;  %v4163_v19 = vsel %vm1081_vm5, %v4131_v53, %v4051_v29 }
 0x366   : > { %v4162_v39 = vsel %vm1081_vm5, %v4130_v28, %v4049_v38  ;;  %v6393_v38 = vpop.f32.mrb[4].mxu1 }
 0x367   : > { %6535 = vmatprep.mubr.msk.f32.mxu1 %vm1592_vm6, %v4162_v39  ;;  %4658 = vrot.lane.b32.xlu1 %v8344_v35, %s6887_s12  ;;  %v1941_v53 = vpop.f32.mrb[5].mxu1  ;;  %v8722_v39 = vld [vmem:[#allocation3 + $0x108] sm:$0xff]  ;;  %v8784_v38 = vld [vmem:[#allocation3 + $0x158] sm:$0xff] }
 0x368   : > { %6536 = vmatmul.mubr.msk.f32.gmra.mrb[20].mxu1 %vm1592_vm6, %v4163_v19  ;;  %v3927_v45 = vpop.permute.xlu1 %3926 }
 0x369   : > { %4656 = vrot.lane.b32.xlu0 %v8349_v60, %s6887_s12  ;;  %v3925_v8 = vpop.permute.xlu0 %3924  ;;  %v4133_v55 = vsel %vm457_vm0, %v8684_v13, %v3927_v45  ;;  %v8724_v45 = vld [vmem:[#allocation3 + $0x110] sm:$0xff] }
 0x36a   : > { %v4132_v40 = vsel %vm457_vm0, %v8682_v63, %v3925_v8 }
 0x36b   : > { %4786 = vrot.lane.b32.xlu1 %v8354_v58, %s6886_s11 }
 0x36c   : > { %v4055_v42 = vpop.permute.xlu1 %4054 }
 0x36d   : > { %4784 = vrot.lane.b32.xlu0 %v8359_v12, %s6886_s11  ;;  %v4053_v35 = vpop.permute.xlu0 %4052  ;;  %v4165_v15 = vsel %vm1081_vm5, %v4133_v55, %v4055_v42 }
 0x36e   : > { %v4164_v60 = vsel %vm1081_vm5, %v4132_v40, %v4053_v35  ;;  %v8742_v35 = vld [vmem:[#allocation3 + $0x120] sm:$0xff] }
 0x36f   : > { %6538 = vmatprep.mubr.msk.f32.mxu1 %vm1592_vm6, %v4164_v60  ;;  %4662 = vrot.lane.b32.xlu1 %v8364_v43, %s6887_s12  ;;  %v8744_v60 = vld [vmem:[#allocation3 + $0x128] sm:$0xff] }
 0x370   : > { %6539 = vmatmul.mubr.msk.f32.gmra.mrb[22].mxu1 %vm1592_vm6, %v4165_v15  ;;  %v3931_v58 = vpop.permute.xlu1 %3930 }
 0x371   : > { %4660 = vrot.lane.b32.xlu0 %v8369_v25, %s6887_s12  ;;  %v3929_v12 = vpop.permute.xlu0 %3928  ;;  %v4135_v29 = vsel %vm457_vm0, %v8704_v18, %v3931_v58 }
 0x372   : > { %v4134_v50 = vsel %vm457_vm0, %v8702_v17, %v3929_v12 }
 0x373   : > { %4790 = vrot.lane.b32.xlu1 %v8374_v48, %s6886_s11 }
 0x374   : > { %v4059_v30 = vpop.permute.xlu1 %4058 }
 0x375   : > { %4788 = vrot.lane.b32.xlu0 %v8379_v57, %s6886_s11  ;;  %v4057_v43 = vpop.permute.xlu0 %4056  ;;  %v4167_v28 = vsel %vm1081_vm5, %v4135_v29, %v4059_v30  ;;  %v8762_v30 = vld [vmem:[#allocation3 + $0x138] sm:$0xff] }
 0x376   : > { %v4166_v25 = vsel %vm1081_vm5, %v4134_v50, %v4057_v43  ;;  %v8764_v43 = vld [vmem:[#allocation3 + $0x140] sm:$0xff] }
 0x377   : > { %6541 = vmatprep.mubr.msk.f32.mxu1 %vm1592_vm6, %v4166_v25  ;;  %4666 = vrot.lane.b32.xlu1 %v8384_v7, %s6887_s12 }
 0x378   : > { %6542 = vmatmul.mubr.msk.f32.gmra.mrb[24].mxu1 %vm1592_vm6, %v4167_v28  ;;  %v3935_v48 = vpop.permute.xlu1 %3934 }
 0x379   : > { %4664 = vrot.lane.b32.xlu0 %v8389_v5, %s6887_s12  ;;  %v3933_v57 = vpop.permute.xlu0 %3932  ;;  %v4137_v5 = vsel %vm457_vm0, %v8724_v45, %v3935_v48  ;;  %v8782_v48 = vld [vmem:[#allocation3 + $0x150] sm:$0xff] }
 0x37a   : > { %v4136_v7 = vsel %vm457_vm0, %v8722_v39, %v3933_v57 }
 0x37b   : > { %4794 = vrot.lane.b32.xlu1 %v8394_v33, %s6886_s11 }
 0x37c   : > { %v4063_v19 = vpop.permute.xlu1 %4062 }
 0x37d   : > { %4792 = vrot.lane.b32.xlu0 %v8399_v21, %s6886_s11  ;;  %v4061_v8 = vpop.permute.xlu0 %4060  ;;  %v4169_v33 = vsel %vm1081_vm5, %v4137_v5, %v4063_v19  ;;  %v8806_v5 = vld [vmem:[#allocation3 + $0x168] sm:$0xff] }
 0x37e   : > { %v4168_v42 = vsel %vm1081_vm5, %v4136_v7, %v4061_v8  ;;  %v9357_v8 = vld [vmem:[#allocation4_spill] sm:$0xff] }
 0x37f   : > { %6544 = vmatprep.mubr.msk.f32.mxu1 %vm1592_vm6, %v4168_v42  ;;  %4670 = vrot.lane.b32.xlu1 %v8404_v22, %s6887_s12 }
 0x380   : > { %6545 = vmatmul.mubr.msk.f32.gmra.mrb[26].mxu1 %vm1592_vm6, %v4169_v33  ;;  %v3939_v40 = vpop.permute.xlu1 %3938  ;;  %v8810_v33 = vld [vmem:[#allocation3 + $0x170] sm:$0xff] }
 0x381   : > { %4668 = vrot.lane.b32.xlu0 %v8409_v23, %s6887_s12  ;;  %v3937_v21 = vpop.permute.xlu0 %3936  ;;  %v4139_v58 = vsel %vm457_vm0, %v8744_v60, %v3939_v40 }
 0x382   : > { %v4138_v15 = vsel %vm457_vm0, %v8742_v35, %v3937_v21  ;;  %v9359_v21 = vld [vmem:[#allocation6_spill] sm:$0xff] }
 0x383   : > { %4798 = vrot.lane.b32.xlu1 %v8414_v37, %s6886_s11 }
 0x384   : > { %v4067_v55 = vpop.permute.xlu1 %4066 }
 0x385   : > { %4796 = vrot.lane.b32.xlu0 %v8419_v49, %s6886_s11  ;;  %v4065_v22 = vpop.permute.xlu0 %4064  ;;  %v4171_v12 = vsel %vm1081_vm5, %v4139_v58, %v4067_v55  ;;  %v9362_v58 = vld [vmem:[#allocation9_spill] sm:$0xff] }
 0x386   : > { %v4170_v23 = vsel %vm1081_vm5, %v4138_v15, %v4065_v22  ;;  %v9360_v15 = vld [vmem:[#allocation7_spill] sm:$0xff]  ;;  %v9361_v22 = vld [vmem:[#allocation8_spill] sm:$0xff] }
 0x387   : > { %6547 = vmatprep.mubr.msk.f32.mxu1 %vm1592_vm6, %v4170_v23  ;;  %4674 = vrot.lane.b32.xlu1 %v8424_v1, %s6887_s12  ;;  %v9363_v23 = vld [vmem:[#allocation10_spill] sm:$0xff] }
 0x388   : > { %6548 = vmatmul.mubr.msk.f32.gmra.mrb[28].mxu1 %vm1592_vm6, %v4171_v12  ;;  %v3943_v37 = vpop.permute.xlu1 %3942  ;;  %v9364_v12 = vld [vmem:[#allocation11_spill] sm:$0xff] }
 0x389   : > { %4672 = vrot.lane.b32.xlu0 %v8429_v41, %s6887_s12  ;;  %v3941_v49 = vpop.permute.xlu0 %3940  ;;  %v4141_v25 = vsel %vm457_vm0, %v8764_v43, %v3943_v37 }
 0x38a   : > { %v4140_v29 = vsel %vm457_vm0, %v8762_v30, %v3941_v49 }
 0x38b   : > { %4802 = vrot.lane.b32.xlu1 %v8434_v20, %s6886_s11 }
 0x38c   : > { %v4071_v50 = vpop.permute.xlu1 %4070 }
 0x38d   : > { %4800 = vrot.lane.b32.xlu0 %v8439_v27, %s6886_s11  ;;  %v4069_v1 = vpop.permute.xlu0 %4068  ;;  %v4173_v28 = vsel %vm1081_vm5, %v4141_v25, %v4071_v50 }
 0x38e   : > { %v4172_v41 = vsel %vm1081_vm5, %v4140_v29, %v4069_v1  ;;  %v8836_v29 = vld [vmem:[#allocation3 + $0x180] sm:$0xff]  ;;  %v8838_v1 = vld [vmem:[#allocation3 + $0x188] sm:$0xff] }
 0x38f   : > { %6550 = vmatprep.mubr.msk.f32.mxu1 %vm1592_vm6, %v4172_v41  ;;  %4678 = vrot.lane.b32.xlu1 %v8444_v16, %s6887_s12 }
 0x390   : > { %6551 = vmatmul.mubr.msk.f32.gmra.mrb[30].mxu1 %vm1592_vm6, %v4173_v28  ;;  %v3947_v20 = vpop.permute.xlu1 %3946 }
 0x391   : > { %4676 = vrot.lane.b32.xlu0 %v8449_v59, %s6887_s12  ;;  %v3945_v27 = vpop.permute.xlu0 %3944  ;;  %v4143_v19 = vsel %vm457_vm0, %v8784_v38, %v3947_v20  ;;  %v4571_v20 = vld [vmem:[#allocation3 + $0x1a1] sm:$0xff] }
 0x392   : > { %v4142_v53 = vsel %vm457_vm0, %v8782_v48, %v3945_v27  ;;  %v3763_v27 = vld [vmem:[%s9318_s5 + $0x8] sm:$0xf] }
 0x393   : > { %4806 = vrot.lane.b32.xlu1 %v8454_v3, %s6886_s11 }
 0x394   : > { %v4075_v57 = vpop.permute.xlu1 %4074 }
 0x395   : > { %4804 = vrot.lane.b32.xlu0 %v8459_v32, %s6886_s11  ;;  %v4073_v16 = vpop.permute.xlu0 %4072  ;;  %v4175_v7 = vsel %vm1081_vm5, %v4143_v19, %v4075_v57  ;;  %v4860_v19 = vsel %vm457_vm0, %v8521_v44, %v8546_v10  ;;  %v4602_v10 = vld [vmem:[#allocation3 + $0x19a] sm:$0xff] }
 0x396   : > { %v4174_v59 = vsel %vm1081_vm5, %v4142_v53, %v4073_v16  ;;  %v4570_v16 = vld [vmem:[#allocation3 + $0x199] sm:$0xff] }
 0x397   : > { %6553 = vmatprep.mubr.msk.f32.mxu1 %vm1592_vm6, %v4174_v59  ;;  %4682 = vrot.lane.b32.xlu1 %v8464_v6, %s6887_s12  ;;  %v9358_v6 = vld [vmem:[#allocation5_spill] sm:$0xff] }
 0x398   : > { %6554 = vmatmul.mubr.msk.f32.gmra.mrb[32].mxu1 %vm1592_vm6, %v4175_v7  ;;  %v9365_v7 = vld [vmem:[#allocation12_spill] sm:$0xff] }
 0x399   : > { %4680 = vrot.lane.b32.xlu0 %v8468_v0, %s6887_s12 }
 0x39b   : > { %4810 = vrot.lane.b32.xlu1 %v8472_v62, %s6886_s11 }
 0x39d   : > { %4808 = vrot.lane.b32.xlu0 %v8476_v54, %s6886_s11  ;;  %v3951_v3 = vpop.permute.xlu1 %3950 }
 0x39e   : > { %v3949_v32 = vpop.permute.xlu0 %3948  ;;  %v4145_v54 = vsel %vm457_vm0, %v8810_v33, %v3951_v3 }
 0x39f   : > { %4686 = vrot.lane.b32.xlu1 %v9357_v8, %s6887_s12  ;;  %v4144_v0 = vsel %vm457_vm0, %v8806_v5, %v3949_v32  ;;  %v4603_v32 = vld [vmem:[#allocation3 + $0x1a2] sm:$0xff] }
 0x3a1   : > { %4684 = vrot.lane.b32.xlu0 %v9358_v6, %s6887_s12  ;;  %v4079_v42 = vpop.permute.xlu1 %4078 }
 0x3a2   : > { %v4077_v62 = vpop.permute.xlu0 %4076  ;;  %v4177_v55 = vsel %vm1081_vm5, %v4145_v54, %v4079_v42 }
 0x3a3   : > { %v4176_v40 = vsel %vm1081_vm5, %v4144_v0, %v4077_v62  ;;  %4814 = vrot.lane.b32.xlu1 %v9359_v21, %s6886_s11  ;;  %v3378_v0 = vld [vmem:[#allocation3 + $0x1] sm:$0xff]  ;;  %v9366_v62 = vld [vmem:[#allocation13_spill] sm:$0xff] }
 0x3a4   : > { %6556 = vmatprep.mubr.msk.f32.mxu1 %vm1592_vm6, %v4176_v40  ;;  %v9367_v21 = vld [vmem:[#allocation14_spill] sm:$0xff] }
 0x3a5   : > { %4812 = vrot.lane.b32.xlu0 %v9360_v15, %s6886_s11  ;;  %6557 = vmatmul.mubr.msk.f32.gmra.mrb[34].mxu1 %vm1592_vm6, %v4177_v55 }
 0x3a7   : > { %4690 = vrot.lane.b32.xlu1 %v9361_v22, %s6887_s12  ;;  %v3411_v22 = vld [vmem:[#allocation3 + $0xa] sm:$0xff] }
 0x3a9   : > { %4688 = vrot.lane.b32.xlu0 %v9362_v58, %s6887_s12 }
 0x3ab   : > { %4818 = vrot.lane.b32.xlu1 %v9363_v23, %s6886_s11  ;;  %v3410_v23 = vld [vmem:[#allocation3 + $0x2] sm:$0xff] }
 0x3ad   : > { %4816 = vrot.lane.b32.xlu0 %v9364_v12, %s6886_s11  ;;  %v3955_v37 = vpop.permute.xlu1 %3954 }
 0x3ae   : > { %v4147_v28 = vsel %vm457_vm0, %v8838_v1, %v3955_v37 }
 0x3af   : > { %v3953_v49 = vpop.permute.xlu0 %3952  ;;  %4694 = vrot.lane.b32.xlu1 %v8552_v56, %s6887_s12 }
 0x3b0   : > { %v4146_v25 = vsel %vm457_vm0, %v8836_v29, %v3953_v49  ;;  %v3381_v49 = vld [vmem:[#allocation3 + $0x21] sm:$0xff] }
 0x3b1   : > { %4692 = vrot.lane.b32.xlu0 %v8558_v14, %s6887_s12  ;;  %v4083_v50 = vpop.permute.xlu1 %4082  ;;  %v3762_v14 = vld [vmem:[%s9318_s5] sm:$0xff] }
 0x3b2   : > { %v4179_v57 = vsel %vm1081_vm5, %v4147_v28, %v4083_v50  ;;  %v6696_v53 = vpack.c.bf16 %v3763_v27, %v3762_v14  ;;  %v3413_v27 = vld [vmem:[#allocation3 + $0x22] sm:$0xff] }
 0x3b3   : > { %v4081_v41 = vpop.permute.xlu0 %4080  ;;  %4822 = vrot.lane.b32.xlu1 %v8569_v46, %s6886_s11 }
 0x3b4   : > { %v4178_v56 = vsel %vm1081_vm5, %v4146_v25, %v4081_v41  ;;  %6698 = vmatprep.subr.msk.bf16.mxu1 %vm7186_vm4, %v6696_v53 }
 0x3b5   : > { %4820 = vrot.lane.b32.xlu0 %v8576_v9, %s6886_s11  ;;  %6559 = vmatprep.mubr.msk.f32.mxu1 %vm1592_vm6, %v4178_v56  ;;  %v4767_v46 = vpop.permute.xlu1 %4766  ;;  %v4861_v9 = vsel %vm457_vm0, %v9365_v7, %v8536_v24  ;;  %v3379_v24 = vld [vmem:[#allocation3 + $0x9] sm:$0xff]  ;;  %v3380_v56 = vld [vmem:[#allocation3 + $0x19] sm:$0xff]  ;;  %v3382_v7 = vld [vmem:[#allocation3 + $0x31] sm:$0xff] }
 0x3b6   : > { %6560 = vmatmul.mubr.msk.f32.gmra.mrb[36].mxu1 %vm1592_vm6, %v4179_v57  ;;  %v4893_v8 = vsel %vm1081_vm5, %v4861_v9, %v4767_v46  ;;  %v3412_v57 = vld [vmem:[#allocation3 + $0x1a] sm:$0xff] }
 0x3b7   : > { %v4765_v59 = vpop.permute.xlu0 %4764  ;;  %4698 = vrot.lane.b32.xlu1 %v4571_v20, %s6887_s12  ;;  %v3383_v46 = vld [vmem:[#allocation3 + $0x39] sm:$0xff] }
 0x3b8   : > { %v4892_v3 = vsel %vm1081_vm5, %v4860_v19, %v4765_v59 }
 0x3b9   : > { %4696 = vrot.lane.b32.xlu0 %v4570_v16, %s6887_s12  ;;  %6566 = vmatprep.mubr.msk.f32.mxu1 %vm1592_vm6, %v4892_v3  ;;  %v4643_v44 = vpop.permute.xlu1 %4642 }
 0x3ba   : > { %6567 = vmatmul.mubr.msk.f32.vlgmr.msra.gmra.mrb[6].mxu1 %vm1592_vm6, %v4893_v8  ;;  %v4863_v55 = vsel %vm457_vm0, %v9367_v21, %v4643_v44  ;;  %v3414_v8 = vld [vmem:[#allocation3 + $0x32] sm:$0xff]  ;;  %v3416_v21 = vld [vmem:[#allocation3 + $0x4a] sm:$0xff] }
 0x3bb   : > { %v4641_v6 = vpop.permute.xlu0 %4640  ;;  %4826 = vrot.lane.b32.xlu1 %v4603_v32, %s6886_s11  ;;  %6701 = vmatpush3.bf16.msk.msra.mxu1 %vm7186_vm4, %v6696_v53  ;;  %v3415_v32 = vld [vmem:[#allocation3 + $0x3a] sm:$0xff]  ;;  %v3385_v44 = vld [vmem:[#allocation3 + $0x51] sm:$0xff] }
 0x3bc   : > { %v4862_v54 = vsel %vm457_vm0, %v9366_v62, %v4641_v6 }
 0x3bd   : > { %4824 = vrot.lane.b32.xlu0 %v4602_v10, %s6886_s11  ;;  %v4771_v42 = vpop.permute.xlu1 %4770 }
 0x3be   : > { %v4895_v4 = vsel %vm1081_vm5, %v4863_v55, %v4771_v42  ;;  %v3387_v55 = vld [vmem:[#allocation3 + $0x69] sm:$0xff] }
 0x3bf   : > { %v4769_v40 = vpop.permute.xlu0 %4768  ;;  %3476 = vrot.lane.b32.xlu1 %v3379_v24, %s6887_s12 }
 0x3c0   : > { %v4894_v15 = vsel %vm1081_vm5, %v4862_v54, %v4769_v40  ;;  %v3417_v40 = vld [vmem:[#allocation3 + $0x52] sm:$0xff] }
 0x3c1   : > { %3474 = vrot.lane.b32.xlu0 %v3378_v0, %s6887_s12  ;;  %6569 = vmatprep.mubr.msk.f32.mxu1 %vm1592_vm6, %v4894_v15  ;;  %v4647_v58 = vpop.permute.xlu1 %4646  ;;  %v3384_v0 = vld [vmem:[#allocation3 + $0x49] sm:$0xff] }
 0x3c2   : > { %6570 = vmatmul.mubr.msk.f32.gmra.mrb[8].mxu1 %vm1592_vm6, %v4895_v4  ;;  %v4865_v41 = vsel %vm457_vm0, %v8584_v61, %v4647_v58 }
 0x3c3   : > { %v4645_v12 = vpop.permute.xlu0 %4644  ;;  %3604 = vrot.lane.b32.xlu1 %v3411_v22, %s6886_s11 }
 0x3c4   : > { %v4864_v50 = vsel %vm457_vm0, %v8582_v11, %v4645_v12 }
 0x3c5   : > { %3602 = vrot.lane.b32.xlu0 %v3410_v23, %s6886_s11  ;;  %v4775_v37 = vpop.permute.xlu1 %4774  ;;  %v3386_v23 = vld [vmem:[#allocation3 + $0x61] sm:$0xff] }
 0x3c6   : > { %v4897_v20 = vsel %vm1081_vm5, %v4865_v41, %v4775_v37 }
 0x3c7   : > { %v4773_v25 = vpop.permute.xlu0 %4772  ;;  %3480 = vrot.lane.b32.xlu1 %v3381_v49, %s6887_s12  ;;  %v3419_v49 = vld [vmem:[#allocation3 + $0x6a] sm:$0xff] }
 0x3c8   : > { %v4896_v28 = vsel %vm1081_vm5, %v4864_v50, %v4773_v25  ;;  %v3418_v50 = vld [vmem:[#allocation3 + $0x62] sm:$0xff] }
 0x3c9   : > { %3478 = vrot.lane.b32.xlu0 %v3380_v56, %s6887_s12  ;;  %6572 = vmatprep.mubr.msk.f32.mxu1 %vm1592_vm6, %v4896_v28  ;;  %v4651_v14 = vpop.permute.xlu1 %4650  ;;  %v3389_v25 = vld [vmem:[#allocation3 + $0x81] sm:$0xff] }
 0x3ca   : > { %6573 = vmatmul.mubr.msk.f32.gmra.mrb[10].mxu1 %vm1592_vm6, %v4897_v20  ;;  %v4867_v19 = vsel %vm457_vm0, %v8604_v36, %v4651_v14  ;;  %v3388_v14 = vld [vmem:[#allocation3 + $0x79] sm:$0xff] }
 0x3cb   : > { %v4649_v11 = vpop.permute.xlu0 %4648  ;;  %3608 = vrot.lane.b32.xlu1 %v3413_v27, %s6886_s11 }
 0x3cc   : > { %v4866_v53 = vsel %vm457_vm0, %v8602_v34, %v4649_v11 }
 0x3cd   : > { %3606 = vrot.lane.b32.xlu0 %v3412_v57, %s6886_s11  ;;  %v4779_v61 = vpop.permute.xlu1 %4778  ;;  %v3421_v57 = vld [vmem:[#allocation3 + $0x82] sm:$0xff] }
 0x3ce   : > { %v4899_v9 = vsel %vm1081_vm5, %v4867_v19, %v4779_v61  ;;  %v3420_v61 = vld [vmem:[#allocation3 + $0x7a] sm:$0xff] }
 0x3cf   : > { %v4777_v16 = vpop.permute.xlu0 %4776  ;;  %3484 = vrot.lane.b32.xlu1 %v3383_v46, %s6887_s12  ;;  %v3391_v46 = vld [vmem:[#allocation3 + $0x99] sm:$0xff] }
 0x3d0   : > { %v4898_v59 = vsel %vm1081_vm5, %v4866_v53, %v4777_v16 }
 0x3d1   : > { %3482 = vrot.lane.b32.xlu0 %v3382_v7, %s6887_s12  ;;  %6575 = vmatprep.mubr.msk.f32.mxu1 %vm1592_vm6, %v4898_v59  ;;  %v4655_v3 = vpop.permute.xlu1 %4654  ;;  %v3390_v7 = vld [vmem:[#allocation3 + $0x91] sm:$0xff] }
 0x3d2   : > { %6576 = vmatmul.mubr.msk.f32.gmra.mrb[12].mxu1 %vm1592_vm6, %v4899_v9  ;;  %v4869_v24 = vsel %vm457_vm0, %v8624_v52, %v4655_v3 }
 0x3d3   : > { %v4653_v34 = vpop.permute.xlu0 %4652  ;;  %3612 = vrot.lane.b32.xlu1 %v3415_v32, %s6886_s11  ;;  %v3423_v32 = vld [vmem:[#allocation3 + $0x9a] sm:$0xff] }
 0x3d4   : > { %v4868_v10 = vsel %vm457_vm0, %v8622_v26, %v4653_v34  ;;  %v3422_v34 = vld [vmem:[#allocation3 + $0x92] sm:$0xff] }
 0x3d5   : > { %3610 = vrot.lane.b32.xlu0 %v3414_v8, %s6886_s11  ;;  %v4783_v36 = vpop.permute.xlu1 %4782  ;;  %v3393_v8 = vld [vmem:[#allocation3 + $0xb1] sm:$0xff] }
 0x3d6   : > { %v4901_v62 = vsel %vm1081_vm5, %v4869_v24, %v4783_v36  ;;  %v3392_v24 = vld [vmem:[#allocation3 + $0xa9] sm:$0xff] }
 0x3d7   : > { %v4781_v6 = vpop.permute.xlu0 %4780  ;;  %3488 = vrot.lane.b32.xlu1 %v3385_v44, %s6887_s12 }
 0x3d8   : > { %v4900_v42 = vsel %vm1081_vm5, %v4868_v10, %v4781_v6 }
 0x3d9   : > { %3486 = vrot.lane.b32.xlu0 %v3384_v0, %s6887_s12  ;;  %6578 = vmatprep.mubr.msk.f32.mxu1 %vm1592_vm6, %v4900_v42  ;;  %v4659_v54 = vpop.permute.xlu1 %4658 }
 0x3da   : > { %6579 = vmatmul.mubr.msk.f32.gmra.mrb[14].mxu1 %vm1592_vm6, %v4901_v62  ;;  %v4871_v4 = vsel %vm457_vm0, %v8644_v47, %v4659_v54  ;;  %v3425_v62 = vld [vmem:[#allocation3 + $0xb2] sm:$0xff]  ;;  %v3424_v54 = vld [vmem:[#allocation3 + $0xaa] sm:$0xff] }
 0x3db   : > { %v4657_v26 = vpop.permute.xlu0 %4656  ;;  %3616 = vrot.lane.b32.xlu1 %v3417_v40, %s6886_s11  ;;  %v3395_v40 = vld [vmem:[#allocation3 + $0xc9] sm:$0xff] }
 0x3dc   : > { %v4870_v15 = vsel %vm457_vm0, %v8642_v31, %v4657_v26 }
 0x3dd   : > { %3614 = vrot.lane.b32.xlu0 %v3416_v21, %s6886_s11  ;;  %v4787_v52 = vpop.permute.xlu1 %4786 }
 0x3de   : > { %v4903_v12 = vsel %vm1081_vm5, %v4871_v4, %v4787_v52 }
 0x3df   : > { %v4785_v22 = vpop.permute.xlu0 %4784  ;;  %3492 = vrot.lane.b32.xlu1 %v3387_v55, %s6887_s12 }
 0x3e0   : > { %v4902_v58 = vsel %vm1081_vm5, %v4870_v15, %v4785_v22  ;;  %v3394_v15 = vld [vmem:[#allocation3 + $0xc1] sm:$0xff] }
 0x3e1   : > { %3490 = vrot.lane.b32.xlu0 %v3386_v23, %s6887_s12  ;;  %6581 = vmatprep.mubr.msk.f32.mxu1 %vm1592_vm6, %v4902_v58  ;;  %v4663_v37 = vpop.permute.xlu1 %4662  ;;  %v3427_v58 = vld [vmem:[#allocation3 + $0xca] sm:$0xff]  ;;  %v3426_v23 = vld [vmem:[#allocation3 + $0xc2] sm:$0xff] }
 0x3e2   : > { %6582 = vmatmul.mubr.msk.f32.gmra.mrb[16].mxu1 %vm1592_vm6, %v4903_v12  ;;  %v4873_v56 = vsel %vm457_vm0, %v8664_v51, %v4663_v37  ;;  %v3397_v12 = vld [vmem:[#allocation3 + $0xe1] sm:$0xff] }
 0x3e3   : > { %v4661_v31 = vpop.permute.xlu0 %4660  ;;  %3620 = vrot.lane.b32.xlu1 %v3419_v49, %s6886_s11 }
 0x3e4   : > { %v4872_v41 = vsel %vm457_vm0, %v8662_v2, %v4661_v31 }
 0x3e5   : > { %3618 = vrot.lane.b32.xlu0 %v3418_v50, %s6886_s11  ;;  %v4791_v47 = vpop.permute.xlu1 %4790 }
 0x3e6   : > { %v4905_v27 = vsel %vm1081_vm5, %v4873_v56, %v4791_v47  ;;  %v3396_v47 = vld [vmem:[#allocation3 + $0xd9] sm:$0xff] }
 0x3e7   : > { %v4789_v28 = vpop.permute.xlu0 %4788  ;;  %3496 = vrot.lane.b32.xlu1 %v3389_v25, %s6887_s12  ;;  %v3428_v56 = vld [vmem:[#allocation3 + $0xda] sm:$0xff] }
 0x3e8   : > { %v4904_v20 = vsel %vm1081_vm5, %v4872_v41, %v4789_v28  ;;  %v3429_v28 = vld [vmem:[#allocation3 + $0xe2] sm:$0xff] }
 0x3e9   : > { %3494 = vrot.lane.b32.xlu0 %v3388_v14, %s6887_s12  ;;  %6584 = vmatprep.mubr.msk.f32.mxu1 %vm1592_vm6, %v4904_v20  ;;  %v4667_v11 = vpop.permute.xlu1 %4666  ;;  %v3399_v20 = vld [vmem:[#allocation3 + $0xf9] sm:$0xff] }
 0x3ea   : > { %6585 = vmatmul.mubr.msk.f32.gmra.mrb[18].mxu1 %vm1592_vm6, %v4905_v27  ;;  %v4875_v19 = vsel %vm457_vm0, %v8684_v13, %v4667_v11 }
 0x3eb   : > { %v4665_v2 = vpop.permute.xlu0 %4664  ;;  %3624 = vrot.lane.b32.xlu1 %v3421_v57, %s6886_s11 }
 0x3ec   : > { %v4874_v53 = vsel %vm457_vm0, %v8682_v63, %v4665_v2  ;;  %v3398_v2 = vld [vmem:[#allocation3 + $0xf1] sm:$0xff] }
 0x3ed   : > { %3622 = vrot.lane.b32.xlu0 %v3420_v61, %s6886_s11  ;;  %v4795_v51 = vpop.permute.xlu1 %4794 }
 0x3ee   : > { %v4907_v9 = vsel %vm1081_vm5, %v4875_v19, %v4795_v51 }
 0x3ef   : > { %v4793_v16 = vpop.permute.xlu0 %4792  ;;  %3500 = vrot.lane.b32.xlu1 %v3391_v46, %s6887_s12  ;;  %v3431_v46 = vld [vmem:[#allocation3 + $0xfa] sm:$0xff] }
 0x3f0   : > { %v4906_v59 = vsel %vm1081_vm5, %v4874_v53, %v4793_v16  ;;  %v3430_v53 = vld [vmem:[#allocation3 + $0xf2] sm:$0xff] }
 0x3f1   : > { %3498 = vrot.lane.b32.xlu0 %v3390_v7, %s6887_s12  ;;  %6587 = vmatprep.mubr.msk.f32.mxu1 %vm1592_vm6, %v4906_v59  ;;  %v4671_v3 = vpop.permute.xlu1 %4670  ;;  %v3401_v16 = vld [vmem:[#allocation3 + $0x111] sm:$0xff] }
 0x3f2   : > { %6588 = vmatmul.mubr.msk.f32.gmra.mrb[20].mxu1 %vm1592_vm6, %v4907_v9  ;;  %v4877_v10 = vsel %vm457_vm0, %v8704_v18, %v4671_v3  ;;  %v3400_v3 = vld [vmem:[#allocation3 + $0x109] sm:$0xff] }
 0x3f3   : > { %v4669_v63 = vpop.permute.xlu0 %4668  ;;  %3628 = vrot.lane.b32.xlu1 %v3423_v32, %s6886_s11 }
 0x3f4   : > { %v4876_v36 = vsel %vm457_vm0, %v8702_v17, %v4669_v63 }
 0x3f5   : > { %3626 = vrot.lane.b32.xlu0 %v3422_v34, %s6886_s11  ;;  %v4799_v13 = vpop.permute.xlu1 %4798  ;;  %v3433_v34 = vld [vmem:[#allocation3 + $0x112] sm:$0xff] }
 0x3f6   : > { %v4909_v42 = vsel %vm1081_vm5, %v4877_v10, %v4799_v13  ;;  %v3432_v13 = vld [vmem:[#allocation3 + $0x10a] sm:$0xff] }
 0x3f7   : > { %v4797_v44 = vpop.permute.xlu0 %4796  ;;  %3504 = vrot.lane.b32.xlu1 %v3393_v8, %s6887_s12  ;;  %v3403_v8 = vld [vmem:[#allocation3 + $0x129] sm:$0xff] }
 0x3f8   : > { %v4908_v6 = vsel %vm1081_vm5, %v4876_v36, %v4797_v44 }
 0x3f9   : > { %3502 = vrot.lane.b32.xlu0 %v3392_v24, %s6887_s12  ;;  %6590 = vmatprep.mubr.msk.f32.mxu1 %vm1592_vm6, %v4908_v6  ;;  %v4675_v0 = vpop.permute.xlu1 %4674  ;;  %v3402_v24 = vld [vmem:[#allocation3 + $0x121] sm:$0xff] }
 0x3fa   : > { %6591 = vmatmul.mubr.msk.f32.gmra.mrb[22].mxu1 %vm1592_vm6, %v4909_v42  ;;  %v4879_v52 = vsel %vm457_vm0, %v8724_v45, %v4675_v0 }
 0x3fb   : > { %v4673_v17 = vpop.permute.xlu0 %4672  ;;  %3632 = vrot.lane.b32.xlu1 %v3425_v62, %s6886_s11  ;;  %v3435_v62 = vld [vmem:[#allocation3 + $0x12a] sm:$0xff] }
 0x3fc   : > { %v4878_v26 = vsel %vm457_vm0, %v8722_v39, %v4673_v17  ;;  %v3434_v17 = vld [vmem:[#allocation3 + $0x122] sm:$0xff] }
 0x3fd   : > { %3630 = vrot.lane.b32.xlu0 %v3424_v54, %s6886_s11  ;;  %v4803_v18 = vpop.permute.xlu1 %4802  ;;  %v3405_v54 = vld [vmem:[#allocation3 + $0x141] sm:$0xff] }
 0x3fe   : > { %v4911_v22 = vsel %vm1081_vm5, %v4879_v52, %v4803_v18  ;;  %v3404_v52 = vld [vmem:[#allocation3 + $0x139] sm:$0xff] }
 0x3ff   : > { %v4801_v21 = vpop.permute.xlu0 %4800  ;;  %3508 = vrot.lane.b32.xlu1 %v3395_v40, %s6887_s12 }
 0x400   : > { %v4910_v55 = vsel %vm1081_vm5, %v4878_v26, %v4801_v21 }
 0x401   : > { %3506 = vrot.lane.b32.xlu0 %v3394_v15, %s6887_s12  ;;  %6593 = vmatprep.mubr.msk.f32.mxu1 %vm1592_vm6, %v4910_v55  ;;  %v4679_v4 = vpop.permute.xlu1 %4678 }
 0x402   : > { %6594 = vmatmul.mubr.msk.f32.gmra.mrb[24].mxu1 %vm1592_vm6, %v4911_v22  ;;  %v4881_v31 = vsel %vm457_vm0, %v8744_v60, %v4679_v4  ;;  %v3437_v22 = vld [vmem:[#allocation3 + $0x142] sm:$0xff] }
 0x403   : > { %v4677_v39 = vpop.permute.xlu0 %4676  ;;  %3636 = vrot.lane.b32.xlu1 %v3427_v58, %s6886_s11  ;;  %v4538_v58 = vld [vmem:[#allocation3 + $0x198] sm:$0xff] }
 0x404   : > { %v4880_v37 = vsel %vm457_vm0, %v8742_v35, %v4677_v39  ;;  %v3436_v39 = vld [vmem:[#allocation3 + $0x13a] sm:$0xff] }
 0x405   : > { %3634 = vrot.lane.b32.xlu0 %v3426_v23, %s6886_s11  ;;  %v4807_v45 = vpop.permute.xlu1 %4806 }
 0x406   : > { %v4913_v25 = vsel %vm1081_vm5, %v4881_v31, %v4807_v45  ;;  %v3407_v45 = vld [vmem:[#allocation3 + $0x159] sm:$0xff]  ;;  %v3406_v31 = vld [vmem:[#allocation3 + $0x151] sm:$0xff] }
 0x407   : > { %v4805_v49 = vpop.permute.xlu0 %4804  ;;  %3512 = vrot.lane.b32.xlu1 %v3397_v12, %s6887_s12 }
 0x408   : > { %v4912_v50 = vsel %vm1081_vm5, %v4880_v37, %v4805_v49 }
 0x409   : > { %3510 = vrot.lane.b32.xlu0 %v3396_v47, %s6887_s12  ;;  %6596 = vmatprep.mubr.msk.f32.mxu1 %vm1592_vm6, %v4912_v50  ;;  %v4683_v41 = vpop.permute.xlu1 %4682 }
 0x40a   : > { %6597 = vmatmul.mubr.msk.f32.gmra.mrb[26].mxu1 %vm1592_vm6, %v4913_v25  ;;  %v4883_v11 = vsel %vm457_vm0, %v8764_v43, %v4683_v41  ;;  %v3439_v25 = vld [vmem:[#allocation3 + $0x15a] sm:$0xff]  ;;  %v3347_v41 = vld [vmem:[#allocation3 + $0x8] sm:$0xff] }
 0x40b   : > { %v4681_v35 = vpop.permute.xlu0 %4680  ;;  %3640 = vrot.lane.b32.xlu1 %v3429_v28, %s6886_s11 }
 0x40c   : > { %v4882_v14 = vsel %vm457_vm0, %v8762_v30, %v4681_v35  ;;  %v3346_v35 = vld [vmem:[#allocation3] sm:$0xff] }
 0x40d   : > { %3638 = vrot.lane.b32.xlu0 %v3428_v56, %s6886_s11  ;;  %v4811_v60 = vpop.permute.xlu1 %4810  ;;  %v3438_v56 = vld [vmem:[#allocation3 + $0x152] sm:$0xff] }
 0x40e   : > { %v4915_v61 = vsel %vm1081_vm5, %v4883_v11, %v4811_v60 }
 0x40f   : > { %v4809_v27 = vpop.permute.xlu0 %4808  ;;  %3516 = vrot.lane.b32.xlu1 %v3399_v20, %s6887_s12 }
 0x410   : > { %v4914_v57 = vsel %vm1081_vm5, %v4882_v14, %v4809_v27  ;;  %v3409_v14 = vld [vmem:[#allocation3 + $0x171] sm:$0xff] }
 0x411   : > { %3514 = vrot.lane.b32.xlu0 %v3398_v2, %s6887_s12  ;;  %6599 = vmatprep.mubr.msk.f32.mxu1 %vm1592_vm6, %v4914_v57  ;;  %v4687_v51 = vpop.permute.xlu1 %4686  ;;  %v3408_v2 = vld [vmem:[#allocation3 + $0x169] sm:$0xff] }
 0x412   : > { %6600 = vmatmul.mubr.msk.f32.gmra.mrb[28].mxu1 %vm1592_vm6, %v4915_v61  ;;  %v4885_v7 = vsel %vm457_vm0, %v8784_v38, %v4687_v51 }
 0x413   : > { %v4685_v30 = vpop.permute.xlu0 %4684  ;;  %3644 = vrot.lane.b32.xlu1 %v3431_v46, %s6886_s11  ;;  %v3441_v46 = vld [vmem:[#allocation3 + $0x172] sm:$0xff] }
 0x414   : > { %v4884_v19 = vsel %vm457_vm0, %v8782_v48, %v4685_v30 }
 0x415   : > { %3642 = vrot.lane.b32.xlu0 %v3430_v53, %s6886_s11  ;;  %v4815_v43 = vpop.permute.xlu1 %4814  ;;  %v3440_v53 = vld [vmem:[#allocation3 + $0x16a] sm:$0xff] }
 0x416   : > { %v4917_v32 = vsel %vm1081_vm5, %v4885_v7, %v4815_v43  ;;  %v720_v43 = vld [vmem:[#allocation2 + $0x1a1] sm:$0xff] }
 0x417   : > { %v4813_v59 = vpop.permute.xlu0 %4812  ;;  %3520 = vrot.lane.b32.xlu1 %v3401_v16, %s6887_s12  ;;  %v3349_v7 = vld [vmem:[#allocation3 + $0x20] sm:$0xff] }
 0x418   : > { %v4916_v9 = vsel %vm1081_vm5, %v4884_v19, %v4813_v59  ;;  %v3348_v19 = vld [vmem:[#allocation3 + $0x18] sm:$0xff] }
 0x419   : > { %3518 = vrot.lane.b32.xlu0 %v3400_v3, %s6887_s12  ;;  %6602 = vmatprep.mubr.msk.f32.mxu1 %vm1592_vm6, %v4916_v9  ;;  %v4691_v63 = vpop.permute.xlu1 %4690  ;;  %v719_v59 = vld [vmem:[#allocation2 + $0x199] sm:$0xff] }
 0x41a   : > { %6603 = vmatmul.mubr.msk.f32.gmra.mrb[30].mxu1 %vm1592_vm6, %v4917_v32  ;;  %v4887_v10 = vsel %vm457_vm0, %v8810_v33, %v4691_v63 }
 0x41b   : > { %v4689_v48 = vpop.permute.xlu0 %4688  ;;  %3648 = vrot.lane.b32.xlu1 %v3433_v34, %s6886_s11  ;;  %v756_v34 = vld [vmem:[#allocation2 + $0x1a2] sm:$0xff] }
 0x41c   : > { %v4886_v36 = vsel %vm457_vm0, %v8806_v5, %v4689_v48 }
 0x41d   : > { %3646 = vrot.lane.b32.xlu0 %v3432_v13, %s6886_s11  ;;  %v4819_v38 = vpop.permute.xlu1 %4818 }
 0x41e   : > { %v4919_v42 = vsel %vm1081_vm5, %v4887_v10, %v4819_v38  ;;  %v755_v38 = vld [vmem:[#allocation2 + $0x19a] sm:$0xff] }
 0x41f   : > { %v4817_v44 = vpop.permute.xlu0 %4816  ;;  %3524 = vrot.lane.b32.xlu1 %v3403_v8, %s6887_s12  ;;  %v3351_v10 = vld [vmem:[#allocation3 + $0x38] sm:$0xff] }
 0x420   : > { %v4918_v6 = vsel %vm1081_vm5, %v4886_v36, %v4817_v44  ;;  %v3350_v44 = vld [vmem:[#allocation3 + $0x30] sm:$0xff] }
 0x421   : > { %3522 = vrot.lane.b32.xlu0 %v3402_v24, %s6887_s12  ;;  %6605 = vmatprep.mubr.msk.f32.mxu1 %vm1592_vm6, %v4918_v6  ;;  %v4695_v0 = vpop.permute.xlu1 %4694 }
 0x422   : > { %6606 = vmatmul.mubr.msk.f32.gmra.mrb[32].mxu1 %vm1592_vm6, %v4919_v42  ;;  %v4889_v26 = vsel %vm457_vm0, %v8838_v1, %v4695_v0 }
 0x423   : > { %v4693_v5 = vpop.permute.xlu0 %4692  ;;  %3652 = vrot.lane.b32.xlu1 %v3435_v62, %s6886_s11 }
 0x424   : > { %v4888_v18 = vsel %vm457_vm0, %v8836_v29, %v4693_v5  ;;  %v4539_v29 = vld [vmem:[#allocation3 + $0x1a0] sm:$0xff] }
 0x425   : > { %3650 = vrot.lane.b32.xlu0 %v3434_v17, %s6886_s11  ;;  %v4823_v33 = vpop.permute.xlu1 %4822 }
 0x426   : > { %v4921_v55 = vsel %vm1081_vm5, %v4889_v26, %v4823_v33 }
 0x427   : > { %v4821_v40 = vpop.permute.xlu0 %4820  ;;  %3528 = vrot.lane.b32.xlu1 %v3405_v54, %s6887_s12  ;;  %v3352_v54 = vld [vmem:[#allocation3 + $0x48] sm:$0xff] }
 0x428   : > { %v4920_v21 = vsel %vm1081_vm5, %v4888_v18, %v4821_v40  ;;  %v3353_v18 = vld [vmem:[#allocation3 + $0x50] sm:$0xff] }
 0x429   : > { %3526 = vrot.lane.b32.xlu0 %v3404_v52, %s6887_s12  ;;  %6608 = vmatprep.mubr.msk.f32.mxu1 %vm1592_vm6, %v4920_v21  ;;  %v4699_v15 = vpop.permute.xlu1 %4698 }
 0x42a   : > { %6609 = vmatmul.mubr.msk.f32.gmra.mrb[34].mxu1 %vm1592_vm6, %v4921_v55  ;;  %v4891_v23 = vsel %vm457_vm0, %v4539_v29, %v4699_v15 }
 0x42b   : > { %v4697_v4 = vpop.permute.xlu0 %4696  ;;  %3656 = vrot.lane.b32.xlu1 %v3437_v22, %s6886_s11 }
 0x42c   : > { %v4890_v12 = vsel %vm457_vm0, %v4538_v58, %v4697_v4  ;;  %v3354_v4 = vld [vmem:[#allocation3 + $0x60] sm:$0xff]  ;;  %v3355_v58 = vld [vmem:[#allocation3 + $0x68] sm:$0xff] }
 0x42d   : > { %3654 = vrot.lane.b32.xlu0 %v3436_v39, %s6886_s11  ;;  %v4827_v1 = vpop.permute.xlu1 %4826 }
 0x42e   : > { %v4923_v50 = vsel %vm1081_vm5, %v4891_v23, %v4827_v1 }
 0x42f   : > { %v4825_v37 = vpop.permute.xlu0 %4824  ;;  %3532 = vrot.lane.b32.xlu1 %v3407_v45, %s6887_s12 }
 0x430   : > { %v4922_v49 = vsel %vm1081_vm5, %v4890_v12, %v4825_v37 }
 0x431   : > { %3530 = vrot.lane.b32.xlu0 %v3406_v31, %s6887_s12  ;;  %6611 = vmatprep.mubr.msk.f32.mxu1 %vm1592_vm6, %v4922_v49  ;;  %v3477_v47 = vpop.permute.xlu1 %3476 }
 0x432   : > { %6612 = vmatmul.mubr.msk.f32.gmra.mrb[36].mxu1 %vm1592_vm6, %v4923_v50  ;;  %v3699_v20 = vsel %vm457_vm0, %v3347_v41, %v3477_v47  ;;  %v3356_v50 = vld [vmem:[#allocation3 + $0x78] sm:$0xff]  ;;  %v3357_v47 = vld [vmem:[#allocation3 + $0x80] sm:$0xff] }
 0x433   : > { %v3475_v28 = vpop.permute.xlu0 %3474  ;;  %3660 = vrot.lane.b32.xlu1 %v3439_v25, %s6886_s11 }
 0x434   : > { %v3698_v27 = vsel %vm457_vm0, %v3346_v35, %v3475_v28 }
 0x435   : > { %3658 = vrot.lane.b32.xlu0 %v3438_v56, %s6886_s11  ;;  %v3605_v60 = vpop.permute.xlu1 %3604 }
 0x436   : > { %v3731_v61 = vsel %vm1081_vm5, %v3699_v20, %v3605_v60 }
 0x437   : > { %v3603_v11 = vpop.permute.xlu0 %3602  ;;  %3536 = vrot.lane.b32.xlu1 %v3409_v14, %s6887_s12 }
 0x438   : > { %v3730_v57 = vsel %vm1081_vm5, %v3698_v27, %v3603_v11  ;;  %v3358_v27 = vld [vmem:[#allocation3 + $0x90] sm:$0xff]  ;;  %v3359_v11 = vld [vmem:[#allocation3 + $0x98] sm:$0xff] }
 0x439   : > { %6618 = vmatprep.mubr.msk.f32.mxu1 %vm1592_vm6, %v3730_v57  ;;  %3534 = vrot.lane.b32.xlu0 %v3408_v2, %s6887_s12  ;;  %v3481_v51 = vpop.permute.xlu1 %3480 }
 0x43a   : > { %6619 = vmatmul.mubr.msk.f32.vlgmr.msra.gmra.mrb[6].mxu1 %vm1592_vm6, %v3731_v61  ;;  %v3701_v32 = vsel %vm457_vm0, %v3349_v7, %v3481_v51 }
 0x43b   : > { %v3479_v30 = vpop.permute.xlu0 %3478  ;;  %3664 = vrot.lane.b32.xlu1 %v3441_v46, %s6886_s11 }
 0x43c   : > { %v3700_v9 = vsel %vm457_vm0, %v3348_v19, %v3479_v30  ;;  %v3361_v19 = vld [vmem:[#allocation3 + $0xb0] sm:$0xff] }
 0x43d   : > { %3662 = vrot.lane.b32.xlu0 %v3440_v53, %s6886_s11  ;;  %v3609_v16 = vpop.permute.xlu1 %3608 }
 0x43e   : > { %v3733_v48 = vsel %vm1081_vm5, %v3701_v32, %v3609_v16  ;;  %v3360_v16 = vld [vmem:[#allocation3 + $0xa8] sm:$0xff] }
 0x43f   : > { %v3607_v3 = vpop.permute.xlu0 %3606  ;;  %863 = vrot.lane.b32.xlu1 %v720_v43, %s6887_s12 }
 0x440   : > { %v3732_v63 = vsel %vm1081_vm5, %v3700_v9, %v3607_v3 }
 0x441   : > { %6621 = vmatprep.mubr.msk.f32.mxu1 %vm1592_vm6, %v3732_v63  ;;  %861 = vrot.lane.b32.xlu0 %v719_v59, %s6887_s12  ;;  %v3485_v13 = vpop.permute.xlu1 %3484 }
 0x442   : > { %6622 = vmatmul.mubr.msk.f32.gmra.mrb[8].mxu1 %vm1592_vm6, %v3733_v48  ;;  %v3703_v42 = vsel %vm457_vm0, %v3351_v10, %v3485_v13  ;;  %v3362_v13 = vld [vmem:[#allocation3 + $0xc0] sm:$0xff] }
 0x443   : > { %v3483_v8 = vpop.permute.xlu0 %3482  ;;  %1007 = vrot.lane.b32.xlu1 %v756_v34, %s6886_s11 }
 0x444   : > { %v3702_v6 = vsel %vm457_vm0, %v3350_v44, %v3483_v8 }
 0x445   : > { %1005 = vrot.lane.b32.xlu0 %v755_v38, %s6886_s11  ;;  %v3613_v36 = vpop.permute.xlu1 %3612  ;;  %v3363_v38 = vld [vmem:[#allocation3 + $0xc8] sm:$0xff] }
 0x446   : > { %v3735_v62 = vsel %vm1081_vm5, %v3703_v42, %v3613_v36 }
 0x447   : > { %v3611_v24 = vpop.permute.xlu0 %3610 }
 0x448   : > { %v3734_v0 = vsel %vm1081_vm5, %v3702_v6, %v3611_v24 }
 0x449   : > { %6624 = vmatprep.mubr.msk.f32.mxu1 %vm1592_vm6, %v3734_v0  ;;  %v3489_v5 = vpop.permute.xlu1 %3488 }
 0x44a   : > { %6625 = vmatmul.mubr.msk.f32.gmra.mrb[10].mxu1 %vm1592_vm6, %v3735_v62  ;;  %v3705_v21 = vsel %vm457_vm0, %v3353_v18, %v3489_v5  ;;  %v3364_v62 = vld [vmem:[#allocation3 + $0xd8] sm:$0xff]  ;;  %v3365_v5 = vld [vmem:[#allocation3 + $0xe0] sm:$0xff] }
 0x44b   : > { %v3487_v17 = vpop.permute.xlu0 %3486 }
 0x44c   : > { %v3704_v40 = vsel %vm457_vm0, %v3352_v54, %v3487_v17 }
 0x44d   : > { %v3617_v33 = vpop.permute.xlu1 %3616 }
 0x44e   : > { %v3737_v55 = vsel %vm1081_vm5, %v3705_v21, %v3617_v33 }
 0x44f   : > { %v3615_v26 = vpop.permute.xlu0 %3614 }
 0x450   : > { %v3736_v52 = vsel %vm1081_vm5, %v3704_v40, %v3615_v26 }
 0x451   : > { %6627 = vmatprep.mubr.msk.f32.mxu1 %vm1592_vm6, %v3736_v52  ;;  %v3493_v15 = vpop.permute.xlu1 %3492 }
 0x452   : > { %6628 = vmatmul.mubr.msk.f32.gmra.mrb[12].mxu1 %vm1592_vm6, %v3737_v55  ;;  %v3707_v23 = vsel %vm457_vm0, %v3355_v58, %v3493_v15  ;;  %v3366_v55 = vld [vmem:[#allocation3 + $0xf0] sm:$0xff]  ;;  %v3367_v15 = vld [vmem:[#allocation3 + $0xf8] sm:$0xff] }
 0x453   : > { %v3491_v22 = vpop.permute.xlu0 %3490 }
 0x454   : > { %v3706_v39 = vsel %vm457_vm0, %v3354_v4, %v3491_v22 }
 0x455   : > { %v3621_v29 = vpop.permute.xlu1 %3620 }
 0x456   : > { %v3739_v12 = vsel %vm1081_vm5, %v3707_v23, %v3621_v29 }
 0x457   : > { %v3619_v1 = vpop.permute.xlu0 %3618 }
 0x458   : > { %v3738_v45 = vsel %vm1081_vm5, %v3706_v39, %v3619_v1 }
 0x459   : > { %6630 = vmatprep.mubr.msk.f32.mxu1 %vm1592_vm6, %v3738_v45  ;;  %v3497_v37 = vpop.permute.xlu1 %3496 }
 0x45a   : > { %6631 = vmatmul.mubr.msk.f32.gmra.mrb[14].mxu1 %vm1592_vm6, %v3739_v12  ;;  %v3709_v28 = vsel %vm457_vm0, %v3357_v47, %v3497_v37  ;;  %v3368_v12 = vld [vmem:[#allocation3 + $0x108] sm:$0xff]  ;;  %v3369_v37 = vld [vmem:[#allocation3 + $0x110] sm:$0xff] }
 0x45b   : > { %v3495_v49 = vpop.permute.xlu0 %3494 }
 0x45c   : > { %v3708_v25 = vsel %vm457_vm0, %v3356_v50, %v3495_v49 }
 0x45d   : > { %v3625_v31 = vpop.permute.xlu1 %3624 }
 0x45e   : > { %v3741_v56 = vsel %vm1081_vm5, %v3709_v28, %v3625_v31 }
 0x45f   : > { %v3623_v41 = vpop.permute.xlu0 %3622 }
 0x460   : > { %v3740_v35 = vsel %vm1081_vm5, %v3708_v25, %v3623_v41 }
 0x461   : > { %6633 = vmatprep.mubr.msk.f32.mxu1 %vm1592_vm6, %v3740_v35  ;;  %v3501_v60 = vpop.permute.xlu1 %3500 }
 0x462   : > { %6634 = vmatmul.mubr.msk.f32.gmra.mrb[16].mxu1 %vm1592_vm6, %v3741_v56  ;;  %v3711_v61 = vsel %vm457_vm0, %v3359_v11, %v3501_v60  ;;  %v3370_v56 = vld [vmem:[#allocation3 + $0x120] sm:$0xff]  ;;  %v3371_v60 = vld [vmem:[#allocation3 + $0x128] sm:$0xff] }
 0x463   : > { %v3499_v20 = vpop.permute.xlu0 %3498 }
 0x464   : > { %v3710_v57 = vsel %vm457_vm0, %v3358_v27, %v3499_v20 }
 0x465   : > { %v3629_v14 = vpop.permute.xlu1 %3628 }
 0x466   : > { %v3743_v46 = vsel %vm1081_vm5, %v3711_v61, %v3629_v14 }
 0x467   : > { %v3627_v2 = vpop.permute.xlu0 %3626 }
 0x468   : > { %v3742_v51 = vsel %vm1081_vm5, %v3710_v57, %v3627_v2 }
 0x469   : > { %6636 = vmatprep.mubr.msk.f32.mxu1 %vm1592_vm6, %v3742_v51  ;;  %v3505_v30 = vpop.permute.xlu1 %3504 }
 0x46a   : > { %6637 = vmatmul.mubr.msk.f32.gmra.mrb[18].mxu1 %vm1592_vm6, %v3743_v46  ;;  %v3713_v9 = vsel %vm457_vm0, %v3361_v19, %v3505_v30  ;;  %v3372_v46 = vld [vmem:[#allocation3 + $0x138] sm:$0xff]  ;;  %v3373_v30 = vld [vmem:[#allocation3 + $0x140] sm:$0xff] }
 0x46b   : > { %v3503_v53 = vpop.permute.xlu0 %3502 }
 0x46c   : > { %v3712_v59 = vsel %vm457_vm0, %v3360_v16, %v3503_v53 }
 0x46d   : > { %v3633_v43 = vpop.permute.xlu1 %3632 }
 0x46e   : > { %v3745_v32 = vsel %vm1081_vm5, %v3713_v9, %v3633_v43 }
 0x46f   : > { %v3631_v7 = vpop.permute.xlu0 %3630 }
 0x470   : > { %v3744_v3 = vsel %vm1081_vm5, %v3712_v59, %v3631_v7 }
 0x471   : > { %6639 = vmatprep.mubr.msk.f32.mxu1 %vm1592_vm6, %v3744_v3  ;;  %v3509_v63 = vpop.permute.xlu1 %3508 }
 0x472   : > { %6640 = vmatmul.mubr.msk.f32.gmra.mrb[20].mxu1 %vm1592_vm6, %v3745_v32  ;;  %v3715_v44 = vsel %vm457_vm0, %v3363_v38, %v3509_v63  ;;  %v3374_v32 = vld [vmem:[#allocation3 + $0x150] sm:$0xff]  ;;  %v3375_v63 = vld [vmem:[#allocation3 + $0x158] sm:$0xff] }
 0x473   : > { %v3507_v34 = vpop.permute.xlu0 %3506 }
 0x474   : > { %v3714_v8 = vsel %vm457_vm0, %v3362_v13, %v3507_v34 }
 0x475   : > { %v3637_v48 = vpop.permute.xlu1 %3636 }
 0x476   : > { %v3747_v6 = vsel %vm1081_vm5, %v3715_v44, %v3637_v48 }
 0x477   : > { %v3635_v36 = vpop.permute.xlu0 %3634 }
 0x478   : > { %v3746_v10 = vsel %vm1081_vm5, %v3714_v8, %v3635_v36 }
 0x479   : > { %6642 = vmatprep.mubr.msk.f32.mxu1 %vm1592_vm6, %v3746_v10  ;;  %v3513_v24 = vpop.permute.xlu1 %3512 }
 0x47a   : > { %6643 = vmatmul.mubr.msk.f32.gmra.mrb[22].mxu1 %vm1592_vm6, %v3747_v6  ;;  %v3717_v54 = vsel %vm457_vm0, %v3365_v5, %v3513_v24  ;;  %v3376_v6 = vld [vmem:[#allocation3 + $0x168] sm:$0xff]  ;;  %v3377_v24 = vld [vmem:[#allocation3 + $0x170] sm:$0xff] }
 0x47b   : > { %v3511_v42 = vpop.permute.xlu0 %3510 }
 0x47c   : > { %v3716_v17 = vsel %vm457_vm0, %v3364_v62, %v3511_v42 }
 0x47d   : > { %v3641_v0 = vpop.permute.xlu1 %3640 }
 0x47e   : > { %v3749_v40 = vsel %vm1081_vm5, %v3717_v54, %v3641_v0  ;;  %v684_v54 = vld [vmem:[#allocation2 + $0x1a0] sm:$0xff] }
 0x47f   : > { %v3639_v33 = vpop.permute.xlu0 %3638 }
 0x480   : > { %v3748_v18 = vsel %vm1081_vm5, %v3716_v17, %v3639_v33 }
 0x481   : > { %6645 = vmatprep.mubr.msk.f32.mxu1 %vm1592_vm6, %v3748_v18  ;;  %v3517_v26 = vpop.permute.xlu1 %3516 }
 0x482   : > { %6646 = vmatmul.mubr.msk.f32.gmra.mrb[24].mxu1 %vm1592_vm6, %v3749_v40  ;;  %v3719_v4 = vsel %vm457_vm0, %v3367_v15, %v3517_v26  ;;  %v683_v40 = vld [vmem:[#allocation2 + $0x198] sm:$0xff] }
 0x483   : > { %v3515_v21 = vpop.permute.xlu0 %3514 }
 0x484   : > { %v3718_v22 = vsel %vm457_vm0, %v3366_v55, %v3515_v21 }
 0x485   : > { %v3645_v52 = vpop.permute.xlu1 %3644 }
 0x486   : > { %v3751_v39 = vsel %vm1081_vm5, %v3719_v4, %v3645_v52 }
 0x487   : > { %v3643_v29 = vpop.permute.xlu0 %3642 }
 0x488   : > { %v3750_v58 = vsel %vm1081_vm5, %v3718_v22, %v3643_v29  ;;  %v9167_v29 = vld [vmem:[%s9319_s6] ss:$0 sm:$0xff] }
 0x489   : > { %6648 = vmatprep.mubr.msk.f32.mxu1 %vm1592_vm6, %v3750_v58  ;;  %v3521_v1 = vpop.permute.xlu1 %3520  ;;  %v5647_v58 = vld [vmem:[%s7207_s10 + $0x8] sm:$0xff] }
 0x48a   : > { %6649 = vmatmul.mubr.msk.f32.gmra.mrb[26].mxu1 %vm1592_vm6, %v3751_v39  ;;  %v3721_v50 = vsel %vm457_vm0, %v3369_v37, %v3521_v1 }
 0x48b   : > { %v3519_v23 = vpop.permute.xlu0 %3518 }
 0x48c   : > { %v3720_v49 = vsel %vm457_vm0, %v3368_v12, %v3519_v23  ;;  %v5646_v23 = vld [vmem:[%s7207_s10] sm:$0xff] }
 0x48d   : > { %v3649_v45 = vpop.permute.xlu1 %3648 }
 0x48e   : > { %v3753_v25 = vsel %vm1081_vm5, %v3721_v50, %v3649_v45 }
 0x48f   : > { %v3647_v31 = vpop.permute.xlu0 %3646 }
 0x490   : > { %v3752_v47 = vsel %vm1081_vm5, %v3720_v49, %v3647_v31  ;;  %v5649_v31 = vld [vmem:[%s7207_s10 + $0x18] sm:$0xff] }
 0x491   : > { %6651 = vmatprep.mubr.msk.f32.mxu1 %vm1592_vm6, %v3752_v47  ;;  %v3525_v41 = vpop.permute.xlu1 %3524 }
 0x492   : > { %6652 = vmatmul.mubr.msk.f32.gmra.mrb[28].mxu1 %vm1592_vm6, %v3753_v25  ;;  %v3723_v27 = vsel %vm457_vm0, %v3371_v60, %v3525_v41  ;;  %v5648_v25 = vld [vmem:[%s7207_s10 + $0x10] sm:$0xff]  ;;  %v5651_v60 = vld [vmem:[%s7207_s10 + $0x28] sm:$0xff] }
 0x493   : > { %v3523_v28 = vpop.permute.xlu0 %3522 }
 0x494   : > { %v3722_v20 = vsel %vm457_vm0, %v3370_v56, %v3523_v28 }
 0x495   : > { %v3653_v35 = vpop.permute.xlu1 %3652 }
 0x496   : > { %v3755_v57 = vsel %vm1081_vm5, %v3723_v27, %v3653_v35  ;;  %v5650_v27 = vld [vmem:[%s7207_s10 + $0x20] sm:$0xff] }
 0x497   : > { %v3651_v14 = vpop.permute.xlu0 %3650 }
 0x498   : > { %v3754_v11 = vsel %vm1081_vm5, %v3722_v20, %v3651_v14 }
 0x499   : > { %6654 = vmatprep.mubr.msk.f32.mxu1 %vm1592_vm6, %v3754_v11  ;;  %v3529_v2 = vpop.permute.xlu1 %3528 }
 0x49a   : > { %6655 = vmatmul.mubr.msk.f32.gmra.mrb[30].mxu1 %vm1592_vm6, %v3755_v57  ;;  %v3725_v16 = vsel %vm457_vm0, %v3373_v30, %v3529_v2 }
 0x49b   : > { %v3527_v61 = vpop.permute.xlu0 %3526 }
 0x49c   : > { %v3724_v53 = vsel %vm457_vm0, %v3372_v46, %v3527_v61 }
 0x49d   : > { %v3657_v51 = vpop.permute.xlu1 %3656 }
 0x49e   : > { %v3757_v59 = vsel %vm1081_vm5, %v3725_v16, %v3657_v51  ;;  %v5653_v51 = vld [vmem:[%s7207_s10 + $0x38] sm:$0xff] }
 0x49f   : > { %v3655_v43 = vpop.permute.xlu0 %3654 }
 0x4a0   : > { %v3756_v19 = vsel %vm1081_vm5, %v3724_v53, %v3655_v43  ;;  %v5652_v53 = vld [vmem:[%s7207_s10 + $0x30] sm:$0xff] }
 0x4a1   : > { %6657 = vmatprep.mubr.msk.f32.mxu1 %vm1592_vm6, %v3756_v19  ;;  %v3533_v7 = vpop.permute.xlu1 %3532 }
 0x4a2   : > { %6658 = vmatmul.mubr.msk.f32.gmra.mrb[32].mxu1 %vm1592_vm6, %v3757_v59  ;;  %v3727_v13 = vsel %vm457_vm0, %v3375_v63, %v3533_v7  ;;  %v5655_v7 = vld [vmem:[%s7207_s10 + $0x48] sm:$0xff] }
 0x4a3   : > { %v3531_v9 = vpop.permute.xlu0 %3530 }
 0x4a4   : > { %v3726_v34 = vsel %vm457_vm0, %v3374_v32, %v3531_v9  ;;  %v5654_v32 = vld [vmem:[%s7207_s10 + $0x40] sm:$0xff] }
 0x4a5   : > { %v3661_v3 = vpop.permute.xlu1 %3660 }
 0x4a6   : > { %v3759_v8 = vsel %vm1081_vm5, %v3727_v13, %v3661_v3 }
 0x4a7   : > { %v3659_v48 = vpop.permute.xlu0 %3658 }
 0x4a8   : > { %v3758_v38 = vsel %vm1081_vm5, %v3726_v34, %v3659_v48 }
 0x4a9   : > { %6660 = vmatprep.mubr.msk.f32.mxu1 %vm1592_vm6, %v3758_v38  ;;  %v3537_v36 = vpop.permute.xlu1 %3536  ;;  %v5657_v38 = vld [vmem:[%s7207_s10 + $0x58] sm:$0xff] }
 0x4aa   : > { %6661 = vmatmul.mubr.msk.f32.gmra.mrb[34].mxu1 %vm1592_vm6, %v3759_v8  ;;  %v3729_v62 = vsel %vm457_vm0, %v3377_v24, %v3537_v36 }
 0x4ab   : > { %v3535_v44 = vpop.permute.xlu0 %3534 }
 0x4ac   : > { %v3728_v42 = vsel %vm457_vm0, %v3376_v6, %v3535_v44  ;;  %v5656_v44 = vld [vmem:[%s7207_s10 + $0x50] sm:$0xff] }
 0x4ad   : > { %v3665_v10 = vpop.permute.xlu1 %3664 }
 0x4ae   : > { %v3761_v17 = vsel %vm1081_vm5, %v3729_v62, %v3665_v10 }
 0x4af   : > { %v3663_v0 = vpop.permute.xlu0 %3662 }
 0x4b0   : > { %v3760_v5 = vsel %vm1081_vm5, %v3728_v42, %v3663_v0  ;;  %v5659_v0 = vld [vmem:[%s7207_s10 + $0x68] sm:$0xff] }
 0x4b1   : > { %6663 = vmatprep.mubr.msk.f32.mxu1 %vm1592_vm6, %v3760_v5  ;;  %v864_v33 = vpop.permute.xlu1 %863 }
 0x4b2   : > { %6664 = vmatmul.mubr.msk.f32.gmra.mrb[36].mxu1 %vm1592_vm6, %v3761_v17  ;;  %v1080_v26 = vsel %vm457_vm0, %v684_v54, %v864_v33  ;;  %v5658_v17 = vld [vmem:[%s7207_s10 + $0x60] sm:$0xff] }
 0x4b3   : > { %v862_v18 = vpop.permute.xlu0 %861 }
 0x4b4   : > { %v1079_v52 = vsel %vm457_vm0, %v683_v40, %v862_v18 }
 0x4b5   : > { %v1008_v21 = vpop.permute.xlu1 %1007 }
 0x4b6   : > { %v1117_v22 = vsel %vm1081_vm5, %v1080_v26, %v1008_v21  ;;  %v5661_v26 = vld [vmem:[%s7207_s10 + $0x78] sm:$0xff] }
 0x4b7   : > { %v1006_v55 = vpop.permute.xlu0 %1005 }
 0x4b8   : > { %v1116_v15 = vsel %vm1081_vm5, %v1079_v52, %v1006_v55  ;;  %v5660_v55 = vld [vmem:[%s7207_s10 + $0x70] sm:$0xff] }
 0x4b9   : > { %6507 = vmatprep.mubr.msk.f32.mxu0 %vm1592_vm6, %v1116_v15 }
 0x4ba   : > { %6508 = vmatmul.mubr.msk.f32.gmra.mrb[40].mxu0 %vm1592_vm6, %v1117_v22 }
 0x50d   : > { %v6620_v4 = vpop.f32.mrb[6].mxu1 }
 0x50e   : > { %v5615_v39 = vadd.f32 %v6620_v4, %v9167_v29  ;;  %v5416_v1 = vpop.f32.mrb[7].mxu1 }
 0x50f   : > { %v5614_v45 = vadd.f32 %v9167_v29, %v5416_v1 }
 0x510   : > { %v5679_v12 = vadd.f32 %v5647_v58, %v5615_v39  ;;  %v5663_v39 = vld [vmem:[%s7207_s10 + $0x88] sm:$0xff] }
 0x511   : > { %v5678_v37 = vadd.f32 %v5646_v23, %v5614_v45  ;;  %v5662_v45 = vld [vmem:[%s7207_s10 + $0x80] sm:$0xff] }
 0x512   : > { %5711 = vst.msk [vmem:[%s9177_s20 + $0x8] sm:$0xff] %vm457_vm0, %v5679_v12 }
 0x513   : > { %5710 = vst.msk [vmem:[%s9177_s20] sm:$0xff] %vm457_vm0, %v5678_v37 }
 0x515   : > { %v6623_v49 = vpop.f32.mrb[8].mxu1 }
 0x516   : > { %v5617_v50 = vadd.f32 %v6623_v49, %v9167_v29  ;;  %v5426_v47 = vpop.f32.mrb[9].mxu1 }
 0x517   : > { %v5616_v41 = vadd.f32 %v9167_v29, %v5426_v47 }
 0x518   : > { %v5681_v28 = vadd.f32 %v5649_v31, %v5617_v50  ;;  %v5665_v50 = vld [vmem:[%s7207_s10 + $0x98] sm:$0xff] }
 0x519   : > { %v5680_v35 = vadd.f32 %v5648_v25, %v5616_v41  ;;  %v5664_v41 = vld [vmem:[%s7207_s10 + $0x90] sm:$0xff] }
 0x51a   : > { %5713 = vst.msk [vmem:[%s9177_s20 + $0x18] sm:$0xff] %vm457_vm0, %v5681_v28 }
 0x51b   : > { %5712 = vst.msk [vmem:[%s9177_s20 + $0x10] sm:$0xff] %vm457_vm0, %v5680_v35 }
 0x51d   : > { %v6626_v56 = vpop.f32.mrb[10].mxu1 }
 0x51e   : > { %v5619_v20 = vadd.f32 %v6626_v56, %v9167_v29  ;;  %v5436_v14 = vpop.f32.mrb[11].mxu1 }
 0x51f   : > { %v5618_v11 = vadd.f32 %v9167_v29, %v5436_v14 }
 0x520   : > { %v5683_v57 = vadd.f32 %v5651_v60, %v5619_v20  ;;  %v5667_v20 = vld [vmem:[%s7207_s10 + $0xa8] sm:$0xff] }
 0x521   : > { %v5682_v2 = vadd.f32 %v5650_v27, %v5618_v11  ;;  %v5666_v11 = vld [vmem:[%s7207_s10 + $0xa0] sm:$0xff] }
 0x522   : > { %5715 = vst.msk [vmem:[%s9177_s20 + $0x28] sm:$0xff] %vm457_vm0, %v5683_v57 }
 0x523   : > { %5714 = vst.msk [vmem:[%s9177_s20 + $0x20] sm:$0xff] %vm457_vm0, %v5682_v2 }
 0x525   : > { %v6629_v61 = vpop.f32.mrb[12].mxu1 }
 0x526   : > { %v5621_v46 = vadd.f32 %v6629_v61, %v9167_v29  ;;  %v5446_v30 = vpop.f32.mrb[13].mxu1 }
 0x527   : > { %v5620_v43 = vadd.f32 %v9167_v29, %v5446_v30 }
 0x528   : > { %v5685_v16 = vadd.f32 %v5653_v51, %v5621_v46  ;;  %v5669_v46 = vld [vmem:[%s7207_s10 + $0xb8] sm:$0xff] }
 0x529   : > { %v5684_v19 = vadd.f32 %v5652_v53, %v5620_v43  ;;  %v5668_v43 = vld [vmem:[%s7207_s10 + $0xb0] sm:$0xff] }
 0x52a   : > { %5717 = vst.msk [vmem:[%s9177_s20 + $0x38] sm:$0xff] %vm457_vm0, %v5685_v16 }
 0x52b   : > { %5716 = vst.msk [vmem:[%s9177_s20 + $0x30] sm:$0xff] %vm457_vm0, %v5684_v19 }
 0x52d   : > { %v6632_v59 = vpop.f32.mrb[14].mxu1 }
 0x52e   : > { %v5623_v9 = vadd.f32 %v6632_v59, %v9167_v29  ;;  %v5456_v3 = vpop.f32.mrb[15].mxu1 }
 0x52f   : > { %v5622_v63 = vadd.f32 %v9167_v29, %v5456_v3 }
 0x530   : > { %v5687_v34 = vadd.f32 %v5655_v7, %v5623_v9  ;;  %v5671_v9 = vld [vmem:[%s7207_s10 + $0xc8] sm:$0xff] }
 0x531   : > { %v5686_v48 = vadd.f32 %v5654_v32, %v5622_v63  ;;  %v5670_v63 = vld [vmem:[%s7207_s10 + $0xc0] sm:$0xff] }
 0x532   : > { %5719 = vst.msk [vmem:[%s9177_s20 + $0x48] sm:$0xff] %vm457_vm0, %v5687_v34 }
 0x533   : > { %5718 = vst.msk [vmem:[%s9177_s20 + $0x40] sm:$0xff] %vm457_vm0, %v5686_v48 }
 0x535   : > { %v6635_v13 = vpop.f32.mrb[16].mxu1 }
 0x536   : > { %v5625_v8 = vadd.f32 %v6635_v13, %v9167_v29  ;;  %v5466_v36 = vpop.f32.mrb[17].mxu1 }
 0x537   : > { %v5624_v10 = vadd.f32 %v9167_v29, %v5466_v36 }
 0x538   : > { %v5689_v6 = vadd.f32 %v5657_v38, %v5625_v8  ;;  %v5673_v8 = vld [vmem:[%s7207_s10 + $0xd8] sm:$0xff] }
 0x539   : > { %v5688_v24 = vadd.f32 %v5656_v44, %v5624_v10  ;;  %v5672_v10 = vld [vmem:[%s7207_s10 + $0xd0] sm:$0xff] }
 0x53a   : > { %5721 = vst.msk [vmem:[%s9177_s20 + $0x58] sm:$0xff] %vm457_vm0, %v5689_v6 }
 0x53b   : > { %5720 = vst.msk [vmem:[%s9177_s20 + $0x50] sm:$0xff] %vm457_vm0, %v5688_v24 }
 0x53d   : > { %v6638_v42 = vpop.f32.mrb[18].mxu1 }
 0x53e   : > { %v5627_v62 = vadd.f32 %v6638_v42, %v9167_v29  ;;  %v5476_v5 = vpop.f32.mrb[19].mxu1 }
 0x53f   : > { %v5626_v33 = vadd.f32 %v9167_v29, %v5476_v5 }
 0x540   : > { %v5691_v54 = vadd.f32 %v5659_v0, %v5627_v62  ;;  %v5675_v62 = vld [vmem:[%s7207_s10 + $0xe8] sm:$0xff] }
 0x541   : > { %v5690_v18 = vadd.f32 %v5658_v17, %v5626_v33  ;;  %v5674_v33 = vld [vmem:[%s7207_s10 + $0xe0] sm:$0xff] }
 0x542   : > { %5723 = vst.msk [vmem:[%s9177_s20 + $0x68] sm:$0xff] %vm457_vm0, %v5691_v54 }
 0x543   : > { %5722 = vst.msk [vmem:[%s9177_s20 + $0x60] sm:$0xff] %vm457_vm0, %v5690_v18 }
 0x545   : > { %v6641_v40 = vpop.f32.mrb[20].mxu1 }
 0x546   : > { %v5629_v21 = vadd.f32 %v6641_v40, %v9167_v29  ;;  %v5486_v52 = vpop.f32.mrb[21].mxu1 }
 0x547   : > { %v5628_v15 = vadd.f32 %v9167_v29, %v5486_v52 }
 0x548   : > { %v5693_v22 = vadd.f32 %v5661_v26, %v5629_v21  ;;  %v5677_v21 = vld [vmem:[%s7207_s10 + $0xf8] sm:$0xff] }
 0x549   : > { %v5692_v4 = vadd.f32 %v5660_v55, %v5628_v15  ;;  %v5676_v15 = vld [vmem:[%s7207_s10 + $0xf0] sm:$0xff] }
 0x54a   : > { %5725 = vst.msk [vmem:[%s9177_s20 + $0x78] sm:$0xff] %vm457_vm0, %v5693_v22 }
 0x54b   : > { %5724 = vst.msk [vmem:[%s9177_s20 + $0x70] sm:$0xff] %vm457_vm0, %v5692_v4 }
 0x54d   : > { %v6644_v58 = vpop.f32.mrb[22].mxu1 }
 0x54e   : > { %v5631_v1 = vadd.f32 %v6644_v58, %v9167_v29  ;;  %v5496_v23 = vpop.f32.mrb[23].mxu1 }
 0x54f   : > { %v5630_v12 = vadd.f32 %v9167_v29, %v5496_v23 }
 0x550   : > { %v5695_v37 = vadd.f32 %v5663_v39, %v5631_v1 }
 0x551   : > { %v5694_v49 = vadd.f32 %v5662_v45, %v5630_v12 }
 0x552   : > { %5727 = vst.msk [vmem:[%s9177_s20 + $0x88] sm:$0xff] %vm457_vm0, %v5695_v37 }
 0x553   : > { %5726 = vst.msk [vmem:[%s9177_s20 + $0x80] sm:$0xff] %vm457_vm0, %v5694_v49 }
 0x555   : > { %v6647_v31 = vpop.f32.mrb[24].mxu1 }
 0x556   : > { %v5633_v47 = vadd.f32 %v6647_v31, %v9167_v29  ;;  %v5506_v25 = vpop.f32.mrb[25].mxu1 }
 0x557   : > { %v5632_v28 = vadd.f32 %v9167_v29, %v5506_v25 }
 0x558   : > { %v5697_v35 = vadd.f32 %v5665_v50, %v5633_v47 }
 0x559   : > { %v5696_v56 = vadd.f32 %v5664_v41, %v5632_v28 }
 0x55a   : > { %5729 = vst.msk [vmem:[%s9177_s20 + $0x98] sm:$0xff] %vm457_vm0, %v5697_v35 }
 0x55b   : > { %5728 = vst.msk [vmem:[%s9177_s20 + $0x90] sm:$0xff] %vm457_vm0, %v5696_v56 }
 0x55d   : > { %v6650_v60 = vpop.f32.mrb[26].mxu1 }
 0x55e   : > { %v5635_v14 = vadd.f32 %v6650_v60, %v9167_v29  ;;  %v5516_v27 = vpop.f32.mrb[27].mxu1 }
 0x55f   : > { %v5634_v57 = vadd.f32 %v9167_v29, %v5516_v27 }
 0x560   : > { %v5699_v2 = vadd.f32 %v5667_v20, %v5635_v14 }
 0x561   : > { %v5698_v61 = vadd.f32 %v5666_v11, %v5634_v57 }
 0x562   : > { %5731 = vst.msk [vmem:[%s9177_s20 + $0xa8] sm:$0xff] %vm457_vm0, %v5699_v2 }
 0x563   : > { %5730 = vst.msk [vmem:[%s9177_s20 + $0xa0] sm:$0xff] %vm457_vm0, %v5698_v61 }
 0x565   : > { %v6653_v51 = vpop.f32.mrb[28].mxu1 }
 0x566   : > { %v5637_v30 = vadd.f32 %v6653_v51, %v9167_v29  ;;  %v5526_v53 = vpop.f32.mrb[29].mxu1 }
 0x567   : > { %v5636_v16 = vadd.f32 %v9167_v29, %v5526_v53 }
 0x568   : > { %v5701_v19 = vadd.f32 %v5669_v46, %v5637_v30 }
 0x569   : > { %v5700_v59 = vadd.f32 %v5668_v43, %v5636_v16 }
 0x56a   : > { %5733 = vst.msk [vmem:[%s9177_s20 + $0xb8] sm:$0xff] %vm457_vm0, %v5701_v19 }
 0x56b   : > { %5732 = vst.msk [vmem:[%s9177_s20 + $0xb0] sm:$0xff] %vm457_vm0, %v5700_v59 }
 0x56d   : > { %v6656_v7 = vpop.f32.mrb[30].mxu1 }
 0x56e   : > { %v5639_v3 = vadd.f32 %v6656_v7, %v9167_v29  ;;  %v5536_v32 = vpop.f32.mrb[31].mxu1 }
 0x56f   : > { %v5638_v34 = vadd.f32 %v9167_v29, %v5536_v32 }
 0x570   : > { %v5703_v48 = vadd.f32 %v5671_v9, %v5639_v3 }
 0x571   : > { %v5702_v13 = vadd.f32 %v5670_v63, %v5638_v34 }
 0x572   : > { %5735 = vst.msk [vmem:[%s9177_s20 + $0xc8] sm:$0xff] %vm457_vm0, %v5703_v48 }
 0x573   : > { %5734 = vst.msk [vmem:[%s9177_s20 + $0xc0] sm:$0xff] %vm457_vm0, %v5702_v13 }
 0x575   : > { %v6659_v38 = vpop.f32.mrb[32].mxu1 }
 0x576   : > { %v5641_v36 = vadd.f32 %v6659_v38, %v9167_v29  ;;  %v5546_v44 = vpop.f32.mrb[33].mxu1 }
 0x577   : > { %v5640_v6 = vadd.f32 %v9167_v29, %v5546_v44 }
 0x578   : > { %v5705_v24 = vadd.f32 %v5673_v8, %v5641_v36 }
 0x579   : > { %v5704_v42 = vadd.f32 %v5672_v10, %v5640_v6 }
 0x57a   : > { %5737 = vst.msk [vmem:[%s9177_s20 + $0xd8] sm:$0xff] %vm457_vm0, %v5705_v24 }
 0x57b   : > { %5736 = vst.msk [vmem:[%s9177_s20 + $0xd0] sm:$0xff] %vm457_vm0, %v5704_v42 }
 0x57d   : > { %v6662_v0 = vpop.f32.mrb[34].mxu1 }
 0x57e   : > { %v5643_v5 = vadd.f32 %v6662_v0, %v9167_v29  ;;  %v5556_v17 = vpop.f32.mrb[35].mxu1 }
 0x57f   : > { %v5642_v54 = vadd.f32 %v9167_v29, %v5556_v17 }
 0x580   : > { %v5707_v18 = vadd.f32 %v5675_v62, %v5643_v5 }
 0x581   : > { %v5706_v40 = vadd.f32 %v5674_v33, %v5642_v54 }
 0x582   : > { %5739 = vst.msk [vmem:[%s9177_s20 + $0xe8] sm:$0xff] %vm457_vm0, %v5707_v18 }
 0x583   : > { %5738 = vst.msk [vmem:[%s9177_s20 + $0xe0] sm:$0xff] %vm457_vm0, %v5706_v40 }
 0x585   : > { %v6665_v26 = vpop.f32.mrb[36].mxu1 }
 0x586   : > { %v5645_v52 = vadd.f32 %v6665_v26, %v9167_v29  ;;  %v5566_v55 = vpop.f32.mrb[37].mxu1 }
 0x587   : > { %v5644_v22 = vadd.f32 %v9167_v29, %v5566_v55 }
 0x588   : > { %v5709_v4 = vadd.f32 %v5677_v21, %v5645_v52 }
 0x589   : > { %v5708_v58 = vadd.f32 %v5676_v15, %v5644_v22 }
 0x58a   : > { %5741 = vst.msk [vmem:[%s9177_s20 + $0xf8] sm:$0xff] %vm457_vm0, %v5709_v4 }
 0x58b   : > { %5740 = vst.msk [vmem:[%s9177_s20 + $0xf0] sm:$0xff] %vm457_vm0, %v5708_v58 }
 0x58d   : > { %v6509_v39 = vpop.f32.mrb[40].mxu0 }
 0x58e   : > { %v3124_v1 = vpop.f32.mrb[41].mxu0 }
 0x58f PF: > { %s17_s2 = sadd.s32 1, %s6882_s2   ;;  %s9368_s23 = smov %s6878_s24 }
 0x590   : > { %p14_p5 = scmp.ge.s32.totalorder %s17_s2, 4   ;;  %s9369_s24 = smov %s9371_s25 }
 0x592   :  { %16 = sbr.rel (!%p14_p5) target bundleno = 2 (0x2), region = 110 }

</bundles_post_ra>
